<compile_context>
chip_gen: v6e
topology: v6e:2x2x1
jax: 0.10.0
libtpu: 0.0.40
codegen_flags: <defaults>
</compile_context>

<pallas_src>
import functools

import jax
import jax.numpy as jnp
import numpy as np
from jax.experimental import pallas as pl
from jax.experimental.pallas import tpu as pltpu

INPUT_SIZE = 768
HIDDEN = 128
GATES = 4 * HIDDEN     # 512 (i, f, g, o)
OUT_PAD = 128          # padded logits width; real logits are the first 2 lanes


# ---------------------------------------------------------------------------
# Fused kernel: merged input projection + fwd closed-form step + bwd recurrence
# + classifier head
# ---------------------------------------------------------------------------
def _fused_kernel(before_ref, after_ref, wih_ref, bf_ref, bb_ref, whhb_ref,
                  w1_ref, b1_ref, w2_ref, b2_ref, out_ref, g_scratch,
                  *, batch, seq_len):
    H = HIDDEN
    I = INPUT_SIZE
    G = GATES
    two_b = 2 * batch

    # ---- one merged bf16 input projection: both directions, all time steps ----
    xb = before_ref[...].reshape(batch * seq_len, I).astype(jnp.bfloat16)
    xa = after_ref[...].reshape(batch * seq_len, I).astype(jnp.bfloat16)
    x2d = jnp.concatenate([xb, xa], axis=0)                   # (2B*T, I) bf16
    g_all = jnp.dot(x2d, wih_ref[...],
                    preferred_element_type=jnp.float32)       # (2B*T, 2G) f32
    g3 = g_all.reshape(two_b, seq_len, 2 * G)                 # (2B, T, 2G)

    # ---- forward direction: single closed-form step at t=0 (h0 = c0 = 0) ----
    gf = g3[:, 0, G:] + bf_ref[...]                           # (2B, G)
    i_f = jax.nn.sigmoid(gf[:, 0 * H:1 * H])
    g_f = jnp.tanh(gf[:, 2 * H:3 * H])
    o_f = jax.nn.sigmoid(gf[:, 3 * H:4 * H])
    h_fwd = o_f * jnp.tanh(i_f * g_f)                         # (2B, H)

    # ---- backward gate pre-activations -> VMEM scratch (bounds live ranges) ----
    g_scratch[...] = g3[:, :, :G] + bb_ref[...]               # (2B, T, G)

    # ---- backward recurrence t = T-1 .. 0; only final hidden is kept ----
    # TODO(synk): pin whh_b in the MXU weight registers across the 8 serial
    # steps via pltpu.matmul_push_rhs / matmul_acc_lhs / matmul_pop if the
    # bundle dump shows Mosaic re-pushing the RHS per unrolled step.
    h = jnp.zeros((two_b, H), jnp.float32)
    c = jnp.zeros((two_b, H), jnp.float32)
    for t in range(seq_len - 1, -1, -1):                      # static unroll, T small
        gates = g_scratch[:, t, :] + jnp.dot(
            h, whhb_ref[...], preferred_element_type=jnp.float32)
        i_g = jax.nn.sigmoid(gates[:, 0 * H:1 * H])
        f_g = jax.nn.sigmoid(gates[:, 1 * H:2 * H])
        g_g = jnp.tanh(gates[:, 2 * H:3 * H])
        o_g = jax.nn.sigmoid(gates[:, 3 * H:4 * H])
        c = f_g * c + i_g * g_g
        h = o_g * jnp.tanh(c)
    h_bwd = h                                                 # (2B, H)

    # ---- head: fold [before|after] x [fwd|bwd] combine into MXU accumulation ----
    # (no lane concats on 2-row operands; W1 row-blocks sliced straight off the ref)
    h1 = (jnp.dot(h_fwd[:batch], w1_ref[0 * H:1 * H, :],
                  preferred_element_type=jnp.float32)
          + jnp.dot(h_bwd[:batch], w1_ref[1 * H:2 * H, :],
                    preferred_element_type=jnp.float32)
          + jnp.dot(h_fwd[batch:], w1_ref[2 * H:3 * H, :],
                    preferred_element_type=jnp.float32)
          + jnp.dot(h_bwd[batch:], w1_ref[3 * H:4 * H, :],
                    preferred_element_type=jnp.float32)
          + b1_ref[...])
    h1 = jnp.maximum(h1, 0.0)                                 # ReLU; Dropout = identity (eval)
    out_ref[...] = (jnp.dot(h1, w2_ref[...], preferred_element_type=jnp.float32)
                    + b2_ref[...])                            # (B, OUT_PAD)


# ---------------------------------------------------------------------------
# Wrapper
# ---------------------------------------------------------------------------
@jax.jit
def patch_classifier_by_hunk(params, before, after):
    """before, after: (B, T, 768) float32, batch-first like PyTorch."""
    B, T, I = before.shape
    assert I == INPUT_SIZE and after.shape == before.shape

    vmem = pl.BlockSpec(memory_space=pltpu.MemorySpace.VMEM)
    logits_pad = pl.pallas_call(
        functools.partial(_fused_kernel, batch=B, seq_len=T),
        out_shape=jax.ShapeDtypeStruct((B, OUT_PAD), jnp.float32),
        in_specs=[vmem] * 10,
        out_specs=vmem,
        scratch_shapes=[pltpu.VMEM((2 * B, T, GATES), jnp.float32)],
    )(before, after,
      params["wih_merged_bf16"], params["b_f"], params["b_b"],
      params["whh_b_t"], params["w1_t"], params["b1"],
      params["w2_pad_t"], params["b2_pad"])
    # TODO(synk): if re-batched to large B in a serving loop, add a batch-tile
    # grid (weights with constant index_map) and mark it "parallel" for v7x's
    # two TensorCores; at B=2, T=8 a single fused call on one core is optimal.
    return logits_pad[:, :2]


# ---------------------------------------------------------------------------
# Deterministic parameter init (PyTorch-style uniform(-1/sqrt(H), 1/sqrt(H)))
# ---------------------------------------------------------------------------
def init_params(key):
    H, I = HIDDEN, INPUT_SIZE
    k = 1.0 / float(np.sqrt(H))
    keys = jax.random.split(key, 12)
    u = lambda kk, shape: jax.random.uniform(kk, shape, jnp.float32, -k, k)

    wih_f = u(keys[0], (4 * H, I)); whh_f = u(keys[1], (4 * H, H))
    bih_f = u(keys[2], (4 * H,));   bhh_f = u(keys[3], (4 * H,))
    wih_b = u(keys[4], (4 * H, I)); whh_b = u(keys[5], (4 * H, H))
    bih_b = u(keys[6], (4 * H,));   bhh_b = u(keys[7], (4 * H,))
    w1 = u(keys[8], (H, 4 * H));    b1 = u(keys[9], (H,))
    w2 = u(keys[10], (2, H));       b2 = u(keys[11], (2,))

    # merged input-projection weight: cols [0:512] backward, [512:1024] forward
    wih_merged_bf16 = jnp.concatenate([wih_b.T, wih_f.T], axis=1).astype(jnp.bfloat16)

    w2_t = w2.T                                              # (H, 2)
    w2_pad_t = jnp.zeros((H, OUT_PAD), jnp.float32).at[:, :2].set(w2_t)
    b2_pad = jnp.zeros((1, OUT_PAD), jnp.float32).at[0, :2].set(b2)

    return dict(
        # kernel params
        wih_merged_bf16=wih_merged_bf16,
        b_f=(bih_f + bhh_f)[None, :], b_b=(bih_b + bhh_b)[None, :],
        whh_b_t=whh_b.T,
        w1_t=w1.T, b1=b1[None, :],
        w2_pad_t=w2_pad_t, b2_pad=b2_pad,
        # f32 originals for the pure-JAX reference
        wih_f_t=wih_f.T, whh_f_t=whh_f.T,
        wih_b_t=wih_b.T,
        w2_t=w2_t, b2=b2[None, :],
    )


# ---------------------------------------------------------------------------
# Pure-JAX reference (full lax.scan LSTM, both directions), f32 throughout
# ---------------------------------------------------------------------------
def _lstm_ref(x_tbi, wih_t, whh_t, b):
    H = HIDDEN

    def step(carry, x_t):
        h, c = carry
        gates = x_t @ wih_t + h @ whh_t + b
        i_g = jax.nn.sigmoid(gates[:, 0 * H:1 * H])
        f_g = jax.nn.sigmoid(gates[:, 1 * H:2 * H])
        g_g = jnp.tanh(gates[:, 2 * H:3 * H])
        o_g = jax.nn.sigmoid(gates[:, 3 * H:4 * H])
        c = f_g * c + i_g * g_g
        h = o_g * jnp.tanh(c)
        return (h, c), h

    B = x_tbi.shape[1]
    init = (jnp.zeros((B, H), jnp.float32), jnp.zeros((B, H), jnp.float32))
    _, hs = jax.lax.scan(step, init, x_tbi)
    return hs


def reference_forward(params, before, after):
    def seq_vector(x_bti):
        x_tbi = jnp.transpose(x_bti, (1, 0, 2))
        hf = _lstm_ref(x_tbi, params["wih_f_t"], params["whh_f_t"], params["b_f"])
        hb = _lstm_ref(x_tbi[::-1], params["wih_b_t"], params["whh_b_t"],
                       params["b_b"])[::-1]
        return jnp.concatenate([hf[0], hb[0]], axis=-1)

    x = jnp.concatenate([seq_vector(before), seq_vector(after)], axis=-1)
    h = jnp.maximum(x @ params["w1_t"] + params["b1"], 0.0)
    return h @ params["w2_t"] + params["b2"]


if __name__ == "__main__":
    key = jax.random.PRNGKey(0)
    pkey, dkey1, dkey2 = jax.random.split(key, 3)
    params = init_params(pkey)

    B, T = 2, 8
    before = 0.1 * jax.random.normal(dkey1, (B, T, INPUT_SIZE), jnp.float32)
    after = 0.1 * jax.random.normal(dkey2, (B, T, INPUT_SIZE), jnp.float32)

    out = jax.block_until_ready(patch_classifier_by_hunk(params, before, after))
    assert out.shape == (B, 2)

    ref = jax.block_until_ready(reference_forward(params, before, after))
    np.testing.assert_allclose(np.asarray(out), np.asarray(ref),
                               rtol=2e-2, atol=2e-2)
    print("KERNEL_OK")
</pallas_src>

<mosaic_0001>
module attributes {stable_mosaic.version = 11 : i64} {
  func.func @_fused_kernel(%arg0: memref<2x8x768xf32, #tpu.memory_space<vmem>>, %arg1: memref<2x8x768xf32, #tpu.memory_space<vmem>>, %arg2: memref<768x1024xbf16, #tpu.memory_space<vmem>>, %arg3: memref<1x512xf32, #tpu.memory_space<vmem>>, %arg4: memref<1x512xf32, #tpu.memory_space<vmem>>, %arg5: memref<128x512xf32, #tpu.memory_space<vmem>>, %arg6: memref<512x128xf32, #tpu.memory_space<vmem>>, %arg7: memref<1x128xf32, #tpu.memory_space<vmem>>, %arg8: memref<128x128xf32, #tpu.memory_space<vmem>>, %arg9: memref<1x128xf32, #tpu.memory_space<vmem>>, %arg10: memref<2x128xf32, #tpu.memory_space<vmem>>, %arg11: memref<4x8x512xf32, #tpu.memory_space<vmem>>) attributes {dimension_semantics = [], scalar_prefetch = 0 : i64, scratch_operands = 1 : i64, tpu.core_type = #tpu.core_type<tc>} {
    %c0 = arith.constant 0 : index
    %c0_0 = arith.constant 0 : index
    %c0_1 = arith.constant 0 : index
    %0 = vector.load %arg0[%c0, %c0_0, %c0_1] : memref<2x8x768xf32, #tpu.memory_space<vmem>>, vector<2x8x768xf32>
    %1 = vector.shape_cast %0 : vector<2x8x768xf32> to vector<16x768xf32>
    %2 = arith.truncf %1 : vector<16x768xf32> to vector<16x768xbf16>
    %c0_2 = arith.constant 0 : index
    %c0_3 = arith.constant 0 : index
    %c0_4 = arith.constant 0 : index
    %3 = vector.load %arg1[%c0_2, %c0_3, %c0_4] : memref<2x8x768xf32, #tpu.memory_space<vmem>>, vector<2x8x768xf32>
    %4 = vector.shape_cast %3 : vector<2x8x768xf32> to vector<16x768xf32>
    %5 = arith.truncf %4 : vector<16x768xf32> to vector<16x768xbf16>
    %6 = tpu.concatenate %2, %5 in 0 : vector<16x768xbf16>, vector<16x768xbf16> -> vector<32x768xbf16>
    %c0_5 = arith.constant 0 : index
    %c0_6 = arith.constant 0 : index
    %7 = vector.load %arg2[%c0_5, %c0_6] : memref<768x1024xbf16, #tpu.memory_space<vmem>>, vector<768x1024xbf16>
    %cst = arith.constant dense<0.000000e+00> : vector<32x1024xf32>
    %8 = tpu.matmul %6, %7, %cst {dimension_numbers = #tpu.dot_dimension_numbers<[1], [0], [0], [1], [0, 0, 1, 1], [], []>} : vector<32x768xbf16>, vector<768x1024xbf16>, vector<32x1024xf32> -> vector<32x1024xf32>
    %9 = vector.shape_cast %8 : vector<32x1024xf32> to vector<4x8x1024xf32>
    %10 = vector.extract_strided_slice %9 {offsets = [0, 0, 512], sizes = [4, 1, 512], strides = [1, 1, 1]} : vector<4x8x1024xf32> to vector<4x1x512xf32>
    %11 = vector.shape_cast %10 : vector<4x1x512xf32> to vector<4x512xf32>
    %c0_7 = arith.constant 0 : index
    %c0_8 = arith.constant 0 : index
    %12 = vector.load %arg3[%c0_7, %c0_8] : memref<1x512xf32, #tpu.memory_space<vmem>>, vector<1x512xf32>
    %13 = vector.broadcast %12 : vector<1x512xf32> to vector<4x512xf32>
    %14 = arith.addf %11, %13 : vector<4x512xf32>
    %15 = vector.extract_strided_slice %14 {offsets = [0, 0], sizes = [4, 128], strides = [1, 1]} : vector<4x512xf32> to vector<4x128xf32>
    %16 = arith.negf %15 : vector<4x128xf32>
    %17 = math.exp %16 : vector<4x128xf32>
    %cst_9 = arith.constant 1.000000e+00 : f32
    %18 = vector.broadcast %cst_9 : f32 to vector<4x128xf32>
    %19 = arith.addf %18, %17 : vector<4x128xf32>
    %20 = arith.divf %18, %19 : vector<4x128xf32>
    %21 = vector.extract_strided_slice %14 {offsets = [0, 256], sizes = [4, 128], strides = [1, 1]} : vector<4x512xf32> to vector<4x128xf32>
    %22 = math.tanh %21 : vector<4x128xf32>
    %23 = vector.extract_strided_slice %14 {offsets = [0, 384], sizes = [4, 128], strides = [1, 1]} : vector<4x512xf32> to vector<4x128xf32>
    %24 = arith.negf %23 : vector<4x128xf32>
    %25 = math.exp %24 : vector<4x128xf32>
    %cst_10 = arith.constant 1.000000e+00 : f32
    %26 = vector.broadcast %cst_10 : f32 to vector<4x128xf32>
    %27 = arith.addf %26, %25 : vector<4x128xf32>
    %28 = arith.divf %26, %27 : vector<4x128xf32>
    %29 = arith.mulf %20, %22 : vector<4x128xf32>
    %30 = math.tanh %29 : vector<4x128xf32>
    %31 = arith.mulf %28, %30 : vector<4x128xf32>
    %32 = vector.extract_strided_slice %9 {offsets = [0, 0, 0], sizes = [4, 8, 512], strides = [1, 1, 1]} : vector<4x8x1024xf32> to vector<4x8x512xf32>
    %c0_11 = arith.constant 0 : index
    %c0_12 = arith.constant 0 : index
    %33 = vector.load %arg4[%c0_11, %c0_12] : memref<1x512xf32, #tpu.memory_space<vmem>>, vector<1x512xf32>
    %34 = vector.shape_cast %33 : vector<1x512xf32> to vector<1x1x512xf32>
    %35 = vector.broadcast %34 : vector<1x1x512xf32> to vector<4x8x512xf32>
    %36 = arith.addf %32, %35 : vector<4x8x512xf32>
    %c0_13 = arith.constant 0 : index
    %c0_14 = arith.constant 0 : index
    %c0_15 = arith.constant 0 : index
    %37 = vector.load %arg11[%c0_13, %c0_14, %c0_15] : memref<4x8x512xf32, #tpu.memory_space<vmem>>, vector<4x8x512xf32>
    tpu.vector_store %arg11[%c0_13, %c0_14, %c0_15], %36 {strides = array<i32>} : memref<4x8x512xf32, #tpu.memory_space<vmem>>, vector<4x8x512xf32>,
    %cst_16 = arith.constant 0.000000e+00 : f32
    %38 = vector.broadcast %cst_16 : f32 to vector<4x128xf32>
    %cst_17 = arith.constant 0.000000e+00 : f32
    %39 = vector.broadcast %cst_17 : f32 to vector<4x128xf32>
    %c0_18 = arith.constant 0 : index
    %c7 = arith.constant 7 : index
    %c0_19 = arith.constant 0 : index
    %40 = vector.load %arg11[%c0_18, %c7, %c0_19] : memref<4x8x512xf32, #tpu.memory_space<vmem>>, vector<4x1x512xf32>
    %41 = vector.shape_cast %40 : vector<4x1x512xf32> to vector<4x512xf32>
    %c0_20 = arith.constant 0 : index
    %c0_21 = arith.constant 0 : index
    %42 = vector.load %arg5[%c0_20, %c0_21] : memref<128x512xf32, #tpu.memory_space<vmem>>, vector<128x512xf32>
    %cst_22 = arith.constant dense<0.000000e+00> : vector<4x512xf32>
    %43 = tpu.matmul %38, %42, %cst_22 {dimension_numbers = #tpu.dot_dimension_numbers<[1], [0], [0], [1], [0, 0, 1, 1], [], []>} : vector<4x128xf32>, vector<128x512xf32>, vector<4x512xf32> -> vector<4x512xf32>
    %44 = arith.addf %41, %43 : vector<4x512xf32>
    %45 = vector.extract_strided_slice %44 {offsets = [0, 0], sizes = [4, 128], strides = [1, 1]} : vector<4x512xf32> to vector<4x128xf32>
    %46 = arith.negf %45 : vector<4x128xf32>
    %47 = math.exp %46 : vector<4x128xf32>
    %cst_23 = arith.constant 1.000000e+00 : f32
    %48 = vector.broadcast %cst_23 : f32 to vector<4x128xf32>
    %49 = arith.addf %48, %47 : vector<4x128xf32>
    %50 = arith.divf %48, %49 : vector<4x128xf32>
    %51 = vector.extract_strided_slice %44 {offsets = [0, 128], sizes = [4, 128], strides = [1, 1]} : vector<4x512xf32> to vector<4x128xf32>
    %52 = arith.negf %51 : vector<4x128xf32>
    %53 = math.exp %52 : vector<4x128xf32>
    %cst_24 = arith.constant 1.000000e+00 : f32
    %54 = vector.broadcast %cst_24 : f32 to vector<4x128xf32>
    %55 = arith.addf %54, %53 : vector<4x128xf32>
    %56 = arith.divf %54, %55 : vector<4x128xf32>
    %57 = vector.extract_strided_slice %44 {offsets = [0, 256], sizes = [4, 128], strides = [1, 1]} : vector<4x512xf32> to vector<4x128xf32>
    %58 = math.tanh %57 : vector<4x128xf32>
    %59 = vector.extract_strided_slice %44 {offsets = [0, 384], sizes = [4, 128], strides = [1, 1]} : vector<4x512xf32> to vector<4x128xf32>
    %60 = arith.negf %59 : vector<4x128xf32>
    %61 = math.exp %60 : vector<4x128xf32>
    %cst_25 = arith.constant 1.000000e+00 : f32
    %62 = vector.broadcast %cst_25 : f32 to vector<4x128xf32>
    %63 = arith.addf %62, %61 : vector<4x128xf32>
    %64 = arith.divf %62, %63 : vector<4x128xf32>
    %65 = arith.mulf %56, %39 : vector<4x128xf32>
    %66 = arith.mulf %50, %58 : vector<4x128xf32>
    %67 = arith.addf %65, %66 : vector<4x128xf32>
    %68 = math.tanh %67 : vector<4x128xf32>
    %69 = arith.mulf %64, %68 : vector<4x128xf32>
    %c0_26 = arith.constant 0 : index
    %c6 = arith.constant 6 : index
    %c0_27 = arith.constant 0 : index
    %70 = vector.load %arg11[%c0_26, %c6, %c0_27] : memref<4x8x512xf32, #tpu.memory_space<vmem>>, vector<4x1x512xf32>
    %71 = vector.shape_cast %70 : vector<4x1x512xf32> to vector<4x512xf32>
    %c0_28 = arith.constant 0 : index
    %c0_29 = arith.constant 0 : index
    %72 = vector.load %arg5[%c0_28, %c0_29] : memref<128x512xf32, #tpu.memory_space<vmem>>, vector<128x512xf32>
    %cst_30 = arith.constant dense<0.000000e+00> : vector<4x512xf32>
    %73 = tpu.matmul %69, %72, %cst_30 {dimension_numbers = #tpu.dot_dimension_numbers<[1], [0], [0], [1], [0, 0, 1, 1], [], []>} : vector<4x128xf32>, vector<128x512xf32>, vector<4x512xf32> -> vector<4x512xf32>
    %74 = arith.addf %71, %73 : vector<4x512xf32>
    %75 = vector.extract_strided_slice %74 {offsets = [0, 0], sizes = [4, 128], strides = [1, 1]} : vector<4x512xf32> to vector<4x128xf32>
    %76 = arith.negf %75 : vector<4x128xf32>
    %77 = math.exp %76 : vector<4x128xf32>
    %cst_31 = arith.constant 1.000000e+00 : f32
    %78 = vector.broadcast %cst_31 : f32 to vector<4x128xf32>
    %79 = arith.addf %78, %77 : vector<4x128xf32>
    %80 = arith.divf %78, %79 : vector<4x128xf32>
    %81 = vector.extract_strided_slice %74 {offsets = [0, 128], sizes = [4, 128], strides = [1, 1]} : vector<4x512xf32> to vector<4x128xf32>
    %82 = arith.negf %81 : vector<4x128xf32>
    %83 = math.exp %82 : vector<4x128xf32>
    %cst_32 = arith.constant 1.000000e+00 : f32
    %84 = vector.broadcast %cst_32 : f32 to vector<4x128xf32>
    %85 = arith.addf %84, %83 : vector<4x128xf32>
    %86 = arith.divf %84, %85 : vector<4x128xf32>
    %87 = vector.extract_strided_slice %74 {offsets = [0, 256], sizes = [4, 128], strides = [1, 1]} : vector<4x512xf32> to vector<4x128xf32>
    %88 = math.tanh %87 : vector<4x128xf32>
    %89 = vector.extract_strided_slice %74 {offsets = [0, 384], sizes = [4, 128], strides = [1, 1]} : vector<4x512xf32> to vector<4x128xf32>
    %90 = arith.negf %89 : vector<4x128xf32>
    %91 = math.exp %90 : vector<4x128xf32>
    %cst_33 = arith.constant 1.000000e+00 : f32
    %92 = vector.broadcast %cst_33 : f32 to vector<4x128xf32>
    %93 = arith.addf %92, %91 : vector<4x128xf32>
    %94 = arith.divf %92, %93 : vector<4x128xf32>
    %95 = arith.mulf %86, %67 : vector<4x128xf32>
    %96 = arith.mulf %80, %88 : vector<4x128xf32>
    %97 = arith.addf %95, %96 : vector<4x128xf32>
    %98 = math.tanh %97 : vector<4x128xf32>
    %99 = arith.mulf %94, %98 : vector<4x128xf32>
    %c0_34 = arith.constant 0 : index
    %c5 = arith.constant 5 : index
    %c0_35 = arith.constant 0 : index
    %100 = vector.load %arg11[%c0_34, %c5, %c0_35] : memref<4x8x512xf32, #tpu.memory_space<vmem>>, vector<4x1x512xf32>
    %101 = vector.shape_cast %100 : vector<4x1x512xf32> to vector<4x512xf32>
    %c0_36 = arith.constant 0 : index
    %c0_37 = arith.constant 0 : index
    %102 = vector.load %arg5[%c0_36, %c0_37] : memref<128x512xf32, #tpu.memory_space<vmem>>, vector<128x512xf32>
    %cst_38 = arith.constant dense<0.000000e+00> : vector<4x512xf32>
    %103 = tpu.matmul %99, %102, %cst_38 {dimension_numbers = #tpu.dot_dimension_numbers<[1], [0], [0], [1], [0, 0, 1, 1], [], []>} : vector<4x128xf32>, vector<128x512xf32>, vector<4x512xf32> -> vector<4x512xf32>
    %104 = arith.addf %101, %103 : vector<4x512xf32>
    %105 = vector.extract_strided_slice %104 {offsets = [0, 0], sizes = [4, 128], strides = [1, 1]} : vector<4x512xf32> to vector<4x128xf32>
    %106 = arith.negf %105 : vector<4x128xf32>
    %107 = math.exp %106 : vector<4x128xf32>
    %cst_39 = arith.constant 1.000000e+00 : f32
    %108 = vector.broadcast %cst_39 : f32 to vector<4x128xf32>
    %109 = arith.addf %108, %107 : vector<4x128xf32>
    %110 = arith.divf %108, %109 : vector<4x128xf32>
    %111 = vector.extract_strided_slice %104 {offsets = [0, 128], sizes = [4, 128], strides = [1, 1]} : vector<4x512xf32> to vector<4x128xf32>
    %112 = arith.negf %111 : vector<4x128xf32>
    %113 = math.exp %112 : vector<4x128xf32>
    %cst_40 = arith.constant 1.000000e+00 : f32
    %114 = vector.broadcast %cst_40 : f32 to vector<4x128xf32>
    %115 = arith.addf %114, %113 : vector<4x128xf32>
    %116 = arith.divf %114, %115 : vector<4x128xf32>
    %117 = vector.extract_strided_slice %104 {offsets = [0, 256], sizes = [4, 128], strides = [1, 1]} : vector<4x512xf32> to vector<4x128xf32>
    %118 = math.tanh %117 : vector<4x128xf32>
    %119 = vector.extract_strided_slice %104 {offsets = [0, 384], sizes = [4, 128], strides = [1, 1]} : vector<4x512xf32> to vector<4x128xf32>
    %120 = arith.negf %119 : vector<4x128xf32>
    %121 = math.exp %120 : vector<4x128xf32>
    %cst_41 = arith.constant 1.000000e+00 : f32
    %122 = vector.broadcast %cst_41 : f32 to vector<4x128xf32>
    %123 = arith.addf %122, %121 : vector<4x128xf32>
    %124 = arith.divf %122, %123 : vector<4x128xf32>
    %125 = arith.mulf %116, %97 : vector<4x128xf32>
    %126 = arith.mulf %110, %118 : vector<4x128xf32>
    %127 = arith.addf %125, %126 : vector<4x128xf32>
    %128 = math.tanh %127 : vector<4x128xf32>
    %129 = arith.mulf %124, %128 : vector<4x128xf32>
    %c0_42 = arith.constant 0 : index
    %c4 = arith.constant 4 : index
    %c0_43 = arith.constant 0 : index
    %130 = vector.load %arg11[%c0_42, %c4, %c0_43] : memref<4x8x512xf32, #tpu.memory_space<vmem>>, vector<4x1x512xf32>
    %131 = vector.shape_cast %130 : vector<4x1x512xf32> to vector<4x512xf32>
    %c0_44 = arith.constant 0 : index
    %c0_45 = arith.constant 0 : index
    %132 = vector.load %arg5[%c0_44, %c0_45] : memref<128x512xf32, #tpu.memory_space<vmem>>, vector<128x512xf32>
    %cst_46 = arith.constant dense<0.000000e+00> : vector<4x512xf32>
    %133 = tpu.matmul %129, %132, %cst_46 {dimension_numbers = #tpu.dot_dimension_numbers<[1], [0], [0], [1], [0, 0, 1, 1], [], []>} : vector<4x128xf32>, vector<128x512xf32>, vector<4x512xf32> -> vector<4x512xf32>
    %134 = arith.addf %131, %133 : vector<4x512xf32>
    %135 = vector.extract_strided_slice %134 {offsets = [0, 0], sizes = [4, 128], strides = [1, 1]} : vector<4x512xf32> to vector<4x128xf32>
    %136 = arith.negf %135 : vector<4x128xf32>
    %137 = math.exp %136 : vector<4x128xf32>
    %cst_47 = arith.constant 1.000000e+00 : f32
    %138 = vector.broadcast %cst_47 : f32 to vector<4x128xf32>
    %139 = arith.addf %138, %137 : vector<4x128xf32>
    %140 = arith.divf %138, %139 : vector<4x128xf32>
    %141 = vector.extract_strided_slice %134 {offsets = [0, 128], sizes = [4, 128], strides = [1, 1]} : vector<4x512xf32> to vector<4x128xf32>
    %142 = arith.negf %141 : vector<4x128xf32>
    %143 = math.exp %142 : vector<4x128xf32>
    %cst_48 = arith.constant 1.000000e+00 : f32
    %144 = vector.broadcast %cst_48 : f32 to vector<4x128xf32>
    %145 = arith.addf %144, %143 : vector<4x128xf32>
    %146 = arith.divf %144, %145 : vector<4x128xf32>
    %147 = vector.extract_strided_slice %134 {offsets = [0, 256], sizes = [4, 128], strides = [1, 1]} : vector<4x512xf32> to vector<4x128xf32>
    %148 = math.tanh %147 : vector<4x128xf32>
    %149 = vector.extract_strided_slice %134 {offsets = [0, 384], sizes = [4, 128], strides = [1, 1]} : vector<4x512xf32> to vector<4x128xf32>
    %150 = arith.negf %149 : vector<4x128xf32>
    %151 = math.exp %150 : vector<4x128xf32>
    %cst_49 = arith.constant 1.000000e+00 : f32
    %152 = vector.broadcast %cst_49 : f32 to vector<4x128xf32>
    %153 = arith.addf %152, %151 : vector<4x128xf32>
    %154 = arith.divf %152, %153 : vector<4x128xf32>
    %155 = arith.mulf %146, %127 : vector<4x128xf32>
    %156 = arith.mulf %140, %148 : vector<4x128xf32>
    %157 = arith.addf %155, %156 : vector<4x128xf32>
    %158 = math.tanh %157 : vector<4x128xf32>
    %159 = arith.mulf %154, %158 : vector<4x128xf32>
    %c0_50 = arith.constant 0 : index
    %c3 = arith.constant 3 : index
    %c0_51 = arith.constant 0 : index
    %160 = vector.load %arg11[%c0_50, %c3, %c0_51] : memref<4x8x512xf32, #tpu.memory_space<vmem>>, vector<4x1x512xf32>
    %161 = vector.shape_cast %160 : vector<4x1x512xf32> to vector<4x512xf32>
    %c0_52 = arith.constant 0 : index
    %c0_53 = arith.constant 0 : index
    %162 = vector.load %arg5[%c0_52, %c0_53] : memref<128x512xf32, #tpu.memory_space<vmem>>, vector<128x512xf32>
    %cst_54 = arith.constant dense<0.000000e+00> : vector<4x512xf32>
    %163 = tpu.matmul %159, %162, %cst_54 {dimension_numbers = #tpu.dot_dimension_numbers<[1], [0], [0], [1], [0, 0, 1, 1], [], []>} : vector<4x128xf32>, vector<128x512xf32>, vector<4x512xf32> -> vector<4x512xf32>
    %164 = arith.addf %161, %163 : vector<4x512xf32>
    %165 = vector.extract_strided_slice %164 {offsets = [0, 0], sizes = [4, 128], strides = [1, 1]} : vector<4x512xf32> to vector<4x128xf32>
    %166 = arith.negf %165 : vector<4x128xf32>
    %167 = math.exp %166 : vector<4x128xf32>
    %cst_55 = arith.constant 1.000000e+00 : f32
    %168 = vector.broadcast %cst_55 : f32 to vector<4x128xf32>
    %169 = arith.addf %168, %167 : vector<4x128xf32>
    %170 = arith.divf %168, %169 : vector<4x128xf32>
    %171 = vector.extract_strided_slice %164 {offsets = [0, 128], sizes = [4, 128], strides = [1, 1]} : vector<4x512xf32> to vector<4x128xf32>
    %172 = arith.negf %171 : vector<4x128xf32>
    %173 = math.exp %172 : vector<4x128xf32>
    %cst_56 = arith.constant 1.000000e+00 : f32
    %174 = vector.broadcast %cst_56 : f32 to vector<4x128xf32>
    %175 = arith.addf %174, %173 : vector<4x128xf32>
    %176 = arith.divf %174, %175 : vector<4x128xf32>
    %177 = vector.extract_strided_slice %164 {offsets = [0, 256], sizes = [4, 128], strides = [1, 1]} : vector<4x512xf32> to vector<4x128xf32>
    %178 = math.tanh %177 : vector<4x128xf32>
    %179 = vector.extract_strided_slice %164 {offsets = [0, 384], sizes = [4, 128], strides = [1, 1]} : vector<4x512xf32> to vector<4x128xf32>
    %180 = arith.negf %179 : vector<4x128xf32>
    %181 = math.exp %180 : vector<4x128xf32>
    %cst_57 = arith.constant 1.000000e+00 : f32
    %182 = vector.broadcast %cst_57 : f32 to vector<4x128xf32>
    %183 = arith.addf %182, %181 : vector<4x128xf32>
    %184 = arith.divf %182, %183 : vector<4x128xf32>
    %185 = arith.mulf %176, %157 : vector<4x128xf32>
    %186 = arith.mulf %170, %178 : vector<4x128xf32>
    %187 = arith.addf %185, %186 : vector<4x128xf32>
    %188 = math.tanh %187 : vector<4x128xf32>
    %189 = arith.mulf %184, %188 : vector<4x128xf32>
    %c0_58 = arith.constant 0 : index
    %c2 = arith.constant 2 : index
    %c0_59 = arith.constant 0 : index
    %190 = vector.load %arg11[%c0_58, %c2, %c0_59] : memref<4x8x512xf32, #tpu.memory_space<vmem>>, vector<4x1x512xf32>
    %191 = vector.shape_cast %190 : vector<4x1x512xf32> to vector<4x512xf32>
    %c0_60 = arith.constant 0 : index
    %c0_61 = arith.constant 0 : index
    %192 = vector.load %arg5[%c0_60, %c0_61] : memref<128x512xf32, #tpu.memory_space<vmem>>, vector<128x512xf32>
    %cst_62 = arith.constant dense<0.000000e+00> : vector<4x512xf32>
    %193 = tpu.matmul %189, %192, %cst_62 {dimension_numbers = #tpu.dot_dimension_numbers<[1], [0], [0], [1], [0, 0, 1, 1], [], []>} : vector<4x128xf32>, vector<128x512xf32>, vector<4x512xf32> -> vector<4x512xf32>
    %194 = arith.addf %191, %193 : vector<4x512xf32>
    %195 = vector.extract_strided_slice %194 {offsets = [0, 0], sizes = [4, 128], strides = [1, 1]} : vector<4x512xf32> to vector<4x128xf32>
    %196 = arith.negf %195 : vector<4x128xf32>
    %197 = math.exp %196 : vector<4x128xf32>
    %cst_63 = arith.constant 1.000000e+00 : f32
    %198 = vector.broadcast %cst_63 : f32 to vector<4x128xf32>
    %199 = arith.addf %198, %197 : vector<4x128xf32>
    %200 = arith.divf %198, %199 : vector<4x128xf32>
    %201 = vector.extract_strided_slice %194 {offsets = [0, 128], sizes = [4, 128], strides = [1, 1]} : vector<4x512xf32> to vector<4x128xf32>
    %202 = arith.negf %201 : vector<4x128xf32>
    %203 = math.exp %202 : vector<4x128xf32>
    %cst_64 = arith.constant 1.000000e+00 : f32
    %204 = vector.broadcast %cst_64 : f32 to vector<4x128xf32>
    %205 = arith.addf %204, %203 : vector<4x128xf32>
    %206 = arith.divf %204, %205 : vector<4x128xf32>
    %207 = vector.extract_strided_slice %194 {offsets = [0, 256], sizes = [4, 128], strides = [1, 1]} : vector<4x512xf32> to vector<4x128xf32>
    %208 = math.tanh %207 : vector<4x128xf32>
    %209 = vector.extract_strided_slice %194 {offsets = [0, 384], sizes = [4, 128], strides = [1, 1]} : vector<4x512xf32> to vector<4x128xf32>
    %210 = arith.negf %209 : vector<4x128xf32>
    %211 = math.exp %210 : vector<4x128xf32>
    %cst_65 = arith.constant 1.000000e+00 : f32
    %212 = vector.broadcast %cst_65 : f32 to vector<4x128xf32>
    %213 = arith.addf %212, %211 : vector<4x128xf32>
    %214 = arith.divf %212, %213 : vector<4x128xf32>
    %215 = arith.mulf %206, %187 : vector<4x128xf32>
    %216 = arith.mulf %200, %208 : vector<4x128xf32>
    %217 = arith.addf %215, %216 : vector<4x128xf32>
    %218 = math.tanh %217 : vector<4x128xf32>
    %219 = arith.mulf %214, %218 : vector<4x128xf32>
    %c0_66 = arith.constant 0 : index
    %c1 = arith.constant 1 : index
    %c0_67 = arith.constant 0 : index
    %220 = vector.load %arg11[%c0_66, %c1, %c0_67] : memref<4x8x512xf32, #tpu.memory_space<vmem>>, vector<4x1x512xf32>
    %221 = vector.shape_cast %220 : vector<4x1x512xf32> to vector<4x512xf32>
    %c0_68 = arith.constant 0 : index
    %c0_69 = arith.constant 0 : index
    %222 = vector.load %arg5[%c0_68, %c0_69] : memref<128x512xf32, #tpu.memory_space<vmem>>, vector<128x512xf32>
    %cst_70 = arith.constant dense<0.000000e+00> : vector<4x512xf32>
    %223 = tpu.matmul %219, %222, %cst_70 {dimension_numbers = #tpu.dot_dimension_numbers<[1], [0], [0], [1], [0, 0, 1, 1], [], []>} : vector<4x128xf32>, vector<128x512xf32>, vector<4x512xf32> -> vector<4x512xf32>
    %224 = arith.addf %221, %223 : vector<4x512xf32>
    %225 = vector.extract_strided_slice %224 {offsets = [0, 0], sizes = [4, 128], strides = [1, 1]} : vector<4x512xf32> to vector<4x128xf32>
    %226 = arith.negf %225 : vector<4x128xf32>
    %227 = math.exp %226 : vector<4x128xf32>
    %cst_71 = arith.constant 1.000000e+00 : f32
    %228 = vector.broadcast %cst_71 : f32 to vector<4x128xf32>
    %229 = arith.addf %228, %227 : vector<4x128xf32>
    %230 = arith.divf %228, %229 : vector<4x128xf32>
    %231 = vector.extract_strided_slice %224 {offsets = [0, 128], sizes = [4, 128], strides = [1, 1]} : vector<4x512xf32> to vector<4x128xf32>
    %232 = arith.negf %231 : vector<4x128xf32>
    %233 = math.exp %232 : vector<4x128xf32>
    %cst_72 = arith.constant 1.000000e+00 : f32
    %234 = vector.broadcast %cst_72 : f32 to vector<4x128xf32>
    %235 = arith.addf %234, %233 : vector<4x128xf32>
    %236 = arith.divf %234, %235 : vector<4x128xf32>
    %237 = vector.extract_strided_slice %224 {offsets = [0, 256], sizes = [4, 128], strides = [1, 1]} : vector<4x512xf32> to vector<4x128xf32>
    %238 = math.tanh %237 : vector<4x128xf32>
    %239 = vector.extract_strided_slice %224 {offsets = [0, 384], sizes = [4, 128], strides = [1, 1]} : vector<4x512xf32> to vector<4x128xf32>
    %240 = arith.negf %239 : vector<4x128xf32>
    %241 = math.exp %240 : vector<4x128xf32>
    %cst_73 = arith.constant 1.000000e+00 : f32
    %242 = vector.broadcast %cst_73 : f32 to vector<4x128xf32>
    %243 = arith.addf %242, %241 : vector<4x128xf32>
    %244 = arith.divf %242, %243 : vector<4x128xf32>
    %245 = arith.mulf %236, %217 : vector<4x128xf32>
    %246 = arith.mulf %230, %238 : vector<4x128xf32>
    %247 = arith.addf %245, %246 : vector<4x128xf32>
    %248 = math.tanh %247 : vector<4x128xf32>
    %249 = arith.mulf %244, %248 : vector<4x128xf32>
    %c0_74 = arith.constant 0 : index
    %c0_75 = arith.constant 0 : index
    %c0_76 = arith.constant 0 : index
    %250 = vector.load %arg11[%c0_74, %c0_75, %c0_76] : memref<4x8x512xf32, #tpu.memory_space<vmem>>, vector<4x1x512xf32>
    %251 = vector.shape_cast %250 : vector<4x1x512xf32> to vector<4x512xf32>
    %c0_77 = arith.constant 0 : index
    %c0_78 = arith.constant 0 : index
    %252 = vector.load %arg5[%c0_77, %c0_78] : memref<128x512xf32, #tpu.memory_space<vmem>>, vector<128x512xf32>
    %cst_79 = arith.constant dense<0.000000e+00> : vector<4x512xf32>
    %253 = tpu.matmul %249, %252, %cst_79 {dimension_numbers = #tpu.dot_dimension_numbers<[1], [0], [0], [1], [0, 0, 1, 1], [], []>} : vector<4x128xf32>, vector<128x512xf32>, vector<4x512xf32> -> vector<4x512xf32>
    %254 = arith.addf %251, %253 : vector<4x512xf32>
    %255 = vector.extract_strided_slice %254 {offsets = [0, 0], sizes = [4, 128], strides = [1, 1]} : vector<4x512xf32> to vector<4x128xf32>
    %256 = arith.negf %255 : vector<4x128xf32>
    %257 = math.exp %256 : vector<4x128xf32>
    %cst_80 = arith.constant 1.000000e+00 : f32
    %258 = vector.broadcast %cst_80 : f32 to vector<4x128xf32>
    %259 = arith.addf %258, %257 : vector<4x128xf32>
    %260 = arith.divf %258, %259 : vector<4x128xf32>
    %261 = vector.extract_strided_slice %254 {offsets = [0, 128], sizes = [4, 128], strides = [1, 1]} : vector<4x512xf32> to vector<4x128xf32>
    %262 = arith.negf %261 : vector<4x128xf32>
    %263 = math.exp %262 : vector<4x128xf32>
    %cst_81 = arith.constant 1.000000e+00 : f32
    %264 = vector.broadcast %cst_81 : f32 to vector<4x128xf32>
    %265 = arith.addf %264, %263 : vector<4x128xf32>
    %266 = arith.divf %264, %265 : vector<4x128xf32>
    %267 = vector.extract_strided_slice %254 {offsets = [0, 256], sizes = [4, 128], strides = [1, 1]} : vector<4x512xf32> to vector<4x128xf32>
    %268 = math.tanh %267 : vector<4x128xf32>
    %269 = vector.extract_strided_slice %254 {offsets = [0, 384], sizes = [4, 128], strides = [1, 1]} : vector<4x512xf32> to vector<4x128xf32>
    %270 = arith.negf %269 : vector<4x128xf32>
    %271 = math.exp %270 : vector<4x128xf32>
    %cst_82 = arith.constant 1.000000e+00 : f32
    %272 = vector.broadcast %cst_82 : f32 to vector<4x128xf32>
    %273 = arith.addf %272, %271 : vector<4x128xf32>
    %274 = arith.divf %272, %273 : vector<4x128xf32>
    %275 = arith.mulf %266, %247 : vector<4x128xf32>
    %276 = arith.mulf %260, %268 : vector<4x128xf32>
    %277 = arith.addf %275, %276 : vector<4x128xf32>
    %278 = math.tanh %277 : vector<4x128xf32>
    %279 = arith.mulf %274, %278 : vector<4x128xf32>
    %280 = vector.extract_strided_slice %31 {offsets = [0, 0], sizes = [2, 128], strides = [1, 1]} : vector<4x128xf32> to vector<2x128xf32>
    %c0_83 = arith.constant 0 : index
    %c0_84 = arith.constant 0 : index
    %281 = vector.load %arg6[%c0_83, %c0_84] : memref<512x128xf32, #tpu.memory_space<vmem>>, vector<128x128xf32>
    %cst_85 = arith.constant dense<0.000000e+00> : vector<2x128xf32>
    %282 = tpu.matmul %280, %281, %cst_85 {dimension_numbers = #tpu.dot_dimension_numbers<[1], [0], [0], [1], [0, 0, 1, 1], [], []>} : vector<2x128xf32>, vector<128x128xf32>, vector<2x128xf32> -> vector<2x128xf32>
    %283 = vector.extract_strided_slice %279 {offsets = [0, 0], sizes = [2, 128], strides = [1, 1]} : vector<4x128xf32> to vector<2x128xf32>
    %c128 = arith.constant 128 : index
    %c0_86 = arith.constant 0 : index
    %284 = vector.load %arg6[%c128, %c0_86] : memref<512x128xf32, #tpu.memory_space<vmem>>, vector<128x128xf32>
    %cst_87 = arith.constant dense<0.000000e+00> : vector<2x128xf32>
    %285 = tpu.matmul %283, %284, %cst_87 {dimension_numbers = #tpu.dot_dimension_numbers<[1], [0], [0], [1], [0, 0, 1, 1], [], []>} : vector<2x128xf32>, vector<128x128xf32>, vector<2x128xf32> -> vector<2x128xf32>
    %286 = arith.addf %282, %285 : vector<2x128xf32>
    %287 = vector.extract_strided_slice %31 {offsets = [2, 0], sizes = [2, 128], strides = [1, 1]} : vector<4x128xf32> to vector<2x128xf32>
    %c256 = arith.constant 256 : index
    %c0_88 = arith.constant 0 : index
    %288 = vector.load %arg6[%c256, %c0_88] : memref<512x128xf32, #tpu.memory_space<vmem>>, vector<128x128xf32>
    %cst_89 = arith.constant dense<0.000000e+00> : vector<2x128xf32>
    %289 = tpu.matmul %287, %288, %cst_89 {dimension_numbers = #tpu.dot_dimension_numbers<[1], [0], [0], [1], [0, 0, 1, 1], [], []>} : vector<2x128xf32>, vector<128x128xf32>, vector<2x128xf32> -> vector<2x128xf32>
    %290 = arith.addf %286, %289 : vector<2x128xf32>
    %291 = vector.extract_strided_slice %279 {offsets = [2, 0], sizes = [2, 128], strides = [1, 1]} : vector<4x128xf32> to vector<2x128xf32>
    %c384 = arith.constant 384 : index
    %c0_90 = arith.constant 0 : index
    %292 = vector.load %arg6[%c384, %c0_90] : memref<512x128xf32, #tpu.memory_space<vmem>>, vector<128x128xf32>
    %cst_91 = arith.constant dense<0.000000e+00> : vector<2x128xf32>
    %293 = tpu.matmul %291, %292, %cst_91 {dimension_numbers = #tpu.dot_dimension_numbers<[1], [0], [0], [1], [0, 0, 1, 1], [], []>} : vector<2x128xf32>, vector<128x128xf32>, vector<2x128xf32> -> vector<2x128xf32>
    %294 = arith.addf %290, %293 : vector<2x128xf32>
    %c0_92 = arith.constant 0 : index
    %c0_93 = arith.constant 0 : index
    %295 = vector.load %arg7[%c0_92, %c0_93] : memref<1x128xf32, #tpu.memory_space<vmem>>, vector<1x128xf32>
    %296 = vector.broadcast %295 : vector<1x128xf32> to vector<2x128xf32>
    %297 = arith.addf %294, %296 : vector<2x128xf32>
    %cst_94 = arith.constant 0.000000e+00 : f32
    %298 = vector.broadcast %cst_94 : f32 to vector<2x128xf32>
    %299 = arith.maximumf %297, %298 : vector<2x128xf32>
    %c0_95 = arith.constant 0 : index
    %c0_96 = arith.constant 0 : index
    %300 = vector.load %arg8[%c0_95, %c0_96] : memref<128x128xf32, #tpu.memory_space<vmem>>, vector<128x128xf32>
    %cst_97 = arith.constant dense<0.000000e+00> : vector<2x128xf32>
    %301 = tpu.matmul %299, %300, %cst_97 {dimension_numbers = #tpu.dot_dimension_numbers<[1], [0], [0], [1], [0, 0, 1, 1], [], []>} : vector<2x128xf32>, vector<128x128xf32>, vector<2x128xf32> -> vector<2x128xf32>
    %c0_98 = arith.constant 0 : index
    %c0_99 = arith.constant 0 : index
    %302 = vector.load %arg9[%c0_98, %c0_99] : memref<1x128xf32, #tpu.memory_space<vmem>>, vector<1x128xf32>
    %303 = vector.broadcast %302 : vector<1x128xf32> to vector<2x128xf32>
    %304 = arith.addf %301, %303 : vector<2x128xf32>
    %c0_100 = arith.constant 0 : index
    %c0_101 = arith.constant 0 : index
    %305 = vector.load %arg10[%c0_100, %c0_101] : memref<2x128xf32, #tpu.memory_space<vmem>>, vector<2x128xf32>
    tpu.vector_store %arg10[%c0_100, %c0_101], %304 {strides = array<i32>} : memref<2x128xf32, #tpu.memory_space<vmem>>, vector<2x128xf32>,
    return
  }
}

</mosaic_0001>

<bundles_post_ra>
// kernel: patch_classifier_by_hunk.1
= control target key start
LH: loop header
LB: loop body
LE: loop exit
PB: predicated region body
PF: predicated region fallthrough
CT: control target
= control target key end

     0   :  { %15 = vsyncpa [#allocation4], 0  ;;  %s9788_s0 = inlined_call_operand.hbm [shape: f32[2,8,768], index: 0, kind: input, shape index: {}]   ;;  %s9789_s1 = inlined_call_operand.hbm [shape: f32[2,8,768], index: 1, kind: input, shape index: {}]   ;;  %s9790_s2 = inlined_call_operand.hbm [shape: bf16[768,1024], index: 2, kind: input, shape index: {}]   ;;  %s9791_s3 = inlined_call_operand.hbm [shape: f32[1,512], index: 3, kind: input, shape index: {}]   ;;  %s9792_s4 = inlined_call_operand.hbm [shape: f32[1,512], index: 4, kind: input, shape index: {}]   ;;  %s9793_s5 = inlined_call_operand.hbm [shape: f32[128,512], index: 5, kind: input, shape index: {}]   ;;  %s9794_s6 = inlined_call_operand.hbm [shape: f32[512,128], index: 6, kind: input, shape index: {}]   ;;  %s9795_s7 = inlined_call_operand.hbm [shape: f32[1,128], index: 7, kind: input, shape index: {}]   ;;  %s9796_s8 = inlined_call_operand.hbm [shape: f32[128,128], index: 8, kind: input, shape index: {}]   ;;  %s9797_s9 = inlined_call_operand.hbm [shape: f32[1,128], index: 9, kind: input, shape index: {}]   ;;  %s9798_s10 = inlined_call_operand.hbm [shape: f32[2,128], index: 10, kind: output, shape index: {}]  }
   0x1   :  { %16 = vsyncpa [#allocation7], 0 }
   0x2   :  { %17 = vsyncpa [#allocation10], 0 }
   0x3   :  { %18 = vsyncpa [#allocation13], 0 }
   0x4   :  { %19 = vsyncpa [#allocation16], 0 }
   0x5   :  { %20 = vsyncpa [#allocation19], 0 }
   0x6   :  { %21 = vsyncpa [#allocation5], 0  ;;  %s8309_s13 = smov [#allocation6]   ;;  %s8310_s15 = smov [#allocation9]  }
   0x7   :  { %s39_s14 = sshll.u32 %s8309_s13, 4  ;;  %s64_s16 = sshll.u32 %s8310_s15, 4  ;;  %s40_s14 = int_to_ptr.vmem [resolvable:$true] %s39_s14  ;;  %s65_s16 = int_to_ptr.vmem [resolvable:$true] %s64_s16 }
   0x8   :  { %s8083_s17 = scalar_lea.vmem %s40_s14, 1536  ;;  %p8088_p1 = scmp.lt.s32.totalorder %s40_s14, %s40_s14 }
   0x9   :  { %p8084_p0 = scmp.ne.s32.totalorder %s40_s14, %s8083_s17  ;;  %p8089_p2 = scmp.lt.s32.totalorder %s8083_s17, %s8083_s17 }
   0xb   :  { %p8090_p3 = por %p8089_p2, %p8088_p1 }
   0xd   :  { %p8091_p4 = pnand %p8090_p3, %p8084_p0 }
   0xf   :  { %8094 = shalt.err (!%p8091_p4)
}
  0x10   :  { %s8311_s18 = smov 768   ;;  %s8312_s19 = smov 48  }
  0x11   :  { %45 = dma.hbm_to_vmem [thread:$0]  %s9789_s1, 1536, %s40_s14, [#allocation7], %s8311_s18, %s8311_s18, %s8312_s19  }
  0x12   :  { %s8103_s22 = scalar_lea.vmem %s65_s16, 64  ;;  %p8108_p6 = scmp.lt.s32.totalorder %s65_s16, %s65_s16 }
  0x13   :  { %p8104_p5 = scmp.ne.s32.totalorder %s65_s16, %s8103_s22  ;;  %p8109_p7 = scmp.lt.s32.totalorder %s8103_s22, %s8103_s22 }
  0x15   :  { %p8110_p8 = por %p8109_p7, %p8108_p6 }
  0x17   :  { %p8111_p9 = pnand %p8110_p8, %p8104_p5 }
  0x19   :  { %8114 = shalt.err (!%p8111_p9)
}
  0x1a   :  { %67 = dma.hbm_to_vmem [thread:$0]  %s9791_s3, 64, %s65_s16, [#allocation10]  }
  0x1b   :  { %s8313_s25 = smov [#allocation12]   ;;  %s8314_s27 = smov [#allocation15]  }
  0x1c   :  { %s83_s26 = sshll.u32 %s8313_s25, 4  ;;  %s108_s28 = sshll.u32 %s8314_s27, 4  ;;  %s84_s26 = int_to_ptr.vmem [resolvable:$true] %s83_s26  ;;  %s109_s28 = int_to_ptr.vmem [resolvable:$true] %s108_s28 }
  0x1d   :  { %s8123_s29 = scalar_lea.vmem %s84_s26, 8192  ;;  %p8128_p11 = scmp.lt.s32.totalorder %s84_s26, %s84_s26 }
  0x1e   :  { %p8124_p10 = scmp.ne.s32.totalorder %s84_s26, %s8123_s29  ;;  %p8129_p12 = scmp.lt.s32.totalorder %s8123_s29, %s8123_s29 }
  0x20   :  { %p8130_p13 = por %p8129_p12, %p8128_p11 }
  0x22   :  { %p8131_p0 = pnand %p8130_p13, %p8124_p10 }
  0x24   :  { %8134 = shalt.err (!%p8131_p0)
}
  0x25   :  { %s8315_s1 = smov 512   ;;  %s8316_s30 = smov 32  }
  0x26   :  { %89 = dma.hbm_to_vmem [thread:$0]  %s9793_s5, 8192, %s84_s26, [#allocation13], %s8315_s1, %s8315_s1, %s8316_s30  }
  0x27   :  { %s8143_s12 = scalar_lea.vmem %s109_s28, 16  ;;  %s8147_s13 = scalar_lea.vmem %s109_s28, 32 }
  0x28   :  { %p8144_p1 = scmp.ne.s32.totalorder %s109_s28, %s8143_s12  ;;  %p8148_p2 = scmp.lt.s32.totalorder %s109_s28, %s109_s28 }
  0x29   :  { %p8149_p3 = scmp.lt.s32.totalorder %s8147_s13, %s8143_s12 }
  0x2b   :  { %p8150_p4 = por %p8149_p3, %p8148_p2 }
  0x2d   :  { %p8151_p5 = pnand %p8150_p4, %p8144_p1 }
  0x2f   :  { %8154 = shalt.err (!%p8151_p5)
}
  0x30   :  { %111 = dma.hbm_to_vmem [thread:$0]  %s9795_s7, 16, %s109_s28, [#allocation16]  }
  0x31   :  { %s8317_s16 = smov [#allocation3]   ;;  %s8318_s20 = smov [#allocation8]  }
  0x32   :  { %s27_s17 = sshll.u32 %s8317_s16, 4  ;;  %s51_s21 = sshll.u32 %s8318_s20, 4  ;;  %s28_s17 = int_to_ptr.vmem [resolvable:$true] %s27_s17  ;;  %s52_s21 = int_to_ptr.vmem [resolvable:$true] %s51_s21 }
  0x33   :  { %s8163_s22 = scalar_lea.vmem %s28_s17, 1536  ;;  %p8168_p7 = scmp.lt.s32.totalorder %s28_s17, %s28_s17 }
  0x34   :  { %p8164_p6 = scmp.ne.s32.totalorder %s28_s17, %s8163_s22  ;;  %p8169_p8 = scmp.lt.s32.totalorder %s8163_s22, %s8163_s22 }
  0x36   :  { %p8170_p9 = por %p8169_p8, %p8168_p7 }
  0x38   :  { %p8171_p10 = pnand %p8170_p9, %p8164_p6 }
  0x3a   :  { %8174 = shalt.err (!%p8171_p10)
}
  0x3b   :  { %33 = dma.hbm_to_vmem [thread:$0]  %s9788_s0, 1536, %s28_s17, [#allocation4], %s8311_s18, %s8311_s18, %s8312_s19  }
  0x3c   :  { %s8183_s7 = scalar_lea.vmem %s52_s21, 49152  ;;  %p8188_p12 = scmp.lt.s32.totalorder %s52_s21, %s52_s21 }
  0x3d   :  { %p8184_p11 = scmp.ne.s32.totalorder %s52_s21, %s8183_s7  ;;  %p8189_p13 = scmp.lt.s32.totalorder %s8183_s7, %s8183_s7 }
  0x3f   :  { %p8190_p0 = por %p8189_p13, %p8188_p12 }
  0x41   :  { %p8191_p1 = pnand %p8190_p0, %p8184_p11 }
  0x43   :  { %8194 = shalt.err (!%p8191_p1)
}
  0x44   :  { %57 = dma.hbm_to_vmem [thread:$0]  %s9790_s2, 49152, %s52_s21, [#allocation7], %s8315_s1, %s8315_s1, %s8316_s30  }
  0x45   :  { %s8319_s26 = smov [#allocation11]   ;;  %s8320_s28 = smov [#allocation14]  }
  0x46   :  { %s74_s27 = sshll.u32 %s8319_s26, 4  ;;  %s95_s29 = sshll.u32 %s8320_s28, 4  ;;  %s75_s27 = int_to_ptr.vmem [resolvable:$true] %s74_s27  ;;  %s96_s29 = int_to_ptr.vmem [resolvable:$true] %s95_s29 }
  0x47   :  { %s8203_s0 = scalar_lea.vmem %s75_s27, 64  ;;  %p8208_p3 = scmp.lt.s32.totalorder %s75_s27, %s75_s27 }
  0x48   :  { %p8204_p2 = scmp.ne.s32.totalorder %s75_s27, %s8203_s0  ;;  %p8209_p4 = scmp.lt.s32.totalorder %s8203_s0, %s8203_s0 }
  0x4a   :  { %p8210_p5 = por %p8209_p4, %p8208_p3 }
  0x4c   :  { %p8211_p6 = pnand %p8210_p5, %p8204_p2 }
  0x4e   :  { %8214 = shalt.err (!%p8211_p6)
}
  0x4f   :  { %77 = dma.hbm_to_vmem [thread:$0]  %s9792_s4, 64, %s75_s27, [#allocation10]  }
  0x50   :  { %s8223_s11 = scalar_lea.vmem %s96_s29, 8192  ;;  %p8228_p8 = scmp.lt.s32.totalorder %s96_s29, %s96_s29 }
  0x51   :  { %p8224_p7 = scmp.ne.s32.totalorder %s96_s29, %s8223_s11  ;;  %p8229_p9 = scmp.lt.s32.totalorder %s8223_s11, %s8223_s11 }
  0x53   :  { %p8230_p10 = por %p8229_p9, %p8228_p8 }
  0x55   :  { %p8231_p11 = pnand %p8230_p10, %p8224_p7 }
  0x57   :  { %8234 = shalt.err (!%p8231_p11)
}
  0x58   :  { %s8321_s2 = smov 128   ;;  %s8322_s1 = smov 8  }
  0x59   :  { %101 = dma.hbm_to_vmem [thread:$0]  %s9794_s6, 8192, %s96_s29, [#allocation13], %s8321_s2, %s8321_s2, %s8322_s1  }
  0x5a   :  { %s8323_s12 = smov [#allocation17]   ;;  %s8324_s14 = smov [#allocation18]  }
  0x5b   :  { %s117_s13 = sshll.u32 %s8323_s12, 4  ;;  %s130_s15 = sshll.u32 %s8324_s14, 4  ;;  %s118_s13 = int_to_ptr.vmem [resolvable:$true] %s117_s13  ;;  %s131_s15 = int_to_ptr.vmem [resolvable:$true] %s130_s15 }
  0x5c   :  { %s8243_s4 = scalar_lea.vmem %s118_s13, 2048  ;;  %p8248_p13 = scmp.lt.s32.totalorder %s118_s13, %s118_s13 }
  0x5d   :  { %p8244_p12 = scmp.ne.s32.totalorder %s118_s13, %s8243_s4  ;;  %p8249_p0 = scmp.lt.s32.totalorder %s8243_s4, %s8243_s4 }
  0x5f   :  { %p8250_p1 = por %p8249_p0, %p8248_p13 }
  0x61   :  { %p8251_p2 = pnand %p8250_p1, %p8244_p12 }
  0x63   :  { %8254 = shalt.err (!%p8251_p2)
}
  0x64   :  { %123 = dma.hbm_to_vmem [thread:$0]  %s9796_s8, 2048, %s118_s13, [#allocation16], %s8321_s2, %s8321_s2, %s8322_s1  }
  0x65   :  { %s8263_s20 = scalar_lea.vmem %s131_s15, 16  ;;  %s8267_s6 = scalar_lea.vmem %s131_s15, 32 }
  0x66   :  { %p8264_p3 = scmp.ne.s32.totalorder %s131_s15, %s8263_s20  ;;  %p8268_p4 = scmp.lt.s32.totalorder %s131_s15, %s131_s15 }
  0x67   :  { %p8269_p5 = scmp.lt.s32.totalorder %s8267_s6, %s8263_s20 }
  0x69   :  { %p8270_p6 = por %p8269_p5, %p8268_p4 }
  0x6b   :  { %p8271_p7 = pnand %p8270_p6, %p8264_p3 }
  0x6d   :  { %8274 = shalt.err (!%p8271_p7)
}
  0x6e   :  { %133 = dma.hbm_to_vmem [thread:$0]  %s9797_s9, 16, %s131_s15, [#allocation19]  }
  0x6f   :  { %8295 = dma.done.wait [#allocation4], 1536  }
  0x70   :  { %8296 = vsyncadd [#allocation4], 4294965760 }
  0x71   :  { %8297 = dma.done.wait [#allocation7], 50688  }
  0x72   :  { %8298 = vsyncadd [#allocation7], 4294916608 }
  0x73   :  { %8299 = dma.done.wait [#allocation10], 128  }
  0x74   :  { %8300 = vsyncadd [#allocation10], 4294967168 }
  0x75   :  { %8301 = dma.done.wait [#allocation13], 16384  }
  0x76   :  { %8302 = vsyncadd [#allocation13], 4294950912 }
  0x77   :  { %8303 = dma.done.wait [#allocation16], 2064  }
  0x78   :  { %8304 = vsyncadd [#allocation16], 4294965232 }
  0x79   :  { %8305 = dma.done.wait [#allocation19], 16  }
  0x7a   :  { %8306 = vsyncadd [#allocation19], 4294967280  ;;  %v256_v0 = vld [vmem:[#allocation8 + $0x1c0] sm:$0xff]  ;;  %v165_v54 = vld [vmem:[#allocation3 + $0x8] sm:$0xff]  ;;  %vm6224_vm0 = vcmask 1041409   ;;  %vm8327_vm1 = vmmov 0  }
  0x7b   :  { %v260_v1 = vld [vmem:[#allocation8 + $0x1e0] sm:$0xff]  ;;  %v171_v55 = vld [vmem:[#allocation3 + $0x38] sm:$0xff]  ;;  %v173_v60 = vld [vmem:[#allocation3 + $0x48] sm:$0xff]  ;;  %s8328_s8 = smov [#allocation20]  }
  0x7c   :  { %v384_v2 = vld [vmem:[#allocation8 + $0x5c0] sm:$0xff]  ;;  %v6674_v3 = vcombine.high %v256_v0, %v260_v1  ;;  %v6673_v5 = vcombine.low %v256_v0, %v260_v1  ;;  %v8426_v58 = vpack.c.bf16 %v171_v55, %v165_v54  ;;  %v167_v59 = vld [vmem:[#allocation3 + $0x18] sm:$0xff]  ;;  %s6603_s9 = sshll.u32 %s8328_s8, 4  ;;  %s6604_s9 = int_to_ptr.vmem [resolvable:$true] %s6603_s9 }
  0x7d   :  { %v388_v4 = vld [vmem:[#allocation8 + $0x5e0] sm:$0xff]  ;;  %v8428_v63 = vpack.c.bf16 %v173_v60, %v167_v59  ;;  %s8275_s5 = scalar_lea.vmem %s6604_s9, 32  ;;  %p8280_p9 = scmp.lt.s32.totalorder %s6604_s9, %s6604_s9 }
  0x7e   :  { %v248_v6 = vld [vmem:[#allocation8 + $0x180] sm:$0xff]  ;;  %v6802_v8 = vcombine.high %v384_v2, %v388_v4  ;;  %v6801_v9 = vcombine.low %v384_v2, %v388_v4  ;;  %2504 = vmatprep.subr.bf16.mxu0 %v6674_v3  ;;  %2536 = vmatprep.mubr.bf16.mxu0 %v8426_v58  ;;  %p8276_p8 = scmp.ne.s32.totalorder %s6604_s9, %s8275_s5  ;;  %p8281_p10 = scmp.lt.s32.totalorder %s8275_s5, %s8275_s5 }
  0x7f   :  { %v252_v7 = vld [vmem:[#allocation8 + $0x1a0] sm:$0xff]  ;;  %2505 = vmatpush1.bf16.msra.mxu0 %v6673_v5  ;;  %2589 = vmatprep.mubr.bf16.mxu1 %v8428_v63 }
  0x80   :  { %v6666_v10 = vcombine.high %v248_v6, %v252_v7  ;;  %v376_v11 = vld [vmem:[#allocation8 + $0x580] sm:$0xff]  ;;  %2557 = vmatprep.subr.bf16.mxu1 %v6802_v8  ;;  %v6665_v18 = vcombine.low %v248_v6, %v252_v7  ;;  %p8282_p11 = por %p8281_p10, %p8280_p9 }
  0x81   :  { %v380_v12 = vld [vmem:[#allocation8 + $0x5a0] sm:$0xff]  ;;  %2558 = vmatpush1.bf16.msra.mxu1 %v6801_v9 }
  0x82   :  { %v240_v13 = vld [vmem:[#allocation8 + $0x140] sm:$0xff]  ;;  %v6794_v14 = vcombine.high %v376_v11, %v380_v12  ;;  %2506 = vmatprep.subr.bf16.mxu0 %v6666_v10  ;;  %v6793_v19 = vcombine.low %v376_v11, %v380_v12  ;;  %p8283_p12 = pnand %p8282_p11, %p8276_p8 }
  0x83   :  { %v244_v15 = vld [vmem:[#allocation8 + $0x160] sm:$0xff]  ;;  %2507 = vmatpush1.bf16.msra.mxu0 %v6665_v18 }
  0x84   :  { %v368_v16 = vld [vmem:[#allocation8 + $0x540] sm:$0xff]  ;;  %v6658_v20 = vcombine.high %v240_v13, %v244_v15  ;;  %2559 = vmatprep.subr.bf16.mxu1 %v6794_v14  ;;  %v6657_v26 = vcombine.low %v240_v13, %v244_v15 }
  0x85   :  { %v372_v17 = vld [vmem:[#allocation8 + $0x560] sm:$0xff]  ;;  %2560 = vmatpush1.bf16.msra.mxu1 %v6793_v19 }
  0x86   :  { %v6786_v21 = vcombine.high %v368_v16, %v372_v17  ;;  %v232_v22 = vld [vmem:[#allocation8 + $0x100] sm:$0xff]  ;;  %2508 = vmatprep.subr.bf16.mxu0 %v6658_v20  ;;  %v6785_v27 = vcombine.low %v368_v16, %v372_v17 }
  0x87   :  { %v236_v23 = vld [vmem:[#allocation8 + $0x120] sm:$0xff]  ;;  %2509 = vmatpush1.bf16.msra.mxu0 %v6657_v26 }
  0x88   :  { %v360_v24 = vld [vmem:[#allocation8 + $0x500] sm:$0xff]  ;;  %v6650_v28 = vcombine.high %v232_v22, %v236_v23  ;;  %2561 = vmatprep.subr.bf16.mxu1 %v6786_v21  ;;  %v6649_v34 = vcombine.low %v232_v22, %v236_v23 }
  0x89   :  { %v364_v25 = vld [vmem:[#allocation8 + $0x520] sm:$0xff]  ;;  %2562 = vmatpush1.bf16.msra.mxu1 %v6785_v27 }
  0x8a   :  { %v6778_v29 = vcombine.high %v360_v24, %v364_v25  ;;  %v224_v30 = vld [vmem:[#allocation8 + $0xc0] sm:$0xff]  ;;  %2510 = vmatprep.subr.bf16.mxu0 %v6650_v28  ;;  %v6777_v35 = vcombine.low %v360_v24, %v364_v25 }
  0x8b   :  { %v228_v31 = vld [vmem:[#allocation8 + $0xe0] sm:$0xff]  ;;  %2511 = vmatpush1.bf16.msra.mxu0 %v6649_v34 }
  0x8c   :  { %v352_v32 = vld [vmem:[#allocation8 + $0x4c0] sm:$0xff]  ;;  %v6642_v36 = vcombine.high %v224_v30, %v228_v31  ;;  %2563 = vmatprep.subr.bf16.mxu1 %v6778_v29  ;;  %v6641_v42 = vcombine.low %v224_v30, %v228_v31 }
  0x8d   :  { %v356_v33 = vld [vmem:[#allocation8 + $0x4e0] sm:$0xff]  ;;  %2564 = vmatpush1.bf16.msra.mxu1 %v6777_v35 }
  0x8e   :  { %v6770_v37 = vcombine.high %v352_v32, %v356_v33  ;;  %v216_v38 = vld [vmem:[#allocation8 + $0x80] sm:$0xff]  ;;  %2512 = vmatprep.subr.bf16.mxu0 %v6642_v36  ;;  %v6769_v43 = vcombine.low %v352_v32, %v356_v33 }
  0x8f   :  { %v220_v39 = vld [vmem:[#allocation8 + $0xa0] sm:$0xff]  ;;  %2513 = vmatpush1.bf16.msra.mxu0 %v6641_v42 }
  0x90   :  { %v344_v40 = vld [vmem:[#allocation8 + $0x480] sm:$0xff]  ;;  %v6634_v44 = vcombine.high %v216_v38, %v220_v39  ;;  %2565 = vmatprep.subr.bf16.mxu1 %v6770_v37  ;;  %v6633_v50 = vcombine.low %v216_v38, %v220_v39 }
  0x91   :  { %v348_v41 = vld [vmem:[#allocation8 + $0x4a0] sm:$0xff]  ;;  %2566 = vmatpush1.bf16.msra.mxu1 %v6769_v43 }
  0x92   :  { %v6762_v45 = vcombine.high %v344_v40, %v348_v41  ;;  %v208_v46 = vld [vmem:[#allocation8 + $0x40] sm:$0xff]  ;;  %2514 = vmatprep.subr.bf16.mxu0 %v6634_v44  ;;  %v6761_v51 = vcombine.low %v344_v40, %v348_v41 }
  0x93   :  { %v212_v47 = vld [vmem:[#allocation8 + $0x60] sm:$0xff]  ;;  %2515 = vmatpush1.bf16.msra.mxu0 %v6633_v50 }
  0x94   :  { %v336_v48 = vld [vmem:[#allocation8 + $0x440] sm:$0xff]  ;;  %v6626_v52 = vcombine.high %v208_v46, %v212_v47  ;;  %2567 = vmatprep.subr.bf16.mxu1 %v6762_v45  ;;  %v6625_v0 = vcombine.low %v208_v46, %v212_v47 }
  0x95   :  { %v340_v49 = vld [vmem:[#allocation8 + $0x460] sm:$0xff]  ;;  %2568 = vmatpush1.bf16.msra.mxu1 %v6761_v51 }
  0x96   :  { %v200_v53 = vld [vmem:[#allocation8] sm:$0xff]  ;;  %v6754_v56 = vcombine.high %v336_v48, %v340_v49  ;;  %2516 = vmatprep.subr.bf16.mxu0 %v6626_v52  ;;  %v6753_v1 = vcombine.low %v336_v48, %v340_v49 }
  0x97   :  { %v204_v57 = vld [vmem:[#allocation8 + $0x20] sm:$0xff]  ;;  %2517 = vmatpush1.bf16.msra.mxu0 %v6625_v0 }
  0x98   :  { %v328_v61 = vld [vmem:[#allocation8 + $0x400] sm:$0xff]  ;;  %v6618_v2 = vcombine.high %v200_v53, %v204_v57  ;;  %2569 = vmatprep.subr.bf16.mxu1 %v6754_v56  ;;  %v6617_v8 = vcombine.low %v200_v53, %v204_v57 }
  0x99   :  { %v332_v62 = vld [vmem:[#allocation8 + $0x420] sm:$0xff]  ;;  %2570 = vmatpush1.bf16.msra.mxu1 %v6753_v1 }
  0x9a   :  { %v6746_v3 = vcombine.high %v328_v61, %v332_v62  ;;  %v320_v4 = vld [vmem:[#allocation8 + $0x3c0] sm:$0xff]  ;;  %2518 = vmatprep.subr.bf16.mxu0 %v6618_v2  ;;  %v6745_v9 = vcombine.low %v328_v61, %v332_v62 }
  0x9b   :  { %v324_v5 = vld [vmem:[#allocation8 + $0x3e0] sm:$0xff]  ;;  %2519 = vmatpush1.bf16.msra.mxu0 %v6617_v8  ;;  %v257_v8 = vld [vmem:[#allocation8 + $0x1c8] sm:$0xff] }
  0x9c   :  { %v448_v6 = vld [vmem:[#allocation8 + $0x7c0] sm:$0xff]  ;;  %v6738_v10 = vcombine.high %v320_v4, %v324_v5  ;;  %2571 = vmatprep.subr.bf16.mxu1 %v6746_v3  ;;  %v6737_v16 = vcombine.low %v320_v4, %v324_v5 }
  0x9d   :  { %v452_v7 = vld [vmem:[#allocation8 + $0x7e0] sm:$0xff]  ;;  %2572 = vmatpush1.bf16.msra.mxu1 %v6745_v9  ;;  %v261_v9 = vld [vmem:[#allocation8 + $0x1e8] sm:$0xff] }
  0x9e   :  { %v6866_v11 = vcombine.high %v448_v6, %v452_v7  ;;  %v312_v12 = vld [vmem:[#allocation8 + $0x380] sm:$0xff]  ;;  %2520 = vmatprep.subr.bf16.mxu0 %v6738_v10  ;;  %v6865_v17 = vcombine.low %v448_v6, %v452_v7 }
  0x9f   :  { %v316_v13 = vld [vmem:[#allocation8 + $0x3a0] sm:$0xff]  ;;  %2521 = vmatpush2.bf16.msra.mxu0 %v6737_v16 }
  0xa0   :  { %v440_v14 = vld [vmem:[#allocation8 + $0x780] sm:$0xff]  ;;  %v6730_v18 = vcombine.high %v312_v12, %v316_v13  ;;  %2573 = vmatprep.subr.bf16.mxu1 %v6866_v11  ;;  %v6729_v24 = vcombine.low %v312_v12, %v316_v13  ;;  %v170_v12 = vld [vmem:[#allocation3 + $0x30] sm:$0xff] }
  0xa1   :  { %v444_v15 = vld [vmem:[#allocation8 + $0x7a0] sm:$0xff]  ;;  %2574 = vmatpush2.bf16.msra.mxu1 %v6865_v17  ;;  %v6676_v17 = vcombine.high %v257_v8, %v261_v9 }
  0xa2   :  { %v6858_v19 = vcombine.high %v440_v14, %v444_v15  ;;  %v304_v20 = vld [vmem:[#allocation8 + $0x340] sm:$0xff]  ;;  %2522 = vmatprep.subr.bf16.mxu0 %v6730_v18  ;;  %v6857_v25 = vcombine.low %v440_v14, %v444_v15  ;;  %v166_v14 = vld [vmem:[#allocation3 + $0x10] sm:$0xff] }
  0xa3   :  { %v308_v21 = vld [vmem:[#allocation8 + $0x360] sm:$0xff]  ;;  %2523 = vmatpush2.bf16.msra.mxu0 %v6729_v24  ;;  %v189_v24 = vld [vmem:[#allocation6 + $0x38] sm:$0xff] }
  0xa4   :  { %v432_v22 = vld [vmem:[#allocation8 + $0x740] sm:$0xff]  ;;  %v6722_v26 = vcombine.high %v304_v20, %v308_v21  ;;  %2575 = vmatprep.subr.bf16.mxu1 %v6858_v19  ;;  %v6721_v32 = vcombine.low %v304_v20, %v308_v21  ;;  %v249_v20 = vld [vmem:[#allocation8 + $0x188] sm:$0xff] }
  0xa5   :  { %v436_v23 = vld [vmem:[#allocation8 + $0x760] sm:$0xff]  ;;  %2576 = vmatpush2.bf16.msra.mxu1 %v6857_v25 }
  0xa6   :  { %v6850_v27 = vcombine.high %v432_v22, %v436_v23  ;;  %v296_v28 = vld [vmem:[#allocation8 + $0x300] sm:$0xff]  ;;  %2524 = vmatprep.subr.bf16.mxu0 %v6722_v26  ;;  %v6849_v33 = vcombine.low %v432_v22, %v436_v23  ;;  %v253_v22 = vld [vmem:[#allocation8 + $0x1a8] sm:$0xff] }
  0xa7   :  { %v300_v29 = vld [vmem:[#allocation8 + $0x320] sm:$0xff]  ;;  %2525 = vmatpush2.bf16.msra.mxu0 %v6721_v32  ;;  %v183_v23 = vld [vmem:[#allocation6 + $0x8] sm:$0xff] }
  0xa8   :  { %v424_v30 = vld [vmem:[#allocation8 + $0x700] sm:$0xff]  ;;  %v6714_v34 = vcombine.high %v296_v28, %v300_v29  ;;  %2577 = vmatprep.subr.bf16.mxu1 %v6850_v27  ;;  %v6713_v40 = vcombine.low %v296_v28, %v300_v29  ;;  %v185_v27 = vld [vmem:[#allocation6 + $0x18] sm:$0xff]  ;;  %v191_v28 = vld [vmem:[#allocation6 + $0x48] sm:$0xff]  ;;  %v6675_v29 = vcombine.low %v257_v8, %v261_v9 }
  0xa9   :  { %v428_v31 = vld [vmem:[#allocation8 + $0x720] sm:$0xff]  ;;  %2578 = vmatpush2.bf16.msra.mxu1 %v6849_v33  ;;  %v221_v8 = vld [vmem:[#allocation8 + $0xa8] sm:$0xff] }
  0xaa   :  { %v6842_v35 = vcombine.high %v424_v30, %v428_v31  ;;  %v288_v36 = vld [vmem:[#allocation8 + $0x2c0] sm:$0xff]  ;;  %2526 = vmatprep.subr.bf16.mxu0 %v6714_v34  ;;  %v6841_v41 = vcombine.low %v424_v30, %v428_v31  ;;  %v6668_v31 = vcombine.high %v249_v20, %v253_v22  ;;  %v8436_v34 = vpack.c.bf16 %v189_v24, %v183_v23  ;;  %v201_v24 = vld [vmem:[#allocation8 + $0x8] sm:$0xff] }
  0xab   :  { %v292_v37 = vld [vmem:[#allocation8 + $0x2e0] sm:$0xff]  ;;  %2527 = vmatpush2.bf16.msra.mxu0 %v6713_v40  ;;  %v188_v40 = vld [vmem:[#allocation6 + $0x30] sm:$0xff] }
  0xac   :  { %v416_v38 = vld [vmem:[#allocation8 + $0x6c0] sm:$0xff]  ;;  %v6706_v42 = vcombine.high %v288_v36, %v292_v37  ;;  %2579 = vmatprep.subr.bf16.mxu1 %v6842_v35  ;;  %v6705_v48 = vcombine.low %v288_v36, %v292_v37  ;;  %v241_v35 = vld [vmem:[#allocation8 + $0x148] sm:$0xff]  ;;  %v8439_v37 = vpack.c.bf16 %v191_v28, %v185_v27 }
  0xad   :  { %v420_v39 = vld [vmem:[#allocation8 + $0x6e0] sm:$0xff]  ;;  %2580 = vmatpush2.bf16.msra.mxu1 %v6841_v41  ;;  %v245_v36 = vld [vmem:[#allocation8 + $0x168] sm:$0xff]  ;;  %v6667_v41 = vcombine.low %v249_v20, %v253_v22 }
  0xae   :  { %v6834_v43 = vcombine.high %v416_v38, %v420_v39  ;;  %v280_v44 = vld [vmem:[#allocation8 + $0x280] sm:$0xff]  ;;  %2528 = vmatprep.subr.bf16.mxu0 %v6706_v42  ;;  %v6833_v49 = vcombine.low %v416_v38, %v420_v39 }
  0xaf   :  { %v284_v45 = vld [vmem:[#allocation8 + $0x2a0] sm:$0xff]  ;;  %2529 = vmatpush2.bf16.msra.mxu0 %v6705_v48  ;;  %v233_v48 = vld [vmem:[#allocation8 + $0x108] sm:$0xff] }
  0xb0   :  { %v408_v46 = vld [vmem:[#allocation8 + $0x680] sm:$0xff]  ;;  %v6698_v50 = vcombine.high %v280_v44, %v284_v45  ;;  %2581 = vmatprep.subr.bf16.mxu1 %v6834_v43  ;;  %v6697_v56 = vcombine.low %v280_v44, %v284_v45  ;;  %v184_v43 = vld [vmem:[#allocation6 + $0x10] sm:$0xff]  ;;  %v6660_v45 = vcombine.high %v241_v35, %v245_v36 }
  0xb1   :  { %v412_v47 = vld [vmem:[#allocation8 + $0x6a0] sm:$0xff]  ;;  %2582 = vmatpush2.bf16.msra.mxu1 %v6833_v49  ;;  %v237_v49 = vld [vmem:[#allocation8 + $0x128] sm:$0xff] }
  0xb2   :  { %v6826_v51 = vcombine.high %v408_v46, %v412_v47  ;;  %v272_v52 = vld [vmem:[#allocation8 + $0x240] sm:$0xff]  ;;  %2530 = vmatprep.subr.bf16.mxu0 %v6698_v50  ;;  %v6825_v57 = vcombine.low %v408_v46, %v412_v47 }
  0xb3   :  { %v276_v53 = vld [vmem:[#allocation8 + $0x260] sm:$0xff]  ;;  %2531 = vmatpush2.bf16.msra.mxu0 %v6697_v56 }
  0xb4   :  { %v400_v54 = vld [vmem:[#allocation8 + $0x640] sm:$0xff]  ;;  %v6690_v59 = vcombine.high %v272_v52, %v276_v53  ;;  %2583 = vmatprep.subr.bf16.mxu1 %v6826_v51  ;;  %v6689_v2 = vcombine.low %v272_v52, %v276_v53  ;;  %v169_v51 = vld [vmem:[#allocation3 + $0x28] sm:$0xff]  ;;  %v175_v52 = vld [vmem:[#allocation3 + $0x58] sm:$0xff] }
  0xb5   :  { %v404_v55 = vld [vmem:[#allocation8 + $0x660] sm:$0xff]  ;;  %2584 = vmatpush2.bf16.msra.mxu1 %v6825_v57  ;;  %v6652_v57 = vcombine.high %v233_v48, %v237_v49 }
  0xb6   :  { %v6818_v60 = vcombine.high %v400_v54, %v404_v55  ;;  %v264_v61 = vld [vmem:[#allocation8 + $0x200] sm:$0xff]  ;;  %2532 = vmatprep.subr.bf16.mxu0 %v6690_v59  ;;  %v6817_v3 = vcombine.low %v400_v54, %v404_v55  ;;  %v6659_v55 = vcombine.low %v241_v35, %v245_v36  ;;  %v325_v35 = vld [vmem:[#allocation8 + $0x3e8] sm:$0xff] }
  0xb7   :  { %v268_v62 = vld [vmem:[#allocation8 + $0x220] sm:$0xff]  ;;  %2533 = vmatpush2.bf16.msra.mxu0 %v6689_v2  ;;  %v6651_v2 = vcombine.low %v233_v48, %v237_v49 }
  0xb8   :  { %v392_v0 = vld [vmem:[#allocation8 + $0x600] sm:$0xff]  ;;  %v6682_v4 = vcombine.high %v264_v61, %v268_v62  ;;  %2585 = vmatprep.subr.bf16.mxu1 %v6818_v60  ;;  %v6681_v10 = vcombine.low %v264_v61, %v268_v62  ;;  %v8448_v61 = vpack.c.bf16 %v175_v52, %v169_v51  ;;  %v225_v62 = vld [vmem:[#allocation8 + $0xc8] sm:$0xff] }
  0xb9   :  { %v396_v1 = vld [vmem:[#allocation8 + $0x620] sm:$0xff]  ;;  %2586 = vmatpush2.bf16.msra.mxu1 %v6817_v3  ;;  %v305_v52 = vld [vmem:[#allocation8 + $0x348] sm:$0xff] }
  0xba   :  { %v6810_v5 = vcombine.high %v392_v0, %v396_v1  ;;  %v512_v6 = vld [vmem:[#allocation8 + $0x9c0] sm:$0xff]  ;;  %2534 = vmatprep.subr.bf16.mxu0 %v6682_v4  ;;  %v6809_v13 = vcombine.low %v392_v0, %v396_v1  ;;  %v229_v0 = vld [vmem:[#allocation8 + $0xe8] sm:$0xff] }
  0xbb   :  { %v516_v7 = vld [vmem:[#allocation8 + $0x9e0] sm:$0xff]  ;;  %2535 = vmatpush2.bf16.msra.mxu0 %v6681_v10  ;;  %v6644_v4 = vcombine.high %v225_v62, %v229_v0  ;;  %v6643_v10 = vcombine.low %v225_v62, %v229_v0  ;;  %v297_v0 = vld [vmem:[#allocation8 + $0x308] sm:$0xff] }
  0xbc   :  { %v164_v11 = vld [vmem:[#allocation3] sm:$0xff]  ;;  %v6930_v16 = vcombine.high %v512_v6, %v516_v7  ;;  %2587 = vmatprep.subr.bf16.mxu1 %v6810_v5  ;;  %v6929_v26 = vcombine.low %v512_v6, %v516_v7  ;;  %v217_v7 = vld [vmem:[#allocation8 + $0x88] sm:$0xff] }
  0xbd   :  { %v172_v15 = vld [vmem:[#allocation3 + $0x40] sm:$0xff]  ;;  %v8432_v21 = vpack.c.bf16 %v170_v12, %v164_v11  ;;  %2588 = vmatpush2.bf16.msra.mxu1 %v6809_v13  ;;  %v6636_v12 = vcombine.high %v217_v7, %v221_v8 }
  0xbe   :  { %v504_v18 = vld [vmem:[#allocation8 + $0x980] sm:$0xff]  ;;  %v8434_v25 = vpack.c.bf16 %v172_v15, %v166_v14  ;;  %2610 = vmatprep.subr.bf16.mxu0 %v6930_v16  ;;  %2663 = vmatprep.subr.bf16.mxu1 %v6676_v17  ;;  %v209_v15 = vld [vmem:[#allocation8 + $0x48] sm:$0xff] }
  0xbf   :  { %v508_v19 = vld [vmem:[#allocation8 + $0x9a0] sm:$0xff]  ;;  %2537 = vmatmul.mubr.bf16.vlgmr.msra.gmra.mxu0 %v8432_v21  ;;  %v213_v16 = vld [vmem:[#allocation8 + $0x68] sm:$0xff] }
  0xc0   :  { %v6922_v30 = vcombine.high %v504_v18, %v508_v19  ;;  %v496_v32 = vld [vmem:[#allocation8 + $0x940] sm:$0xff]  ;;  %2590 = vmatmul.mubr.bf16.vlgmr.msra.gmra.mxu1 %v8434_v25  ;;  %2611 = vmatpush1.bf16.msra.mxu0 %v6929_v26  ;;  %v6921_v38 = vcombine.low %v504_v18, %v508_v19  ;;  %v6635_v18 = vcombine.low %v217_v7, %v221_v8  ;;  %v205_v26 = vld [vmem:[#allocation8 + $0x28] sm:$0xff] }
  0xc1   :  { %v500_v33 = vld [vmem:[#allocation8 + $0x960] sm:$0xff]  ;;  %2664 = vmatpush1.bf16.msra.mxu1 %v6675_v29  ;;  %2546 = vmatprep.mubr.bf16.mxu0 %v8436_v34  ;;  %v6628_v20 = vcombine.high %v209_v15, %v213_v16  ;;  %v6627_v28 = vcombine.low %v209_v15, %v213_v16  ;;  %v289_v8 = vld [vmem:[#allocation8 + $0x2c8] sm:$0xff] }
  0xc2   :  { %v182_v39 = vld [vmem:[#allocation6] sm:$0xff]  ;;  %2612 = vmatprep.subr.bf16.mxu0 %v6922_v30  ;;  %v6914_v42 = vcombine.high %v496_v32, %v500_v33  ;;  %2665 = vmatprep.subr.bf16.mxu1 %v6668_v31  ;;  %v6913_v53 = vcombine.low %v496_v32, %v500_v33  ;;  %v6620_v30 = vcombine.high %v201_v24, %v205_v26  ;;  %v321_v33 = vld [vmem:[#allocation8 + $0x3c8] sm:$0xff] }
  0xc3   :  { %v190_v44 = vld [vmem:[#allocation6 + $0x40] sm:$0xff]  ;;  %2599 = vmatprep.mubr.bf16.mxu1 %v8439_v37  ;;  %v8444_v50 = vpack.c.bf16 %v188_v40, %v182_v39  ;;  %v6740_v40 = vcombine.high %v321_v33, %v325_v35  ;;  %v281_v16 = vld [vmem:[#allocation8 + $0x288] sm:$0xff] }
  0xc4   :  { %v488_v46 = vld [vmem:[#allocation8 + $0x900] sm:$0xff]  ;;  %2613 = vmatpush1.bf16.msra.mxu0 %v6921_v38  ;;  %v8446_v54 = vpack.c.bf16 %v190_v44, %v184_v43  ;;  %v6619_v38 = vcombine.low %v201_v24, %v205_v26  ;;  %v313_v43 = vld [vmem:[#allocation8 + $0x388] sm:$0xff] }
  0xc5   :  { %v492_v47 = vld [vmem:[#allocation8 + $0x920] sm:$0xff]  ;;  %2666 = vmatpush1.bf16.msra.mxu1 %v6667_v41  ;;  %2614 = vmatprep.subr.bf16.mxu0 %v6914_v42  ;;  %v317_v44 = vld [vmem:[#allocation8 + $0x3a8] sm:$0xff] }
  0xc6   :  { %v6906_v56 = vcombine.high %v488_v46, %v492_v47  ;;  %2667 = vmatprep.subr.bf16.mxu1 %v6660_v45  ;;  %v480_v59 = vld [vmem:[#allocation8 + $0x8c0] sm:$0xff]  ;;  %v6905_v1 = vcombine.low %v488_v46, %v492_v47  ;;  %v6739_v46 = vcombine.low %v321_v33, %v325_v35  ;;  %v6732_v48 = vcombine.high %v313_v43, %v317_v44  ;;  %v273_v26 = vld [vmem:[#allocation8 + $0x248] sm:$0xff] }
  0xc7   :  { %v484_v60 = vld [vmem:[#allocation8 + $0x8e0] sm:$0xff]  ;;  %2547 = vmatmul.mubr.bf16.gmra.mxu0 %v8444_v50  ;;  %v265_v35 = vld [vmem:[#allocation8 + $0x208] sm:$0xff] }
  0xc8   :  { %2615 = vmatpush1.bf16.msra.mxu0 %v6913_v53  ;;  %2600 = vmatmul.mubr.bf16.gmra.mxu1 %v8446_v54  ;;  %v6898_v3 = vcombine.high %v480_v59, %v484_v60  ;;  %v472_v5 = vld [vmem:[#allocation8 + $0x880] sm:$0xff]  ;;  %v6897_v9 = vcombine.low %v480_v59, %v484_v60  ;;  %v309_v53 = vld [vmem:[#allocation8 + $0x368] sm:$0xff] }
  0xc9   :  { %2668 = vmatpush1.bf16.msra.mxu1 %v6659_v55  ;;  %2616 = vmatprep.subr.bf16.mxu0 %v6906_v56  ;;  %v476_v6 = vld [vmem:[#allocation8 + $0x8a0] sm:$0xff]  ;;  %v6731_v56 = vcombine.low %v313_v43, %v317_v44  ;;  %v6724_v59 = vcombine.high %v305_v52, %v309_v53  ;;  %v389_v43 = vld [vmem:[#allocation8 + $0x5e8] sm:$0xff] }
  0xca   :  { %2669 = vmatprep.subr.bf16.mxu1 %v6652_v57  ;;  %2642 = vmatprep.mubr.bf16.mxu0 %v8448_v61  ;;  %v6890_v11 = vcombine.high %v472_v5, %v476_v6  ;;  %v464_v13 = vld [vmem:[#allocation8 + $0x840] sm:$0xff]  ;;  %v6889_v17 = vcombine.low %v472_v5, %v476_v6  ;;  %v513_v44 = vld [vmem:[#allocation8 + $0x9c8] sm:$0xff] }
  0xcb   :  { %2695 = vmatprep.mubr.bf16.mxu1 %v8426_v58  ;;  %v468_v14 = vld [vmem:[#allocation8 + $0x860] sm:$0xff] }
  0xcc   :  { %2617 = vmatpush1.bf16.msra.mxu0 %v6905_v1  ;;  %v6882_v19 = vcombine.high %v464_v13, %v468_v14  ;;  %v456_v22 = vld [vmem:[#allocation8 + $0x800] sm:$0xff]  ;;  %v6881_v27 = vcombine.low %v464_v13, %v468_v14  ;;  %v301_v1 = vld [vmem:[#allocation8 + $0x328] sm:$0xff] }
  0xcd   :  { %2670 = vmatpush1.bf16.msra.mxu1 %v6651_v2  ;;  %2618 = vmatprep.subr.bf16.mxu0 %v6898_v3  ;;  %v460_v23 = vld [vmem:[#allocation8 + $0x820] sm:$0xff]  ;;  %v6723_v3 = vcombine.low %v305_v52, %v309_v53  ;;  %v6716_v5 = vcombine.high %v297_v0, %v301_v1  ;;  %v377_v53 = vld [vmem:[#allocation8 + $0x588] sm:$0xff] }
  0xce   :  { %2671 = vmatprep.subr.bf16.mxu1 %v6644_v4  ;;  %v6874_v29 = vcombine.high %v456_v22, %v460_v23  ;;  %v576_v31 = vld [vmem:[#allocation8 + $0xbc0] sm:$0xff]  ;;  %v6873_v36 = vcombine.low %v456_v22, %v460_v23 }
  0xcf   :  { %v580_v32 = vld [vmem:[#allocation8 + $0xbe0] sm:$0xff] }
  0xd0   :  { %2619 = vmatpush1.bf16.msra.mxu0 %v6897_v9  ;;  %v6994_v39 = vcombine.high %v576_v31, %v580_v32  ;;  %v568_v41 = vld [vmem:[#allocation8 + $0xb80] sm:$0xff]  ;;  %v6993_v45 = vcombine.low %v576_v31, %v580_v32  ;;  %v293_v9 = vld [vmem:[#allocation8 + $0x2e8] sm:$0xff] }
  0xd1   :  { %2672 = vmatpush1.bf16.msra.mxu1 %v6643_v10  ;;  %2620 = vmatprep.subr.bf16.mxu0 %v6890_v11  ;;  %v572_v42 = vld [vmem:[#allocation8 + $0xba0] sm:$0xff]  ;;  %v6715_v11 = vcombine.low %v297_v0, %v301_v1  ;;  %v6708_v13 = vcombine.high %v289_v8, %v293_v9 }
  0xd2   :  { %2673 = vmatprep.subr.bf16.mxu1 %v6636_v12  ;;  %v6986_v47 = vcombine.high %v568_v41, %v572_v42  ;;  %v560_v49 = vld [vmem:[#allocation8 + $0xb40] sm:$0xff]  ;;  %v6985_v55 = vcombine.low %v568_v41, %v572_v42  ;;  %v385_v42 = vld [vmem:[#allocation8 + $0x5c8] sm:$0xff] }
  0xd3   :  { %v564_v51 = vld [vmem:[#allocation8 + $0xb60] sm:$0xff]  ;;  %v6803_v0 = vcombine.low %v385_v42, %v389_v43 }
  0xd4   :  { %2621 = vmatpush1.bf16.msra.mxu0 %v6889_v17  ;;  %v6978_v57 = vcombine.high %v560_v49, %v564_v51  ;;  %v552_v60 = vld [vmem:[#allocation8 + $0xb00] sm:$0xff]  ;;  %v6977_v2 = vcombine.low %v560_v49, %v564_v51  ;;  %v285_v17 = vld [vmem:[#allocation8 + $0x2a8] sm:$0xff]  ;;  %v6804_v51 = vcombine.high %v385_v42, %v389_v43 }
  0xd5   :  { %2674 = vmatpush1.bf16.msra.mxu1 %v6635_v18  ;;  %2622 = vmatprep.subr.bf16.mxu0 %v6882_v19  ;;  %v556_v62 = vld [vmem:[#allocation8 + $0xb20] sm:$0xff]  ;;  %v6707_v19 = vcombine.low %v289_v8, %v293_v9  ;;  %v6700_v22 = vcombine.high %v281_v16, %v285_v17  ;;  %v501_v8 = vld [vmem:[#allocation8 + $0x968] sm:$0xff] }
  0xd6   :  { %2675 = vmatprep.subr.bf16.mxu1 %v6628_v20  ;;  %v6970_v4 = vcombine.high %v552_v60, %v556_v62  ;;  %v544_v6 = vld [vmem:[#allocation8 + $0xac0] sm:$0xff]  ;;  %v6969_v10 = vcombine.low %v552_v60, %v556_v62  ;;  %v187_v60 = vld [vmem:[#allocation6 + $0x28] sm:$0xff]  ;;  %v193_v62 = vld [vmem:[#allocation6 + $0x58] sm:$0xff] }
  0xd7   :  { %v548_v7 = vld [vmem:[#allocation8 + $0xae0] sm:$0xff] }
  0xd8   :  { %2623 = vmatpush1.bf16.msra.mxu0 %v6881_v27  ;;  %v6962_v12 = vcombine.high %v544_v6, %v548_v7  ;;  %v536_v14 = vld [vmem:[#allocation8 + $0xa80] sm:$0xff]  ;;  %v6961_v18 = vcombine.low %v544_v6, %v548_v7  ;;  %v277_v27 = vld [vmem:[#allocation8 + $0x268] sm:$0xff] }
  0xd9   :  { %2676 = vmatpush1.bf16.msra.mxu1 %v6627_v28  ;;  %2624 = vmatprep.subr.bf16.mxu0 %v6874_v29  ;;  %v540_v15 = vld [vmem:[#allocation8 + $0xaa0] sm:$0xff]  ;;  %v6699_v29 = vcombine.low %v281_v16, %v285_v17  ;;  %v6692_v31 = vcombine.high %v273_v26, %v277_v27  ;;  %v373_v6 = vld [vmem:[#allocation8 + $0x568] sm:$0xff] }
  0xda   :  { %2677 = vmatprep.subr.bf16.mxu1 %v6620_v30  ;;  %v6954_v20 = vcombine.high %v536_v14, %v540_v15  ;;  %v528_v23 = vld [vmem:[#allocation8 + $0xa40] sm:$0xff]  ;;  %v6953_v28 = vcombine.low %v536_v14, %v540_v15  ;;  %v497_v7 = vld [vmem:[#allocation8 + $0x948] sm:$0xff] }
  0xdb   :  { %v532_v24 = vld [vmem:[#allocation8 + $0xa60] sm:$0xff]  ;;  %v6916_v14 = vcombine.high %v497_v7, %v501_v8  ;;  %v361_v15 = vld [vmem:[#allocation8 + $0x508] sm:$0xff] }
  0xdc   :  { %2625 = vmatpush1.bf16.msra.mxu0 %v6873_v36  ;;  %v6946_v30 = vcombine.high %v528_v23, %v532_v24  ;;  %v520_v32 = vld [vmem:[#allocation8 + $0xa00] sm:$0xff]  ;;  %v269_v36 = vld [vmem:[#allocation8 + $0x228] sm:$0xff] }
  0xdd   :  { %2678 = vmatpush1.bf16.msra.mxu1 %v6619_v38  ;;  %2626 = vmatprep.subr.bf16.mxu0 %v6994_v39  ;;  %v524_v33 = vld [vmem:[#allocation8 + $0xa20] sm:$0xff]  ;;  %v6945_v38 = vcombine.low %v528_v23, %v532_v24  ;;  %v6691_v39 = vcombine.low %v273_v26, %v277_v27  ;;  %v6684_v41 = vcombine.high %v265_v35, %v269_v36  ;;  %v365_v16 = vld [vmem:[#allocation8 + $0x528] sm:$0xff] }
  0xde   :  { %2679 = vmatprep.subr.bf16.mxu1 %v6740_v40  ;;  %v6938_v40 = vcombine.high %v520_v32, %v524_v33  ;;  %v6683_v49 = vcombine.low %v265_v35, %v269_v36  ;;  %v6780_v23 = vcombine.high %v361_v15, %v365_v16  ;;  %v353_v26 = vld [vmem:[#allocation8 + $0x4c8] sm:$0xff] }
  0xdf   :  { %v357_v27 = vld [vmem:[#allocation8 + $0x4e8] sm:$0xff] }
  0xe0   :  { %2627 = vmatpush2.bf16.msra.mxu0 %v6993_v45  ;;  %v517_v45 = vld [vmem:[#allocation8 + $0x9e8] sm:$0xff] }
  0xe1   :  { %2680 = vmatpush2.bf16.msra.mxu1 %v6739_v46  ;;  %2628 = vmatprep.subr.bf16.mxu0 %v6986_v47  ;;  %v6937_v46 = vcombine.low %v520_v32, %v524_v33  ;;  %v168_v47 = vld [vmem:[#allocation3 + $0x20] sm:$0xff]  ;;  %v6932_v52 = vcombine.high %v513_v44, %v517_v45  ;;  %v6931_v1 = vcombine.low %v513_v44, %v517_v45  ;;  %v345_v35 = vld [vmem:[#allocation8 + $0x488] sm:$0xff] }
  0xe2   :  { %2681 = vmatprep.subr.bf16.mxu1 %v6732_v48  ;;  %v174_v48 = vld [vmem:[#allocation3 + $0x50] sm:$0xff]  ;;  %v6772_v32 = vcombine.high %v353_v26, %v357_v27  ;;  %v349_v36 = vld [vmem:[#allocation8 + $0x4a8] sm:$0xff] }
  0xe3   :  { %v6764_v42 = vcombine.high %v345_v35, %v349_v36  ;;  %v337_v44 = vld [vmem:[#allocation8 + $0x448] sm:$0xff] }
  0xe4   :  { %2629 = vmatpush2.bf16.msra.mxu0 %v6985_v55  ;;  %v381_v55 = vld [vmem:[#allocation8 + $0x5a8] sm:$0xff] }
  0xe5   :  { %2682 = vmatpush2.bf16.msra.mxu1 %v6731_v56  ;;  %2630 = vmatprep.subr.bf16.mxu0 %v6978_v57  ;;  %v505_v56 = vld [vmem:[#allocation8 + $0x988] sm:$0xff]  ;;  %v8454_v57 = vpack.c.bf16 %v174_v48, %v168_v47  ;;  %v6795_v9 = vcombine.low %v377_v53, %v381_v55  ;;  %v6763_v48 = vcombine.low %v345_v35, %v349_v36 }
  0xe6   :  { %2683 = vmatprep.subr.bf16.mxu1 %v6724_v59  ;;  %v509_v59 = vld [vmem:[#allocation8 + $0x9a8] sm:$0xff] }
  0xe7   :  { %v341_v45 = vld [vmem:[#allocation8 + $0x468] sm:$0xff] }
  0xe8   :  { %2631 = vmatpush2.bf16.msra.mxu0 %v6977_v2  ;;  %v6796_v2 = vcombine.high %v377_v53, %v381_v55  ;;  %v469_v47 = vld [vmem:[#allocation8 + $0x868] sm:$0xff] }
  0xe9   :  { %2684 = vmatpush2.bf16.msra.mxu1 %v6723_v3  ;;  %2632 = vmatprep.subr.bf16.mxu0 %v6970_v4  ;;  %v6924_v3 = vcombine.high %v505_v56, %v509_v59  ;;  %v8456_v4 = vpack.c.bf16 %v193_v62, %v187_v60  ;;  %v329_v53 = vld [vmem:[#allocation8 + $0x408] sm:$0xff]  ;;  %v6755_v60 = vcombine.low %v337_v44, %v341_v45 }
  0xea   :  { %2685 = vmatprep.subr.bf16.mxu1 %v6716_v5  ;;  %v369_v5 = vld [vmem:[#allocation8 + $0x548] sm:$0xff] }
  0xeb   :  { %v333_v55 = vld [vmem:[#allocation8 + $0x428] sm:$0xff] }
  0xec   :  { %2633 = vmatpush2.bf16.msra.mxu0 %v6969_v10  ;;  %v186_v10 = vld [vmem:[#allocation6 + $0x20] sm:$0xff] }
  0xed   :  { %2686 = vmatpush2.bf16.msra.mxu1 %v6715_v11  ;;  %2634 = vmatprep.subr.bf16.mxu0 %v6962_v12  ;;  %v192_v11 = vld [vmem:[#allocation6 + $0x50] sm:$0xff]  ;;  %v6923_v12 = vcombine.low %v505_v56, %v509_v59  ;;  %v457_v56 = vld [vmem:[#allocation8 + $0x808] sm:$0xff] }
  0xee   :  { %2687 = vmatprep.subr.bf16.mxu1 %v6708_v13  ;;  %v6788_v13 = vcombine.high %v369_v5, %v373_v6  ;;  %v8461_v17 = vpack.c.bf16 %v192_v11, %v186_v10  ;;  %v461_v59 = vld [vmem:[#allocation8 + $0x828] sm:$0xff] }
  0xef   :  { %v441_v11 = vld [vmem:[#allocation8 + $0x788] sm:$0xff] }
  0xf0   :  { %2635 = vmatpush2.bf16.msra.mxu0 %v6961_v18  ;;  %v489_v18 = vld [vmem:[#allocation8 + $0x908] sm:$0xff] }
  0xf1   :  { %2688 = vmatpush2.bf16.msra.mxu1 %v6707_v19  ;;  %2636 = vmatprep.subr.bf16.mxu0 %v6954_v20  ;;  %v493_v19 = vld [vmem:[#allocation8 + $0x928] sm:$0xff]  ;;  %v6787_v20 = vcombine.low %v369_v5, %v373_v6 }
  0xf2   :  { %2689 = vmatprep.subr.bf16.mxu1 %v6700_v22  ;;  %v6915_v22 = vcombine.low %v497_v7, %v501_v8  ;;  %v6908_v24 = vcombine.high %v489_v18, %v493_v19  ;;  %v577_v5 = vld [vmem:[#allocation8 + $0xbc8] sm:$0xff]  ;;  %v6747_v7 = vcombine.low %v329_v53, %v333_v55  ;;  %v6875_v8 = vcombine.low %v457_v56, %v461_v59 }
  0xf3   :  { %v581_v6 = vld [vmem:[#allocation8 + $0xbe8] sm:$0xff] }
  0xf4   :  { %2637 = vmatpush2.bf16.msra.mxu0 %v6953_v28  ;;  %v481_v28 = vld [vmem:[#allocation8 + $0x8c8] sm:$0xff]  ;;  %v6996_v10 = vcombine.high %v577_v5, %v581_v6 }
  0xf5   :  { %2690 = vmatpush2.bf16.msra.mxu1 %v6699_v29  ;;  %2638 = vmatprep.subr.bf16.mxu0 %v6946_v30  ;;  %v485_v29 = vld [vmem:[#allocation8 + $0x8e8] sm:$0xff]  ;;  %v6779_v30 = vcombine.low %v361_v15, %v365_v16  ;;  %v6995_v16 = vcombine.low %v577_v5, %v581_v6 }
  0xf6   :  { %2691 = vmatprep.subr.bf16.mxu1 %v6692_v31  ;;  %v6907_v31 = vcombine.low %v489_v18, %v493_v19  ;;  %v6900_v33 = vcombine.high %v481_v28, %v485_v29 }
  0xf8   :  { %2639 = vmatpush2.bf16.msra.mxu0 %v6945_v38  ;;  %v473_v38 = vld [vmem:[#allocation8 + $0x888] sm:$0xff] }
  0xf9   :  { %2692 = vmatpush2.bf16.msra.mxu1 %v6691_v39  ;;  %2640 = vmatprep.subr.bf16.mxu0 %v6938_v40  ;;  %v477_v39 = vld [vmem:[#allocation8 + $0x8a8] sm:$0xff]  ;;  %v6771_v40 = vcombine.low %v353_v26, %v357_v27 }
  0xfa   :  { %2693 = vmatprep.subr.bf16.mxu1 %v6684_v41  ;;  %v6899_v41 = vcombine.low %v481_v28, %v485_v29  ;;  %v6892_v43 = vcombine.high %v473_v38, %v477_v39 }
  0xfc   :  { %2641 = vmatpush2.bf16.msra.mxu0 %v6937_v46  ;;  %v465_v46 = vld [vmem:[#allocation8 + $0x848] sm:$0xff] }
  0xfd   :  { %2694 = vmatpush2.bf16.msra.mxu1 %v6683_v49  ;;  %2716 = vmatprep.subr.bf16.mxu0 %v6804_v51  ;;  %v6891_v49 = vcombine.low %v473_v38, %v477_v39  ;;  %v6756_v51 = vcombine.high %v337_v44, %v341_v45  ;;  %v6883_v62 = vcombine.low %v465_v46, %v469_v47 }
  0xfe   :  { %2769 = vmatprep.subr.bf16.mxu1 %v6932_v52  ;;  %v6884_v52 = vcombine.high %v465_v46, %v469_v47 }
  0xff   :  { %2643 = vmatmul.mubr.bf16.vlgmr.msra.gmra.mxu0 %v8454_v57 }
 0x100   :  { %2696 = vmatmul.mubr.bf16.vlgmr.msra.gmra.mxu1 %v8432_v21  ;;  %2717 = vmatpush1.bf16.msra.mxu0 %v6803_v0  ;;  %v6748_v0 = vcombine.high %v329_v53, %v333_v55 }
 0x101   :  { %2770 = vmatpush1.bf16.msra.mxu1 %v6931_v1  ;;  %2718 = vmatprep.subr.bf16.mxu0 %v6796_v2  ;;  %v6876_v1 = vcombine.high %v457_v56, %v461_v59  ;;  %v449_v2 = vld [vmem:[#allocation8 + $0x7c8] sm:$0xff] }
 0x102   :  { %2771 = vmatprep.subr.bf16.mxu1 %v6924_v3  ;;  %2652 = vmatprep.mubr.bf16.mxu0 %v8456_v4  ;;  %v453_v3 = vld [vmem:[#allocation8 + $0x7e8] sm:$0xff] }
 0x103   :  { %2705 = vmatprep.mubr.bf16.mxu1 %v8436_v34  ;;  %v6867_v15 = vcombine.low %v449_v2, %v453_v3 }
 0x104   :  { %2719 = vmatpush1.bf16.msra.mxu0 %v6795_v9  ;;  %v6868_v9 = vcombine.high %v449_v2, %v453_v3 }
 0x105   :  { %2772 = vmatpush1.bf16.msra.mxu1 %v6923_v12  ;;  %2720 = vmatprep.subr.bf16.mxu0 %v6788_v13  ;;  %v445_v12 = vld [vmem:[#allocation8 + $0x7a8] sm:$0xff] }
 0x106   :  { %2773 = vmatprep.subr.bf16.mxu1 %v6916_v14  ;;  %v569_v13 = vld [vmem:[#allocation8 + $0xb88] sm:$0xff]  ;;  %v6860_v18 = vcombine.high %v441_v11, %v445_v12  ;;  %v6859_v26 = vcombine.low %v441_v11, %v445_v12 }
 0x107   :  { %2653 = vmatmul.mubr.bf16.gmra.mxu0 %v8461_v17  ;;  %v573_v14 = vld [vmem:[#allocation8 + $0xba8] sm:$0xff] }
 0x108   :  { %2721 = vmatpush1.bf16.msra.mxu0 %v6787_v20  ;;  %2706 = vmatmul.mubr.bf16.gmra.mxu1 %v8444_v50  ;;  %v6988_v19 = vcombine.high %v569_v13, %v573_v14  ;;  %v433_v20 = vld [vmem:[#allocation8 + $0x748] sm:$0xff]  ;;  %v6987_v27 = vcombine.low %v569_v13, %v573_v14 }
 0x109   :  { %2774 = vmatpush1.bf16.msra.mxu1 %v6915_v22  ;;  %2722 = vmatprep.subr.bf16.mxu0 %v6780_v23  ;;  %v437_v22 = vld [vmem:[#allocation8 + $0x768] sm:$0xff] }
 0x10a   :  { %2775 = vmatprep.subr.bf16.mxu1 %v6908_v24  ;;  %2748 = vmatprep.mubr.bf16.mxu0 %v8428_v63  ;;  %v561_v23 = vld [vmem:[#allocation8 + $0xb48] sm:$0xff]  ;;  %v6852_v28 = vcombine.high %v433_v20, %v437_v22  ;;  %v6851_v35 = vcombine.low %v433_v20, %v437_v22 }
 0x10b   :  { %2801 = vmatprep.mubr.bf16.mxu1 %v8448_v61  ;;  %v565_v24 = vld [vmem:[#allocation8 + $0xb68] sm:$0xff] }
 0x10c   :  { %2723 = vmatpush1.bf16.msra.mxu0 %v6779_v30  ;;  %v6980_v29 = vcombine.high %v561_v23, %v565_v24  ;;  %v425_v30 = vld [vmem:[#allocation8 + $0x708] sm:$0xff]  ;;  %v6979_v36 = vcombine.low %v561_v23, %v565_v24 }
 0x10d   :  { %2776 = vmatpush1.bf16.msra.mxu1 %v6907_v31  ;;  %2724 = vmatprep.subr.bf16.mxu0 %v6772_v32  ;;  %v429_v31 = vld [vmem:[#allocation8 + $0x728] sm:$0xff] }
 0x10e   :  { %2777 = vmatprep.subr.bf16.mxu1 %v6900_v33  ;;  %v553_v32 = vld [vmem:[#allocation8 + $0xb08] sm:$0xff]  ;;  %v6844_v38 = vcombine.high %v425_v30, %v429_v31  ;;  %v6843_v44 = vcombine.low %v425_v30, %v429_v31 }
 0x10f   :  { %v557_v33 = vld [vmem:[#allocation8 + $0xb28] sm:$0xff] }
 0x110   :  { %2725 = vmatpush1.bf16.msra.mxu0 %v6771_v40  ;;  %v6972_v39 = vcombine.high %v553_v32, %v557_v33  ;;  %v417_v40 = vld [vmem:[#allocation8 + $0x6c8] sm:$0xff]  ;;  %v6971_v45 = vcombine.low %v553_v32, %v557_v33 }
 0x111   :  { %2778 = vmatpush1.bf16.msra.mxu1 %v6899_v41  ;;  %2726 = vmatprep.subr.bf16.mxu0 %v6764_v42  ;;  %v421_v41 = vld [vmem:[#allocation8 + $0x6e8] sm:$0xff] }
 0x112   :  { %2779 = vmatprep.subr.bf16.mxu1 %v6892_v43  ;;  %v545_v42 = vld [vmem:[#allocation8 + $0xac8] sm:$0xff]  ;;  %v6836_v46 = vcombine.high %v417_v40, %v421_v41  ;;  %v6835_v53 = vcombine.low %v417_v40, %v421_v41 }
 0x113   :  { %v549_v43 = vld [vmem:[#allocation8 + $0xae8] sm:$0xff] }
 0x114   :  { %2727 = vmatpush1.bf16.msra.mxu0 %v6763_v48  ;;  %v6964_v47 = vcombine.high %v545_v42, %v549_v43  ;;  %v409_v48 = vld [vmem:[#allocation8 + $0x688] sm:$0xff]  ;;  %v6963_v55 = vcombine.low %v545_v42, %v549_v43 }
 0x115   :  { %2780 = vmatpush1.bf16.msra.mxu1 %v6891_v49  ;;  %2728 = vmatprep.subr.bf16.mxu0 %v6756_v51  ;;  %v413_v49 = vld [vmem:[#allocation8 + $0x6a8] sm:$0xff] }
 0x116   :  { %2781 = vmatprep.subr.bf16.mxu1 %v6884_v52  ;;  %v537_v51 = vld [vmem:[#allocation8 + $0xa88] sm:$0xff]  ;;  %v6828_v56 = vcombine.high %v409_v48, %v413_v49  ;;  %v6827_v2 = vcombine.low %v409_v48, %v413_v49 }
 0x117   :  { %v541_v52 = vld [vmem:[#allocation8 + $0xaa8] sm:$0xff] }
 0x118   :  { %2729 = vmatpush1.bf16.msra.mxu0 %v6755_v60  ;;  %v6956_v59 = vcombine.high %v537_v51, %v541_v52  ;;  %v401_v60 = vld [vmem:[#allocation8 + $0x648] sm:$0xff]  ;;  %v6955_v3 = vcombine.low %v537_v51, %v541_v52 }
 0x119   :  { %2782 = vmatpush1.bf16.msra.mxu1 %v6883_v62  ;;  %2730 = vmatprep.subr.bf16.mxu0 %v6748_v0  ;;  %v405_v62 = vld [vmem:[#allocation8 + $0x668] sm:$0xff] }
 0x11a   :  { %2783 = vmatprep.subr.bf16.mxu1 %v6876_v1  ;;  %v529_v0 = vld [vmem:[#allocation8 + $0xa48] sm:$0xff]  ;;  %v6820_v5 = vcombine.high %v401_v60, %v405_v62  ;;  %v6819_v11 = vcombine.low %v401_v60, %v405_v62 }
 0x11b   :  { %v533_v1 = vld [vmem:[#allocation8 + $0xa68] sm:$0xff] }
 0x11c   :  { %2731 = vmatpush1.bf16.msra.mxu0 %v6747_v7  ;;  %v6948_v6 = vcombine.high %v529_v0, %v533_v1  ;;  %v393_v7 = vld [vmem:[#allocation8 + $0x608] sm:$0xff]  ;;  %v6947_v12 = vcombine.low %v529_v0, %v533_v1 }
 0x11d   :  { %2784 = vmatpush1.bf16.msra.mxu1 %v6875_v8  ;;  %2732 = vmatprep.subr.bf16.mxu0 %v6868_v9  ;;  %v397_v8 = vld [vmem:[#allocation8 + $0x628] sm:$0xff] }
 0x11e   :  { %2785 = vmatprep.subr.bf16.mxu1 %v6996_v10  ;;  %v521_v9 = vld [vmem:[#allocation8 + $0xa08] sm:$0xff]  ;;  %v6812_v13 = vcombine.high %v393_v7, %v397_v8  ;;  %v6811_v20 = vcombine.low %v393_v7, %v397_v8 }
 0x11f   :  { %v525_v10 = vld [vmem:[#allocation8 + $0xa28] sm:$0xff] }
 0x120   :  { %2733 = vmatpush2.bf16.msra.mxu0 %v6867_v15  ;;  %v6940_v14 = vcombine.high %v521_v9, %v525_v10  ;;  %v258_v15 = vld [vmem:[#allocation8 + $0x1d0] sm:$0xff]  ;;  %v6939_v22 = vcombine.low %v521_v9, %v525_v10 }
 0x121   :  { %2786 = vmatpush2.bf16.msra.mxu1 %v6995_v16  ;;  %2734 = vmatprep.subr.bf16.mxu0 %v6860_v18  ;;  %v262_v16 = vld [vmem:[#allocation8 + $0x1f0] sm:$0xff] }
 0x122   :  { %2787 = vmatprep.subr.bf16.mxu1 %v6988_v19  ;;  %v386_v18 = vld [vmem:[#allocation8 + $0x5d0] sm:$0xff]  ;;  %v6678_v23 = vcombine.high %v258_v15, %v262_v16  ;;  %v6677_v30 = vcombine.low %v258_v15, %v262_v16 }
 0x123   :  { %v390_v19 = vld [vmem:[#allocation8 + $0x5f0] sm:$0xff] }
 0x124   :  { %2735 = vmatpush2.bf16.msra.mxu0 %v6859_v26  ;;  %v6806_v24 = vcombine.high %v386_v18, %v390_v19  ;;  %v250_v26 = vld [vmem:[#allocation8 + $0x190] sm:$0xff]  ;;  %v6805_v31 = vcombine.low %v386_v18, %v390_v19 }
 0x125   :  { %2788 = vmatpush2.bf16.msra.mxu1 %v6987_v27  ;;  %2736 = vmatprep.subr.bf16.mxu0 %v6852_v28  ;;  %v254_v27 = vld [vmem:[#allocation8 + $0x1b0] sm:$0xff] }
 0x126   :  { %2789 = vmatprep.subr.bf16.mxu1 %v6980_v29  ;;  %v378_v28 = vld [vmem:[#allocation8 + $0x590] sm:$0xff]  ;;  %v6670_v32 = vcombine.high %v250_v26, %v254_v27  ;;  %v6669_v40 = vcombine.low %v250_v26, %v254_v27 }
 0x127   :  { %v382_v29 = vld [vmem:[#allocation8 + $0x5b0] sm:$0xff] }
 0x128   :  { %2737 = vmatpush2.bf16.msra.mxu0 %v6851_v35  ;;  %v6798_v33 = vcombine.high %v378_v28, %v382_v29  ;;  %v242_v35 = vld [vmem:[#allocation8 + $0x150] sm:$0xff]  ;;  %v6797_v41 = vcombine.low %v378_v28, %v382_v29 }
 0x129   :  { %2790 = vmatpush2.bf16.msra.mxu1 %v6979_v36  ;;  %2738 = vmatprep.subr.bf16.mxu0 %v6844_v38  ;;  %v246_v36 = vld [vmem:[#allocation8 + $0x170] sm:$0xff] }
 0x12a   :  { %2791 = vmatprep.subr.bf16.mxu1 %v6972_v39  ;;  %v370_v38 = vld [vmem:[#allocation8 + $0x550] sm:$0xff]  ;;  %v6662_v42 = vcombine.high %v242_v35, %v246_v36  ;;  %v6661_v48 = vcombine.low %v242_v35, %v246_v36 }
 0x12b   :  { %v374_v39 = vld [vmem:[#allocation8 + $0x570] sm:$0xff] }
 0x12c   :  { %2739 = vmatpush2.bf16.msra.mxu0 %v6843_v44  ;;  %v6790_v43 = vcombine.high %v370_v38, %v374_v39  ;;  %v234_v44 = vld [vmem:[#allocation8 + $0x110] sm:$0xff]  ;;  %v6789_v49 = vcombine.low %v370_v38, %v374_v39 }
 0x12d   :  { %2792 = vmatpush2.bf16.msra.mxu1 %v6971_v45  ;;  %2740 = vmatprep.subr.bf16.mxu0 %v6836_v46  ;;  %v238_v45 = vld [vmem:[#allocation8 + $0x130] sm:$0xff] }
 0x12e   :  { %2793 = vmatprep.subr.bf16.mxu1 %v6964_v47  ;;  %v362_v46 = vld [vmem:[#allocation8 + $0x510] sm:$0xff]  ;;  %v6654_v51 = vcombine.high %v234_v44, %v238_v45  ;;  %v6653_v60 = vcombine.low %v234_v44, %v238_v45 }
 0x12f   :  { %v366_v47 = vld [vmem:[#allocation8 + $0x530] sm:$0xff] }
 0x130   :  { %2741 = vmatpush2.bf16.msra.mxu0 %v6835_v53  ;;  %v6782_v52 = vcombine.high %v362_v46, %v366_v47  ;;  %v226_v53 = vld [vmem:[#allocation8 + $0xd0] sm:$0xff]  ;;  %v6781_v62 = vcombine.low %v362_v46, %v366_v47 }
 0x131   :  { %2794 = vmatpush2.bf16.msra.mxu1 %v6963_v55  ;;  %2742 = vmatprep.subr.bf16.mxu0 %v6828_v56  ;;  %v230_v55 = vld [vmem:[#allocation8 + $0xf0] sm:$0xff] }
 0x132   :  { %2795 = vmatprep.subr.bf16.mxu1 %v6956_v59  ;;  %v354_v56 = vld [vmem:[#allocation8 + $0x4d0] sm:$0xff]  ;;  %v6646_v0 = vcombine.high %v226_v53, %v230_v55  ;;  %v6645_v7 = vcombine.low %v226_v53, %v230_v55 }
 0x133   :  { %v358_v59 = vld [vmem:[#allocation8 + $0x4f0] sm:$0xff] }
 0x134   :  { %2743 = vmatpush2.bf16.msra.mxu0 %v6827_v2  ;;  %v6774_v1 = vcombine.high %v354_v56, %v358_v59  ;;  %v218_v2 = vld [vmem:[#allocation8 + $0x90] sm:$0xff]  ;;  %v6773_v8 = vcombine.low %v354_v56, %v358_v59 }
 0x135   :  { %2796 = vmatpush2.bf16.msra.mxu1 %v6955_v3  ;;  %2744 = vmatprep.subr.bf16.mxu0 %v6820_v5  ;;  %v222_v3 = vld [vmem:[#allocation8 + $0xb0] sm:$0xff] }
 0x136   :  { %2797 = vmatprep.subr.bf16.mxu1 %v6948_v6  ;;  %v346_v5 = vld [vmem:[#allocation8 + $0x490] sm:$0xff]  ;;  %v6638_v9 = vcombine.high %v218_v2, %v222_v3  ;;  %v6637_v15 = vcombine.low %v218_v2, %v222_v3 }
 0x137   :  { %v350_v6 = vld [vmem:[#allocation8 + $0x4b0] sm:$0xff] }
 0x138   :  { %2745 = vmatpush2.bf16.msra.mxu0 %v6819_v11  ;;  %v6766_v10 = vcombine.high %v346_v5, %v350_v6  ;;  %v210_v11 = vld [vmem:[#allocation8 + $0x50] sm:$0xff]  ;;  %v6765_v16 = vcombine.low %v346_v5, %v350_v6 }
 0x139   :  { %2798 = vmatpush2.bf16.msra.mxu1 %v6947_v12  ;;  %2746 = vmatprep.subr.bf16.mxu0 %v6812_v13  ;;  %v214_v12 = vld [vmem:[#allocation8 + $0x70] sm:$0xff] }
 0x13a   :  { %2799 = vmatprep.subr.bf16.mxu1 %v6940_v14  ;;  %v338_v13 = vld [vmem:[#allocation8 + $0x450] sm:$0xff]  ;;  %v6630_v18 = vcombine.high %v210_v11, %v214_v12  ;;  %v6629_v26 = vcombine.low %v210_v11, %v214_v12 }
 0x13b   :  { %v342_v14 = vld [vmem:[#allocation8 + $0x470] sm:$0xff] }
 0x13c   :  { %2747 = vmatpush2.bf16.msra.mxu0 %v6811_v20  ;;  %v6758_v19 = vcombine.high %v338_v13, %v342_v14  ;;  %v202_v20 = vld [vmem:[#allocation8 + $0x10] sm:$0xff]  ;;  %v6757_v27 = vcombine.low %v338_v13, %v342_v14 }
 0x13d   :  { %2800 = vmatpush2.bf16.msra.mxu1 %v6939_v22  ;;  %2822 = vmatprep.subr.bf16.mxu0 %v6678_v23  ;;  %v206_v22 = vld [vmem:[#allocation8 + $0x30] sm:$0xff] }
 0x13e   :  { %2871 = vmatprep.subr.bf16.mxu1 %v6806_v24  ;;  %v330_v23 = vld [vmem:[#allocation8 + $0x410] sm:$0xff]  ;;  %v6622_v28 = vcombine.high %v202_v20, %v206_v22  ;;  %v6621_v35 = vcombine.low %v202_v20, %v206_v22 }
 0x13f   :  { %2749 = vmatmul.mubr.bf16.vlgmr.msra.gmra.mxu0 %v8434_v25  ;;  %v334_v24 = vld [vmem:[#allocation8 + $0x430] sm:$0xff] }
 0x140   :  { %2802 = vmatmul.mubr.bf16.vlgmr.msra.gmra.mxu1 %v8454_v57  ;;  %2823 = vmatpush1.bf16.msra.mxu0 %v6677_v30  ;;  %v6750_v29 = vcombine.high %v330_v23, %v334_v24  ;;  %v322_v30 = vld [vmem:[#allocation8 + $0x3d0] sm:$0xff]  ;;  %v6749_v36 = vcombine.low %v330_v23, %v334_v24 }
 0x141   :  { %2872 = vmatpush1.bf16.msra.mxu1 %v6805_v31  ;;  %2824 = vmatprep.subr.bf16.mxu0 %v6670_v32  ;;  %v326_v31 = vld [vmem:[#allocation8 + $0x3f0] sm:$0xff] }
 0x142   :  { %2873 = vmatprep.subr.bf16.mxu1 %v6798_v33  ;;  %2758 = vmatprep.mubr.bf16.mxu0 %v8439_v37  ;;  %v450_v32 = vld [vmem:[#allocation8 + $0x7d0] sm:$0xff]  ;;  %v6742_v38 = vcombine.high %v322_v30, %v326_v31  ;;  %v6741_v44 = vcombine.low %v322_v30, %v326_v31 }
 0x143   :  { %2811 = vmatprep.mubr.bf16.mxu1 %v8456_v4  ;;  %v454_v33 = vld [vmem:[#allocation8 + $0x7f0] sm:$0xff] }
 0x144   :  { %2825 = vmatpush1.bf16.msra.mxu0 %v6669_v40  ;;  %v6870_v39 = vcombine.high %v450_v32, %v454_v33  ;;  %v314_v40 = vld [vmem:[#allocation8 + $0x390] sm:$0xff]  ;;  %v6869_v45 = vcombine.low %v450_v32, %v454_v33 }
 0x145   :  { %2874 = vmatpush1.bf16.msra.mxu1 %v6797_v41  ;;  %2826 = vmatprep.subr.bf16.mxu0 %v6662_v42  ;;  %v318_v41 = vld [vmem:[#allocation8 + $0x3b0] sm:$0xff] }
 0x146   :  { %2875 = vmatprep.subr.bf16.mxu1 %v6790_v43  ;;  %v442_v42 = vld [vmem:[#allocation8 + $0x790] sm:$0xff]  ;;  %v6734_v46 = vcombine.high %v314_v40, %v318_v41  ;;  %v6733_v53 = vcombine.low %v314_v40, %v318_v41 }
 0x147   :  { %2759 = vmatmul.mubr.bf16.gmra.mxu0 %v8446_v54  ;;  %v446_v43 = vld [vmem:[#allocation8 + $0x7b0] sm:$0xff] }
 0x148   :  { %2827 = vmatpush1.bf16.msra.mxu0 %v6661_v48  ;;  %2812 = vmatmul.mubr.bf16.gmra.mxu1 %v8461_v17  ;;  %v6862_v47 = vcombine.high %v442_v42, %v446_v43  ;;  %v306_v48 = vld [vmem:[#allocation8 + $0x350] sm:$0xff]  ;;  %v6861_v55 = vcombine.low %v442_v42, %v446_v43 }
 0x149   :  { %2876 = vmatpush1.bf16.msra.mxu1 %v6789_v49  ;;  %2828 = vmatprep.subr.bf16.mxu0 %v6654_v51  ;;  %v310_v49 = vld [vmem:[#allocation8 + $0x370] sm:$0xff] }
 0x14a   :  { %2877 = vmatprep.subr.bf16.mxu1 %v6782_v52  ;;  %2854 = vmatprep.mubr.bf16.mxu0 %v8426_v58  ;;  %v434_v51 = vld [vmem:[#allocation8 + $0x750] sm:$0xff]  ;;  %v6726_v56 = vcombine.high %v306_v48, %v310_v49  ;;  %v6725_v2 = vcombine.low %v306_v48, %v310_v49 }
 0x14b   :  { %2903 = vmatprep.mubr.bf16.mxu1 %v8428_v63  ;;  %v438_v52 = vld [vmem:[#allocation8 + $0x770] sm:$0xff] }
 0x14c   :  { %2829 = vmatpush1.bf16.msra.mxu0 %v6653_v60  ;;  %v6854_v59 = vcombine.high %v434_v51, %v438_v52  ;;  %v298_v60 = vld [vmem:[#allocation8 + $0x310] sm:$0xff]  ;;  %v6853_v3 = vcombine.low %v434_v51, %v438_v52 }
 0x14d   :  { %2878 = vmatpush1.bf16.msra.mxu1 %v6781_v62  ;;  %2830 = vmatprep.subr.bf16.mxu0 %v6646_v0  ;;  %v302_v62 = vld [vmem:[#allocation8 + $0x330] sm:$0xff] }
 0x14e   :  { %2879 = vmatprep.subr.bf16.mxu1 %v6774_v1  ;;  %v426_v0 = vld [vmem:[#allocation8 + $0x710] sm:$0xff]  ;;  %v6718_v5 = vcombine.high %v298_v60, %v302_v62  ;;  %v6717_v11 = vcombine.low %v298_v60, %v302_v62 }
 0x14f   :  { %v430_v1 = vld [vmem:[#allocation8 + $0x730] sm:$0xff] }
 0x150   :  { %2831 = vmatpush1.bf16.msra.mxu0 %v6645_v7  ;;  %v6846_v6 = vcombine.high %v426_v0, %v430_v1  ;;  %v290_v7 = vld [vmem:[#allocation8 + $0x2d0] sm:$0xff]  ;;  %v6845_v12 = vcombine.low %v426_v0, %v430_v1 }
 0x151   :  { %2880 = vmatpush1.bf16.msra.mxu1 %v6773_v8  ;;  %2832 = vmatprep.subr.bf16.mxu0 %v6638_v9  ;;  %v294_v8 = vld [vmem:[#allocation8 + $0x2f0] sm:$0xff] }
 0x152   :  { %2881 = vmatprep.subr.bf16.mxu1 %v6766_v10  ;;  %v418_v9 = vld [vmem:[#allocation8 + $0x6d0] sm:$0xff]  ;;  %v6710_v13 = vcombine.high %v290_v7, %v294_v8  ;;  %v6709_v20 = vcombine.low %v290_v7, %v294_v8 }
 0x153   :  { %v422_v10 = vld [vmem:[#allocation8 + $0x6f0] sm:$0xff] }
 0x154   :  { %2833 = vmatpush1.bf16.msra.mxu0 %v6637_v15  ;;  %v6838_v14 = vcombine.high %v418_v9, %v422_v10  ;;  %v282_v15 = vld [vmem:[#allocation8 + $0x290] sm:$0xff]  ;;  %v6837_v22 = vcombine.low %v418_v9, %v422_v10 }
 0x155   :  { %2882 = vmatpush1.bf16.msra.mxu1 %v6765_v16  ;;  %2834 = vmatprep.subr.bf16.mxu0 %v6630_v18  ;;  %v286_v16 = vld [vmem:[#allocation8 + $0x2b0] sm:$0xff] }
 0x156   :  { %2883 = vmatprep.subr.bf16.mxu1 %v6758_v19  ;;  %v410_v18 = vld [vmem:[#allocation8 + $0x690] sm:$0xff]  ;;  %v6702_v23 = vcombine.high %v282_v15, %v286_v16  ;;  %v6701_v30 = vcombine.low %v282_v15, %v286_v16 }
 0x157   :  { %v414_v19 = vld [vmem:[#allocation8 + $0x6b0] sm:$0xff] }
 0x158   :  { %2835 = vmatpush1.bf16.msra.mxu0 %v6629_v26  ;;  %v6830_v24 = vcombine.high %v410_v18, %v414_v19  ;;  %v274_v26 = vld [vmem:[#allocation8 + $0x250] sm:$0xff]  ;;  %v6829_v31 = vcombine.low %v410_v18, %v414_v19 }
 0x159   :  { %2884 = vmatpush1.bf16.msra.mxu1 %v6757_v27  ;;  %2836 = vmatprep.subr.bf16.mxu0 %v6622_v28  ;;  %v278_v27 = vld [vmem:[#allocation8 + $0x270] sm:$0xff] }
 0x15a   :  { %2885 = vmatprep.subr.bf16.mxu1 %v6750_v29  ;;  %v402_v28 = vld [vmem:[#allocation8 + $0x650] sm:$0xff]  ;;  %v6694_v32 = vcombine.high %v274_v26, %v278_v27  ;;  %v6693_v40 = vcombine.low %v274_v26, %v278_v27 }
 0x15b   :  { %v406_v29 = vld [vmem:[#allocation8 + $0x670] sm:$0xff] }
 0x15c   :  { %2837 = vmatpush1.bf16.msra.mxu0 %v6621_v35  ;;  %v6822_v33 = vcombine.high %v402_v28, %v406_v29  ;;  %v266_v35 = vld [vmem:[#allocation8 + $0x210] sm:$0xff]  ;;  %v6821_v41 = vcombine.low %v402_v28, %v406_v29 }
 0x15d   :  { %2886 = vmatpush1.bf16.msra.mxu1 %v6749_v36  ;;  %2838 = vmatprep.subr.bf16.mxu0 %v6742_v38  ;;  %v270_v36 = vld [vmem:[#allocation8 + $0x230] sm:$0xff] }
 0x15e   :  { %2887 = vmatprep.subr.bf16.mxu1 %v6870_v39  ;;  %v394_v38 = vld [vmem:[#allocation8 + $0x610] sm:$0xff]  ;;  %v6686_v42 = vcombine.high %v266_v35, %v270_v36  ;;  %v6685_v48 = vcombine.low %v266_v35, %v270_v36 }
 0x15f   :  { %v398_v39 = vld [vmem:[#allocation8 + $0x630] sm:$0xff] }
 0x160   :  { %2839 = vmatpush2.bf16.msra.mxu0 %v6741_v44  ;;  %v6814_v43 = vcombine.high %v394_v38, %v398_v39  ;;  %v514_v44 = vld [vmem:[#allocation8 + $0x9d0] sm:$0xff]  ;;  %v6813_v49 = vcombine.low %v394_v38, %v398_v39 }
 0x161   :  { %2888 = vmatpush2.bf16.msra.mxu1 %v6869_v45  ;;  %2840 = vmatprep.subr.bf16.mxu0 %v6734_v46  ;;  %v518_v45 = vld [vmem:[#allocation8 + $0x9f0] sm:$0xff]  ;;  %v259_v46 = vld [vmem:[#allocation8 + $0x1d8] sm:$0xff] }
 0x162   :  { %2889 = vmatprep.subr.bf16.mxu1 %v6862_v47  ;;  %v263_v47 = vld [vmem:[#allocation8 + $0x1f8] sm:$0xff]  ;;  %v6934_v51 = vcombine.high %v514_v44, %v518_v45  ;;  %v6933_v60 = vcombine.low %v514_v44, %v518_v45 }
 0x163   :  { %v6680_v52 = vcombine.high %v259_v46, %v263_v47  ;;  %v6679_v62 = vcombine.low %v259_v46, %v263_v47  ;;  %v458_v47 = vld [vmem:[#allocation8 + $0x810] sm:$0xff] }
 0x164   :  { %2841 = vmatpush2.bf16.msra.mxu0 %v6733_v53  ;;  %v506_v53 = vld [vmem:[#allocation8 + $0x990] sm:$0xff] }
 0x165   :  { %2890 = vmatpush2.bf16.msra.mxu1 %v6861_v55  ;;  %2842 = vmatprep.subr.bf16.mxu0 %v6726_v56  ;;  %v510_v55 = vld [vmem:[#allocation8 + $0x9b0] sm:$0xff]  ;;  %v251_v56 = vld [vmem:[#allocation8 + $0x198] sm:$0xff] }
 0x166   :  { %2891 = vmatprep.subr.bf16.mxu1 %v6854_v59  ;;  %v255_v59 = vld [vmem:[#allocation8 + $0x1b8] sm:$0xff]  ;;  %v6926_v0 = vcombine.high %v506_v53, %v510_v55  ;;  %v6925_v7 = vcombine.low %v506_v53, %v510_v55 }
 0x167   :  { %v6672_v1 = vcombine.high %v251_v56, %v255_v59  ;;  %v6671_v8 = vcombine.low %v251_v56, %v255_v59  ;;  %v578_v59 = vld [vmem:[#allocation8 + $0xbd0] sm:$0xff] }
 0x168   :  { %2843 = vmatpush2.bf16.msra.mxu0 %v6725_v2  ;;  %v498_v2 = vld [vmem:[#allocation8 + $0x950] sm:$0xff] }
 0x169   :  { %2892 = vmatpush2.bf16.msra.mxu1 %v6853_v3  ;;  %2844 = vmatprep.subr.bf16.mxu0 %v6718_v5  ;;  %v502_v3 = vld [vmem:[#allocation8 + $0x970] sm:$0xff]  ;;  %v243_v5 = vld [vmem:[#allocation8 + $0x158] sm:$0xff] }
 0x16a   :  { %2893 = vmatprep.subr.bf16.mxu1 %v6846_v6  ;;  %v247_v6 = vld [vmem:[#allocation8 + $0x178] sm:$0xff]  ;;  %v6918_v9 = vcombine.high %v498_v2, %v502_v3  ;;  %v6917_v15 = vcombine.low %v498_v2, %v502_v3 }
 0x16b   :  { %v6664_v10 = vcombine.high %v243_v5, %v247_v6  ;;  %v6663_v16 = vcombine.low %v243_v5, %v247_v6  ;;  %v570_v6 = vld [vmem:[#allocation8 + $0xb90] sm:$0xff] }
 0x16c   :  { %2845 = vmatpush2.bf16.msra.mxu0 %v6717_v11  ;;  %v490_v11 = vld [vmem:[#allocation8 + $0x910] sm:$0xff] }
 0x16d   :  { %2894 = vmatpush2.bf16.msra.mxu1 %v6845_v12  ;;  %2846 = vmatprep.subr.bf16.mxu0 %v6710_v13  ;;  %v494_v12 = vld [vmem:[#allocation8 + $0x930] sm:$0xff]  ;;  %v235_v13 = vld [vmem:[#allocation8 + $0x118] sm:$0xff] }
 0x16e   :  { %2895 = vmatprep.subr.bf16.mxu1 %v6838_v14  ;;  %v239_v14 = vld [vmem:[#allocation8 + $0x138] sm:$0xff]  ;;  %v6910_v18 = vcombine.high %v490_v11, %v494_v12  ;;  %v6909_v26 = vcombine.low %v490_v11, %v494_v12 }
 0x16f   :  { %v6656_v19 = vcombine.high %v235_v13, %v239_v14  ;;  %v6655_v27 = vcombine.low %v235_v13, %v239_v14  ;;  %v562_v14 = vld [vmem:[#allocation8 + $0xb50] sm:$0xff] }
 0x170   :  { %2847 = vmatpush2.bf16.msra.mxu0 %v6709_v20  ;;  %v482_v20 = vld [vmem:[#allocation8 + $0x8d0] sm:$0xff] }
 0x171   :  { %2896 = vmatpush2.bf16.msra.mxu1 %v6837_v22  ;;  %2848 = vmatprep.subr.bf16.mxu0 %v6702_v23  ;;  %v486_v22 = vld [vmem:[#allocation8 + $0x8f0] sm:$0xff]  ;;  %v227_v23 = vld [vmem:[#allocation8 + $0xd8] sm:$0xff] }
 0x172   :  { %2897 = vmatprep.subr.bf16.mxu1 %v6830_v24  ;;  %v231_v24 = vld [vmem:[#allocation8 + $0xf8] sm:$0xff]  ;;  %v6902_v28 = vcombine.high %v482_v20, %v486_v22  ;;  %v6901_v35 = vcombine.low %v482_v20, %v486_v22 }
 0x173   :  { %v6648_v29 = vcombine.high %v227_v23, %v231_v24  ;;  %v6647_v36 = vcombine.low %v227_v23, %v231_v24  ;;  %v554_v24 = vld [vmem:[#allocation8 + $0xb10] sm:$0xff] }
 0x174   :  { %2849 = vmatpush2.bf16.msra.mxu0 %v6701_v30  ;;  %v474_v30 = vld [vmem:[#allocation8 + $0x890] sm:$0xff] }
 0x175   :  { %2898 = vmatpush2.bf16.msra.mxu1 %v6829_v31  ;;  %2850 = vmatprep.subr.bf16.mxu0 %v6694_v32  ;;  %v478_v31 = vld [vmem:[#allocation8 + $0x8b0] sm:$0xff]  ;;  %v219_v32 = vld [vmem:[#allocation8 + $0x98] sm:$0xff] }
 0x176   :  { %2899 = vmatprep.subr.bf16.mxu1 %v6822_v33  ;;  %v223_v33 = vld [vmem:[#allocation8 + $0xb8] sm:$0xff]  ;;  %v6894_v38 = vcombine.high %v474_v30, %v478_v31  ;;  %v6893_v44 = vcombine.low %v474_v30, %v478_v31 }
 0x177   :  { %v6640_v39 = vcombine.high %v219_v32, %v223_v33  ;;  %v6639_v45 = vcombine.low %v219_v32, %v223_v33 }
 0x178   :  { %2851 = vmatpush2.bf16.msra.mxu0 %v6693_v40  ;;  %v466_v40 = vld [vmem:[#allocation8 + $0x850] sm:$0xff] }
 0x179   :  { %2900 = vmatpush2.bf16.msra.mxu1 %v6821_v41  ;;  %2852 = vmatprep.subr.bf16.mxu0 %v6686_v42  ;;  %v470_v41 = vld [vmem:[#allocation8 + $0x870] sm:$0xff]  ;;  %v211_v42 = vld [vmem:[#allocation8 + $0x58] sm:$0xff] }
 0x17a   :  { %2901 = vmatprep.subr.bf16.mxu1 %v6814_v43  ;;  %v215_v43 = vld [vmem:[#allocation8 + $0x78] sm:$0xff]  ;;  %v6886_v46 = vcombine.high %v466_v40, %v470_v41 }
 0x17b   :  { %v6631_v53 = vcombine.low %v211_v42, %v215_v43 }
 0x17c   :  { %2853 = vmatpush2.bf16.msra.mxu0 %v6685_v48  ;;  %v462_v48 = vld [vmem:[#allocation8 + $0x830] sm:$0xff] }
 0x17d   :  { %2902 = vmatpush2.bf16.msra.mxu1 %v6813_v49  ;;  %2920 = vmatprep.subr.bf16.mxu0 %v6934_v51  ;;  %v203_v49 = vld [vmem:[#allocation8 + $0x18] sm:$0xff]  ;;  %v6878_v55 = vcombine.high %v458_v47, %v462_v48 }
 0x17e   :  { %2969 = vmatprep.subr.bf16.mxu1 %v6680_v52  ;;  %v207_v51 = vld [vmem:[#allocation8 + $0x38] sm:$0xff]  ;;  %v6885_v52 = vcombine.low %v466_v40, %v470_v41 }
 0x17f   :  { %2855 = vmatmul.mubr.bf16.vlgmr.msra.gmra.mxu0 %v8432_v21  ;;  %v6624_v56 = vcombine.high %v203_v49, %v207_v51  ;;  %v6623_v2 = vcombine.low %v203_v49, %v207_v51  ;;  %v295_v40 = vld [vmem:[#allocation8 + $0x2f8] sm:$0xff] }
 0x180   :  { %2904 = vmatmul.mubr.bf16.vlgmr.msra.gmra.mxu1 %v8434_v25  ;;  %2921 = vmatpush1.bf16.msra.mxu0 %v6933_v60  ;;  %v582_v60 = vld [vmem:[#allocation8 + $0xbf0] sm:$0xff] }
 0x181   :  { %2970 = vmatpush1.bf16.msra.mxu1 %v6679_v62  ;;  %2922 = vmatprep.subr.bf16.mxu0 %v6926_v0  ;;  %v323_v62 = vld [vmem:[#allocation8 + $0x3d8] sm:$0xff]  ;;  %v6998_v3 = vcombine.high %v578_v59, %v582_v60 }
 0x182   :  { %2971 = vmatprep.subr.bf16.mxu1 %v6672_v1  ;;  %2862 = vmatprep.mubr.bf16.mxu0 %v8436_v34  ;;  %v327_v0 = vld [vmem:[#allocation8 + $0x3f8] sm:$0xff]  ;;  %v6877_v1 = vcombine.low %v458_v47, %v462_v48 }
 0x183   :  { %2911 = vmatprep.mubr.bf16.mxu1 %v8439_v37  ;;  %v6744_v5 = vcombine.high %v323_v62, %v327_v0  ;;  %v6743_v11 = vcombine.low %v323_v62, %v327_v0  ;;  %v283_v47 = vld [vmem:[#allocation8 + $0x298] sm:$0xff] }
 0x184   :  { %2923 = vmatpush1.bf16.msra.mxu0 %v6925_v7  ;;  %v574_v7 = vld [vmem:[#allocation8 + $0xbb0] sm:$0xff]  ;;  %v287_v48 = vld [vmem:[#allocation8 + $0x2b8] sm:$0xff] }
 0x185   :  { %2972 = vmatpush1.bf16.msra.mxu1 %v6671_v8  ;;  %2924 = vmatprep.subr.bf16.mxu0 %v6918_v9  ;;  %v315_v8 = vld [vmem:[#allocation8 + $0x398] sm:$0xff]  ;;  %v6990_v12 = vcombine.high %v570_v6, %v574_v7 }
 0x186   :  { %2973 = vmatprep.subr.bf16.mxu1 %v6664_v10  ;;  %v319_v9 = vld [vmem:[#allocation8 + $0x3b8] sm:$0xff]  ;;  %v6997_v10 = vcombine.low %v578_v59, %v582_v60  ;;  %v2591_v59 = vpop.f32.mrf.mxu1 }
 0x187   :  { %2863 = vmatmul.mubr.bf16.gmra.mxu0 %v8444_v50  ;;  %v6736_v13 = vcombine.high %v315_v8, %v319_v9  ;;  %v6735_v20 = vcombine.low %v315_v8, %v319_v9  ;;  %v275_v62 = vld [vmem:[#allocation8 + $0x258] sm:$0xff]  ;;  %v526_v8 = vld [vmem:[#allocation8 + $0xa30] sm:$0xff]  ;;  %v3130_v9 = vlaneseq }
 0x188   :  { %2925 = vmatpush1.bf16.msra.mxu0 %v6917_v15  ;;  %2912 = vmatmul.mubr.bf16.gmra.mxu1 %v8446_v54  ;;  %v566_v15 = vld [vmem:[#allocation8 + $0xb70] sm:$0xff]  ;;  %v279_v0 = vld [vmem:[#allocation8 + $0x278] sm:$0xff] }
 0x189   :  { %2974 = vmatpush1.bf16.msra.mxu1 %v6663_v16  ;;  %2926 = vmatprep.subr.bf16.mxu0 %v6910_v18  ;;  %v307_v16 = vld [vmem:[#allocation8 + $0x358] sm:$0xff]  ;;  %v6982_v22 = vcombine.high %v562_v14, %v566_v15  ;;  %v6981_v30 = vcombine.low %v562_v14, %v566_v15  ;;  %v6695_v15 = vcombine.low %v275_v62, %v279_v0 }
 0x18a   :  { %2975 = vmatprep.subr.bf16.mxu1 %v6656_v19  ;;  %2952 = vmatprep.mubr.bf16.mxu0 %v8448_v61  ;;  %v311_v18 = vld [vmem:[#allocation8 + $0x378] sm:$0xff]  ;;  %v6989_v19 = vcombine.low %v570_v6, %v574_v7  ;;  %v6696_v6 = vcombine.high %v275_v62, %v279_v0  ;;  %v522_v7 = vld [vmem:[#allocation8 + $0xa10] sm:$0xff] }
 0x18b   :  { %3001 = vmatprep.mubr.bf16.mxu1 %v8426_v58  ;;  %v6632_v58 = vcombine.high %v211_v42, %v215_v43  ;;  %v6728_v23 = vcombine.high %v307_v16, %v311_v18  ;;  %v6727_v31 = vcombine.low %v307_v16, %v311_v18  ;;  %v6942_v16 = vcombine.high %v522_v7, %v526_v8  ;;  %v503_v62 = vld [vmem:[#allocation8 + $0x978] sm:$0xff] }
 0x18c   :  { %2927 = vmatpush1.bf16.msra.mxu0 %v6909_v26  ;;  %v558_v26 = vld [vmem:[#allocation8 + $0xb30] sm:$0xff] }
 0x18d   :  { %2976 = vmatpush1.bf16.msra.mxu1 %v6655_v27  ;;  %2928 = vmatprep.subr.bf16.mxu0 %v6902_v28  ;;  %v8484_v27 = vpop.f32.mrf.mxu0  ;;  %v299_v28 = vld [vmem:[#allocation8 + $0x318] sm:$0xff]  ;;  %v6974_v32 = vcombine.high %v554_v24, %v558_v26  ;;  %v6973_v41 = vcombine.low %v554_v24, %v558_v26 }
 0x18e   :  { %2977 = vmatprep.subr.bf16.mxu1 %v6648_v29  ;;  %v303_v29 = vld [vmem:[#allocation8 + $0x338] sm:$0xff] }
 0x18f   :  { %v6720_v33 = vcombine.high %v299_v28, %v303_v29  ;;  %v6719_v42 = vcombine.low %v299_v28, %v303_v29  ;;  %v515_v24 = vld [vmem:[#allocation8 + $0x9d8] sm:$0xff]  ;;  %v6941_v28 = vcombine.low %v522_v7, %v526_v8 }
 0x190   :  { %2929 = vmatpush1.bf16.msra.mxu0 %v6901_v35  ;;  %v546_v35 = vld [vmem:[#allocation8 + $0xad0] sm:$0xff]  ;;  %v519_v26 = vld [vmem:[#allocation8 + $0x9f8] sm:$0xff] }
 0x191   :  { %2978 = vmatpush1.bf16.msra.mxu1 %v6647_v36  ;;  %2930 = vmatprep.subr.bf16.mxu0 %v6894_v38  ;;  %v550_v36 = vld [vmem:[#allocation8 + $0xaf0] sm:$0xff]  ;;  %v8486_v38 = vpop.f32.mrf.mxu0 }
 0x192   :  { %2979 = vmatprep.subr.bf16.mxu1 %v6640_v39  ;;  %v291_v39 = vld [vmem:[#allocation8 + $0x2d8] sm:$0xff]  ;;  %v6966_v43 = vcombine.high %v546_v35, %v550_v36  ;;  %v6965_v49 = vcombine.low %v546_v35, %v550_v36 }
 0x193   :  { %v6711_v51 = vcombine.low %v291_v39, %v295_v40  ;;  %v379_v35 = vld [vmem:[#allocation8 + $0x598] sm:$0xff] }
 0x194   :  { %2931 = vmatpush1.bf16.msra.mxu0 %v6893_v44  ;;  %v6712_v44 = vcombine.high %v291_v39, %v295_v40  ;;  %v383_v36 = vld [vmem:[#allocation8 + $0x5b8] sm:$0xff]  ;;  %v8501_v40 = vld [vmem:[#allocation11] sm:$0xf] }
 0x195   :  { %2980 = vmatpush1.bf16.msra.mxu1 %v6639_v45  ;;  %2932 = vmatprep.subr.bf16.mxu0 %v6886_v46  ;;  %v538_v45 = vld [vmem:[#allocation8 + $0xa90] sm:$0xff] }
 0x196   :  { %2981 = vmatprep.subr.bf16.mxu1 %v6632_v58  ;;  %v542_v46 = vld [vmem:[#allocation8 + $0xab0] sm:$0xff]  ;;  %v8488_v58 = vpop.f32.mrf.mxu0 }
 0x198   :  { %2933 = vmatpush1.bf16.msra.mxu0 %v6885_v52  ;;  %v6958_v52 = vcombine.high %v538_v45, %v542_v46  ;;  %v8490_v60 = vpop.f32.mrf.mxu0 }
 0x199   :  { %2982 = vmatpush1.bf16.msra.mxu1 %v6631_v53  ;;  %2934 = vmatprep.subr.bf16.mxu0 %v6878_v55  ;;  %v6704_v53 = vcombine.high %v283_v47, %v287_v48  ;;  %v530_v55 = vld [vmem:[#allocation8 + $0xa50] sm:$0xff] }
 0x19a   :  { %2983 = vmatprep.subr.bf16.mxu1 %v6624_v56  ;;  %v534_v56 = vld [vmem:[#allocation8 + $0xa70] sm:$0xff] }
 0x19c   :  { %2935 = vmatpush1.bf16.msra.mxu0 %v6877_v1  ;;  %v6957_v1 = vcombine.low %v538_v45, %v542_v46 }
 0x19d   :  { %2984 = vmatpush1.bf16.msra.mxu1 %v6623_v2  ;;  %2936 = vmatprep.subr.bf16.mxu0 %v6998_v3  ;;  %v8492_v2 = vpop.f32.mrf.mxu0  ;;  %v6703_v3 = vcombine.low %v283_v47, %v287_v48  ;;  %v6935_v47 = vcombine.low %v515_v24, %v519_v26  ;;  %v6800_v48 = vcombine.high %v379_v35, %v383_v36 }
 0x19e   :  { %2985 = vmatprep.subr.bf16.mxu1 %v6744_v5  ;;  %v6950_v5 = vcombine.high %v530_v55, %v534_v56 }
 0x19f   :  { %v8494_v14 = vpop.f32.mrf.mxu0 }
 0x1a0   :  { %2937 = vmatpush2.bf16.msra.mxu0 %v6997_v10  ;;  %v2593_v10 = vpop.f32.mrf.mxu1 }
 0x1a1   :  { %2986 = vmatpush2.bf16.msra.mxu1 %v6743_v11  ;;  %2938 = vmatprep.subr.bf16.mxu0 %v6990_v12  ;;  %v267_v11 = vld [vmem:[#allocation8 + $0x218] sm:$0xff]  ;;  %v8498_v29 = vpop.f32.mrf.mxu0 }
 0x1a2   :  { %2987 = vmatprep.subr.bf16.mxu1 %v6736_v13  ;;  %v271_v12 = vld [vmem:[#allocation8 + $0x238] sm:$0xff]  ;;  %v6949_v13 = vcombine.low %v530_v55, %v534_v56 }
 0x1a3   :  { %v6688_v18 = vcombine.high %v267_v11, %v271_v12  ;;  %v8504_v46 = vpop.f32.mrf.mxu0  ;;  %v375_v55 = vld [vmem:[#allocation8 + $0x578] sm:$0xff] }
 0x1a4   :  { %2939 = vmatpush2.bf16.msra.mxu0 %v6989_v19  ;;  %v8496_v19 = vshrl.u32 %v3130_v9, 7  ;;  %v499_v56 = vld [vmem:[#allocation8 + $0x958] sm:$0xff] }
 0x1a5   :  { %2988 = vmatpush2.bf16.msra.mxu1 %v6735_v20  ;;  %2940 = vmatprep.subr.bf16.mxu0 %v6982_v22  ;;  %v387_v20 = vld [vmem:[#allocation8 + $0x5d8] sm:$0xff]  ;;  %v6920_v9 = vcombine.high %v499_v56, %v503_v62 }
 0x1a6   :  { %2989 = vmatprep.subr.bf16.mxu1 %v6728_v23  ;;  %9904 = vst [vmem:[#allocation28_spill] sm:$0xff] %v8496_v19  ;;  %v391_v22 = vld [vmem:[#allocation8 + $0x5f8] sm:$0xff]  ;;  %v2595_v23 = vpop.f32.mrf.mxu1 }
 0x1a8   :  { %2941 = vmatpush2.bf16.msra.mxu0 %v6981_v30  ;;  %v6687_v30 = vcombine.low %v267_v11, %v271_v12  ;;  %v2597_v39 = vpop.f32.mrf.mxu1  ;;  %v2596_v11 = vadd.f32 %v2595_v23, %v8488_v58 }
 0x1a9   :  { %2990 = vmatpush2.bf16.msra.mxu1 %v6727_v31  ;;  %2942 = vmatprep.subr.bf16.mxu0 %v6974_v32  ;;  %v6808_v31 = vcombine.high %v387_v20, %v391_v22  ;;  %v9801_v32 = vsub.s32 0, %v8496_v19 }
 0x1aa   :  { %2991 = vmatprep.subr.bf16.mxu1 %v6720_v33  ;;  %v6936_v33 = vcombine.high %v515_v24, %v519_v26  ;;  %v2601_v45 = vpop.f32.mrf.mxu1  ;;  %v6919_v26 = vcombine.low %v499_v56, %v503_v62  ;;  %v347_v56 = vld [vmem:[#allocation8 + $0x498] sm:$0xff] }
 0x1ab   :  { %v351_v62 = vld [vmem:[#allocation8 + $0x4b8] sm:$0xff] }
 0x1ac   :  { %2943 = vmatpush2.bf16.msra.mxu0 %v6973_v41  ;;  %v3229_v41 = vsub.s32 1, %v8496_v19 }
 0x1ad   :  { %2992 = vmatpush2.bf16.msra.mxu1 %v6719_v42  ;;  %2944 = vmatprep.subr.bf16.mxu0 %v6966_v43  ;;  %v507_v42 = vld [vmem:[#allocation8 + $0x998] sm:$0xff] }
 0x1ae   :  { %2993 = vmatprep.subr.bf16.mxu1 %v6712_v44  ;;  %v511_v43 = vld [vmem:[#allocation8 + $0x9b8] sm:$0xff]  ;;  %v6807_v44 = vcombine.low %v387_v20, %v391_v22 }
 0x1af   :  { %v6927_v7 = vcombine.low %v507_v42, %v511_v43 }
 0x1b0   :  { %2945 = vmatpush2.bf16.msra.mxu0 %v6965_v49  ;;  %v8506_v49 = vld [vmem:[#allocation8 + $0x558] sm:$0xff] }
 0x1b1   :  { %2994 = vmatpush2.bf16.msra.mxu1 %v6711_v51  ;;  %2946 = vmatprep.subr.bf16.mxu0 %v6958_v52  ;;  %v2592_v51 = vadd.f32 %v2591_v59, %v8484_v27  ;;  %v8512_v52 = vrot.slane %v8501_v40, %v9801_v32  ;;  %v6799_v27 = vcombine.low %v379_v35, %v383_v36  ;;  %v2603_v59 = vpop.f32.mrf.mxu1  ;;  %v359_v35 = vld [vmem:[#allocation8 + $0x4f8] sm:$0xff]  ;;  %v8773_v32 = vld [vmem:[#allocation12] sm:$0xff] }
 0x1b2   :  { %2995 = vmatprep.subr.bf16.mxu1 %v6704_v53  ;;  %v6928_v53 = vcombine.high %v507_v42, %v511_v43  ;;  %v6792_v8 = vcombine.high %v8506_v49, %v375_v55  ;;  %v6791_v58 = vcombine.low %v8506_v49, %v375_v55  ;;  %v483_v36 = vld [vmem:[#allocation8 + $0x8d8] sm:$0xff]  ;;  %v2604_v43 = vadd.f32 %v2603_v59, %v8494_v14 }
 0x1b3   :  { %v2605_v23 = vpop.f32.mrf.mxu1  ;;  %9911 = vst [vmem:[#allocation35_spill] sm:$0xff] %v8773_v32 }
 0x1b4   :  { %2947 = vmatpush2.bf16.msra.mxu0 %v6957_v1  ;;  %v8516_v1 = vrot.slane %v8501_v40, %v3229_v41 }
 0x1b5   :  { %2996 = vmatpush2.bf16.msra.mxu1 %v6703_v3  ;;  %2948 = vmatprep.subr.bf16.mxu0 %v6950_v5  ;;  %v2594_v3 = vadd.f32 %v2593_v10, %v8486_v38  ;;  %v363_v38 = vld [vmem:[#allocation8 + $0x518] sm:$0xff] }
 0x1b6   :  { %2997 = vmatprep.subr.bf16.mxu1 %v6696_v6 }
 0x1b8   :  { %2949 = vmatpush2.bf16.msra.mxu0 %v6949_v13 }
 0x1b9   :  { %2998 = vmatpush2.bf16.msra.mxu1 %v6695_v15  ;;  %2950 = vmatprep.subr.bf16.mxu0 %v6942_v16  ;;  %v491_v15 = vld [vmem:[#allocation8 + $0x918] sm:$0xff] }
 0x1ba   :  { %2999 = vmatprep.subr.bf16.mxu1 %v6688_v18  ;;  %v495_v16 = vld [vmem:[#allocation8 + $0x938] sm:$0xff]  ;;  %v2598_v18 = vadd.f32 %v2597_v39, %v8490_v60 }
 0x1bb   :  { %v487_v39 = vld [vmem:[#allocation8 + $0x8f8] sm:$0xff] }
 0x1bc   :  { %2951 = vmatpush2.bf16.msra.mxu0 %v6941_v28 }
 0x1bd   :  { %3000 = vmatpush2.bf16.msra.mxu1 %v6687_v30  ;;  %3022 = vmatprep.subr.bf16.mxu0 %v6808_v31  ;;  %v355_v30 = vld [vmem:[#allocation8 + $0x4d8] sm:$0xff]  ;;  %v2602_v31 = vadd.f32 %v2601_v45, %v8492_v2  ;;  %v2607_v2 = vpop.f32.mrf.mxu1 }
 0x1be   :  { %3075 = vmatprep.subr.bf16.mxu1 %v6936_v33  ;;  %v6912_v33 = vcombine.high %v491_v15, %v495_v16  ;;  %v6776_v49 = vcombine.high %v355_v30, %v359_v35  ;;  %v6775_v59 = vcombine.low %v355_v30, %v359_v35  ;;  %v579_v30 = vld [vmem:[#allocation8 + $0xbd8] sm:$0xff] }
 0x1bf   :  { %v2644_v0 = vpop.f32.mrf.mxu0  ;;  %2953 = vmatmul.mubr.bf16.vlgmr.msra.gmra.mxu0 %v8454_v57 }
 0x1c0   :  { %v2645_v5 = vadd.f32 %v2644_v0, %v2592_v51  ;;  %3002 = vmatmul.mubr.bf16.vlgmr.msra.gmra.mxu1 %v8432_v21  ;;  %3023 = vmatpush1.bf16.msra.mxu0 %v6807_v44  ;;  %v367_v21 = vld [vmem:[#allocation8 + $0x538] sm:$0xff]  ;;  %v6904_v51 = vcombine.high %v483_v36, %v487_v39 }
 0x1c1   :  { %3076 = vmatpush1.bf16.msra.mxu1 %v6935_v47  ;;  %v2646_v6 = vpop.f32.mrf.mxu0  ;;  %3024 = vmatprep.subr.bf16.mxu0 %v6800_v48  ;;  %v6784_v28 = vcombine.high %v363_v38, %v367_v21  ;;  %v6783_v42 = vcombine.low %v363_v38, %v367_v21  ;;  %v6911_v48 = vcombine.low %v491_v15, %v495_v16 }
 0x1c2   :  { %v3243_v12 = vadd.f32 %v8512_v52, %v2645_v5  ;;  %v2647_v13 = vadd.f32 %v2646_v6, %v2594_v3  ;;  %3077 = vmatprep.subr.bf16.mxu1 %v6928_v53  ;;  %2960 = vmatprep.mubr.bf16.mxu0 %v8456_v4  ;;  %v2606_v53 = vadd.f32 %v2605_v23, %v8498_v29  ;;  %v479_v3 = vld [vmem:[#allocation8 + $0x8b8] sm:$0xff] }
 0x1c3   :  { %v2648_v10 = vpop.f32.mrf.mxu0  ;;  %3011 = vmatprep.mubr.bf16.mxu1 %v8436_v34  ;;  %v2608_v5 = vadd.f32 %v2607_v2, %v8504_v46  ;;  %v467_v46 = vld [vmem:[#allocation8 + $0x858] sm:$0xff]  ;;  %v6767_v21 = vcombine.low %v347_v56, %v351_v62 }
 0x1c4   :  { %3259 = vst [vmem:[#allocation2] sm:$0xff] %v3243_v12  ;;  %v3244_v20 = vadd.f32 %v8516_v1, %v2647_v13  ;;  %v2649_v22 = vadd.f32 %v2648_v10, %v2596_v11  ;;  %3025 = vmatpush1.bf16.msra.mxu0 %v6799_v27  ;;  %v343_v12 = vld [vmem:[#allocation8 + $0x478] sm:$0xff] }
 0x1c5   :  { %3078 = vmatpush1.bf16.msra.mxu1 %v6927_v7  ;;  %v2650_v24 = vpop.f32.mrf.mxu0  ;;  %3026 = vmatprep.subr.bf16.mxu0 %v6792_v8  ;;  %v6903_v7 = vcombine.low %v483_v36, %v487_v39  ;;  %v6768_v8 = vcombine.high %v347_v56, %v351_v62  ;;  %v471_v13 = vld [vmem:[#allocation8 + $0x878] sm:$0xff] }
 0x1c6   :  { %3260 = vst [vmem:[#allocation2 + $0x8] sm:$0xff] %v3244_v20  ;;  %v3247_v34 = vadd.f32 %v8512_v52, %v2649_v22  ;;  %v2651_v60 = vadd.f32 %v2650_v24, %v2598_v18  ;;  %3079 = vmatprep.subr.bf16.mxu1 %v6920_v9  ;;  %v6888_v16 = vcombine.high %v467_v46, %v471_v13  ;;  %v335_v18 = vld [vmem:[#allocation8 + $0x438] sm:$0xff] }
 0x1c7   :  { %v2654_v41 = vpop.f32.mrf.mxu0  ;;  %2961 = vmatmul.mubr.bf16.gmra.mxu0 %v8461_v17  ;;  %v459_v20 = vld [vmem:[#allocation8 + $0x818] sm:$0xff]  ;;  %v6887_v23 = vcombine.low %v467_v46, %v471_v13 }
 0x1c8   :  { %3263 = vst [vmem:[#allocation2 + $0x20] sm:$0xff] %v3247_v34  ;;  %v3248_v44 = vadd.f32 %v8516_v1, %v2651_v60  ;;  %v2655_v47 = vadd.f32 %v2654_v41, %v2602_v31  ;;  %3027 = vmatpush1.bf16.msra.mxu0 %v6791_v58  ;;  %3012 = vmatmul.mubr.bf16.gmra.mxu1 %v8444_v50  ;;  %v475_v50 = vld [vmem:[#allocation8 + $0x898] sm:$0xff] }
 0x1c9   :  { %3080 = vmatpush1.bf16.msra.mxu1 %v6919_v26  ;;  %v2656_v45 = vpop.f32.mrf.mxu0  ;;  %3028 = vmatprep.subr.bf16.mxu0 %v6784_v28  ;;  %v6896_v11 = vcombine.high %v475_v50, %v479_v3  ;;  %v6895_v10 = vcombine.low %v475_v50, %v479_v3  ;;  %v463_v22 = vld [vmem:[#allocation8 + $0x838] sm:$0xff] }
 0x1ca   :  { %3264 = vst [vmem:[#allocation2 + $0x28] sm:$0xff] %v3248_v44  ;;  %v3251_v55 = vadd.f32 %v8512_v52, %v2655_v47  ;;  %v2657_v14 = vadd.f32 %v2656_v45, %v2604_v43  ;;  %3081 = vmatprep.subr.bf16.mxu1 %v6912_v33  ;;  %3054 = vmatprep.mubr.bf16.mxu0 %v8428_v63  ;;  %v451_v26 = vld [vmem:[#allocation8 + $0x7d8] sm:$0xff] }
 0x1cb   :  { %v2658_v0 = vpop.f32.mrf.mxu0  ;;  %3107 = vmatprep.mubr.bf16.mxu1 %v8448_v61  ;;  %v339_v61 = vld [vmem:[#allocation8 + $0x458] sm:$0xff]  ;;  %v6879_v60 = vcombine.low %v459_v20, %v463_v22 }
 0x1cc   :  { %3267 = vst [vmem:[#allocation2 + $0x40] sm:$0xff] %v3251_v55  ;;  %v3252_v27 = vadd.f32 %v8516_v1, %v2657_v14  ;;  %v2659_v29 = vadd.f32 %v2658_v0, %v2606_v53  ;;  %3029 = vmatpush1.bf16.msra.mxu0 %v6783_v42  ;;  %v6760_v15 = vcombine.high %v339_v61, %v343_v12  ;;  %v455_v28 = vld [vmem:[#allocation8 + $0x7f8] sm:$0xff] }
 0x1cd   :  { %3082 = vmatpush1.bf16.msra.mxu1 %v6911_v48  ;;  %v2660_v6 = vpop.f32.mrf.mxu0  ;;  %3030 = vmatprep.subr.bf16.mxu0 %v6776_v49  ;;  %v6759_v58 = vcombine.low %v339_v61, %v343_v12  ;;  %v583_v31 = vld [vmem:[#allocation8 + $0xbf8] sm:$0xff]  ;;  %v6872_v33 = vcombine.high %v451_v26, %v455_v28  ;;  %v6871_v43 = vcombine.low %v451_v26, %v455_v28 }
 0x1ce   :  { %3268 = vst [vmem:[#allocation2 + $0x48] sm:$0xff] %v3252_v27  ;;  %v3255_v63 = vadd.f32 %v8512_v52, %v2659_v29  ;;  %v2661_v9 = vadd.f32 %v2660_v6, %v2608_v5  ;;  %3083 = vmatprep.subr.bf16.mxu1 %v6904_v51  ;;  %v331_v52 = vld [vmem:[#allocation8 + $0x418] sm:$0xff]  ;;  %v7000_v35 = vcombine.high %v579_v30, %v583_v31  ;;  %v8542_v5 = vpop.f32.mrf.mxu1 }
 0x1cf   :  { %v6752_v24 = vcombine.high %v331_v52, %v335_v18  ;;  %v6751_v34 = vcombine.low %v331_v52, %v335_v18  ;;  %v443_v36 = vld [vmem:[#allocation8 + $0x798] sm:$0xff]  ;;  %v6999_v44 = vcombine.low %v579_v30, %v583_v31 }
 0x1d0   :  { %3271 = vst [vmem:[#allocation2 + $0x60] sm:$0xff] %v3255_v63  ;;  %v3256_v38 = vadd.f32 %v8516_v1, %v2661_v9  ;;  %3031 = vmatpush1.bf16.msra.mxu0 %v6775_v59  ;;  %v6880_v1 = vcombine.high %v459_v20, %v463_v22  ;;  %v447_v39 = vld [vmem:[#allocation8 + $0x7b8] sm:$0xff] }
 0x1d1   :  { %3084 = vmatpush1.bf16.msra.mxu1 %v6903_v7  ;;  %3032 = vmatprep.subr.bf16.mxu0 %v6768_v8  ;;  %v571_v41 = vld [vmem:[#allocation8 + $0xb98] sm:$0xff]  ;;  %v6864_v47 = vcombine.high %v443_v36, %v447_v39  ;;  %v6863_v53 = vcombine.low %v443_v36, %v447_v39 }
 0x1d2   :  { %3272 = vst [vmem:[#allocation2 + $0x68] sm:$0xff] %v3256_v38  ;;  %3085 = vmatprep.subr.bf16.mxu1 %v6896_v11  ;;  %v575_v42 = vld [vmem:[#allocation8 + $0xbb8] sm:$0xff]  ;;  %v8544_v11 = vpop.f32.mrf.mxu1 }
 0x1d3   :  { %v6992_v2 = vcombine.high %v571_v41, %v575_v42  ;;  %v435_v45 = vld [vmem:[#allocation8 + $0x758] sm:$0xff]  ;;  %v6991_v55 = vcombine.low %v571_v41, %v575_v42 }
 0x1d4   :  { %3033 = vmatpush1.bf16.msra.mxu0 %v6767_v21  ;;  %v439_v48 = vld [vmem:[#allocation8 + $0x778] sm:$0xff] }
 0x1d5   :  { %3086 = vmatpush1.bf16.msra.mxu1 %v6895_v10  ;;  %3034 = vmatprep.subr.bf16.mxu0 %v6760_v15  ;;  %v563_v49 = vld [vmem:[#allocation8 + $0xb58] sm:$0xff]  ;;  %v6856_v14 = vcombine.high %v435_v45, %v439_v48  ;;  %v6855_v27 = vcombine.low %v435_v45, %v439_v48 }
 0x1d6   :  { %3087 = vmatprep.subr.bf16.mxu1 %v6888_v16  ;;  %v567_v51 = vld [vmem:[#allocation8 + $0xb78] sm:$0xff]  ;;  %v8546_v16 = vpop.f32.mrf.mxu1 }
 0x1d7   :  { %v6984_v56 = vcombine.high %v563_v49, %v567_v51  ;;  %v427_v62 = vld [vmem:[#allocation8 + $0x718] sm:$0xff]  ;;  %v6983_v29 = vcombine.low %v563_v49, %v567_v51  ;;  %v8556_v49 = vld [vmem:[#allocation12 + $0x1e8] sm:$0xff]  ;;  %v8558_v51 = vld [vmem:[#allocation12 + $0x1f8] sm:$0xff] }
 0x1d8   :  { %3035 = vmatpush1.bf16.msra.mxu0 %v6759_v58  ;;  %v431_v0 = vld [vmem:[#allocation8 + $0x738] sm:$0xff]  ;;  %v8548_v26 = vpop.f32.mrf.mxu1 }
 0x1d9   :  { %3088 = vmatpush1.bf16.msra.mxu1 %v6887_v23  ;;  %3036 = vmatprep.subr.bf16.mxu0 %v6752_v24  ;;  %v555_v50 = vld [vmem:[#allocation8 + $0xb18] sm:$0xff]  ;;  %v6848_v59 = vcombine.high %v427_v62, %v431_v0  ;;  %v6847_v61 = vcombine.low %v427_v62, %v431_v0  ;;  %v9799_v62 = vsub.s32 3, %v8496_v19  ;;  %v8570_v0 = vld [vmem:[#allocation12 + $0x1c8] sm:$0xff] }
 0x1da   :  { %3089 = vmatprep.subr.bf16.mxu1 %v6880_v1  ;;  %v559_v3 = vld [vmem:[#allocation8 + $0xb38] sm:$0xff] }
 0x1db   :  { %v6976_v6 = vcombine.high %v555_v50, %v559_v3  ;;  %v419_v7 = vld [vmem:[#allocation8 + $0x6d8] sm:$0xff]  ;;  %v6975_v12 = vcombine.low %v555_v50, %v559_v3  ;;  %v8573_v3 = vld [vmem:[#allocation12 + $0x1d8] sm:$0xff] }
 0x1dc   :  { %3037 = vmatpush1.bf16.msra.mxu0 %v6751_v34  ;;  %v423_v8 = vld [vmem:[#allocation8 + $0x6f8] sm:$0xff]  ;;  %v8550_v34 = vpop.f32.mrf.mxu1 }
 0x1dd   :  { %3090 = vmatpush1.bf16.msra.mxu1 %v6879_v60  ;;  %3038 = vmatprep.subr.bf16.mxu0 %v6872_v33  ;;  %v547_v63 = vld [vmem:[#allocation8 + $0xad8] sm:$0xff]  ;;  %v6840_v46 = vcombine.high %v419_v7, %v423_v8  ;;  %v6839_v52 = vcombine.low %v419_v7, %v423_v8  ;;  %v8587_v8 = vld [vmem:[#allocation12 + $0x1a8] sm:$0xff] }
 0x1de   :  { %3091 = vmatprep.subr.bf16.mxu1 %v7000_v35  ;;  %v551_v9 = vld [vmem:[#allocation8 + $0xaf8] sm:$0xff] }
 0x1df   :  { %v6968_v13 = vcombine.high %v547_v63, %v551_v9  ;;  %v411_v38 = vld [vmem:[#allocation8 + $0x698] sm:$0xff]  ;;  %v6967_v18 = vcombine.low %v547_v63, %v551_v9  ;;  %v8593_v63 = vld [vmem:[#allocation12 + $0x1a0] sm:$0xff] }
 0x1e0   :  { %3039 = vmatpush2.bf16.msra.mxu0 %v6871_v43  ;;  %v415_v21 = vld [vmem:[#allocation8 + $0x6b8] sm:$0xff] }
 0x1e1   :  { %3092 = vmatpush2.bf16.msra.mxu1 %v6999_v44  ;;  %3040 = vmatprep.subr.bf16.mxu0 %v6864_v47  ;;  %v539_v10 = vld [vmem:[#allocation8 + $0xa98] sm:$0xff]  ;;  %v6832_v20 = vcombine.high %v411_v38, %v415_v21  ;;  %v6831_v28 = vcombine.low %v411_v38, %v415_v21  ;;  %v8552_v44 = vpop.f32.mrf.mxu1 }
 0x1e2   :  { %3093 = vmatprep.subr.bf16.mxu1 %v6992_v2  ;;  %v543_v15 = vld [vmem:[#allocation8 + $0xab8] sm:$0xff] }
 0x1e3   :  { %v6960_v22 = vcombine.high %v539_v10, %v543_v15  ;;  %v403_v58 = vld [vmem:[#allocation8 + $0x658] sm:$0xff]  ;;  %v6959_v30 = vcombine.low %v539_v10, %v543_v15  ;;  %v8554_v48 = vpop.f32.mrf.mxu1 }
 0x1e4   :  { %3041 = vmatpush2.bf16.msra.mxu0 %v6863_v53  ;;  %v407_v23 = vld [vmem:[#allocation8 + $0x678] sm:$0xff]  ;;  %v9800_v53 = vsub.s32 2, %v8496_v19 }
 0x1e5   :  { %3094 = vmatpush2.bf16.msra.mxu1 %v6991_v55  ;;  %3042 = vmatprep.subr.bf16.mxu0 %v6856_v14  ;;  %v531_v24 = vld [vmem:[#allocation8 + $0xa58] sm:$0xff]  ;;  %v6824_v31 = vcombine.high %v403_v58, %v407_v23  ;;  %v6823_v41 = vcombine.low %v403_v58, %v407_v23  ;;  %v8562_v55 = vld [vmem:[#allocation12 + $0x1e0] sm:$0xff]  ;;  %v8564_v14 = vpop.f32.mrf.mxu1 }
 0x1e6   :  { %3095 = vmatprep.subr.bf16.mxu1 %v6984_v56  ;;  %v535_v1 = vld [vmem:[#allocation8 + $0xa78] sm:$0xff] }
 0x1e7   :  { %v6952_v60 = vcombine.high %v531_v24, %v535_v1  ;;  %v395_v33 = vld [vmem:[#allocation8 + $0x618] sm:$0xff]  ;;  %v6951_v42 = vcombine.low %v531_v24, %v535_v1  ;;  %v8627_v1 = vld [vmem:[#allocation12 + $0x178] sm:$0xff] }
 0x1e8   :  { %3043 = vmatpush2.bf16.msra.mxu0 %v6855_v27  ;;  %v399_v35 = vld [vmem:[#allocation8 + $0x638] sm:$0xff]  ;;  %v8575_v27 = vld [vmem:[#allocation12 + $0x1c0] sm:$0xff] }
 0x1e9   :  { %3096 = vmatpush2.bf16.msra.mxu1 %v6983_v29  ;;  %3044 = vmatprep.subr.bf16.mxu0 %v6848_v59  ;;  %v523_v36 = vld [vmem:[#allocation8 + $0xa18] sm:$0xff]  ;;  %v6816_v43 = vcombine.high %v395_v33, %v399_v35  ;;  %v6815_v2 = vcombine.low %v395_v33, %v399_v35  ;;  %v8639_v35 = vld [vmem:[#allocation12 + $0x148] sm:$0xff] }
 0x1ea   :  { %3097 = vmatprep.subr.bf16.mxu1 %v6976_v6  ;;  %v527_v39 = vld [vmem:[#allocation8 + $0xa38] sm:$0xff]  ;;  %v8581_v6 = vrot.slane %v8501_v40, %v9800_v53  ;;  %v8771_v53 = vld [vmem:[#allocation12 + $0x18] sm:$0xff] }
 0x1eb   :  { %v6944_v47 = vcombine.high %v523_v36, %v527_v39  ;;  %v6943_v45 = vcombine.low %v523_v36, %v527_v39  ;;  %v8567_v56 = vld [vmem:[#allocation12 + $0x1f0] sm:$0xff]  ;;  %v8643_v39 = vld [vmem:[#allocation12 + $0x158] sm:$0xff]  ;;  %9910 = vst [vmem:[#allocation34_spill] sm:$0xff] %v8771_v53 }
 0x1ec   :  { %3045 = vmatpush2.bf16.msra.mxu0 %v6847_v61  ;;  %v8585_v7 = vld [vmem:[#allocation12 + $0x1d0] sm:$0xff] }
 0x1ed   :  { %3098 = vmatpush2.bf16.msra.mxu1 %v6975_v12  ;;  %3046 = vmatprep.subr.bf16.mxu0 %v6840_v46  ;;  %v8603_v46 = vld [vmem:[#allocation12 + $0x1b0] sm:$0xff] }
 0x1ee   :  { %3099 = vmatprep.subr.bf16.mxu1 %v6968_v13  ;;  %v8605_v13 = vld [vmem:[#allocation12 + $0x188] sm:$0xff]  ;;  %v8777_v19 = vld [vmem:[#allocation12 + $0x10] sm:$0xff] }
 0x1ef   :  { %9912 = vst [vmem:[#allocation36_spill] sm:$0xff] %v8777_v19 }
 0x1f0   :  { %3047 = vmatpush2.bf16.msra.mxu0 %v6839_v52  ;;  %v8615_v52 = vld [vmem:[#allocation12 + $0x180] sm:$0xff] }
 0x1f1   :  { %3100 = vmatpush2.bf16.msra.mxu1 %v6967_v18  ;;  %3048 = vmatprep.subr.bf16.mxu0 %v6832_v20  ;;  %v8617_v18 = vld [vmem:[#allocation12 + $0x190] sm:$0xff] }
 0x1f2   :  { %3101 = vmatprep.subr.bf16.mxu1 %v6960_v22  ;;  %v8621_v22 = vld [vmem:[#allocation12 + $0x168] sm:$0xff] }
 0x1f4   :  { %3049 = vmatpush2.bf16.msra.mxu0 %v6831_v28 }
 0x1f5   :  { %3102 = vmatpush2.bf16.msra.mxu1 %v6959_v30  ;;  %3050 = vmatprep.subr.bf16.mxu0 %v6824_v31  ;;  %v8631_v30 = vld [vmem:[#allocation12 + $0x160] sm:$0xff]  ;;  %v8633_v31 = vld [vmem:[#allocation12 + $0x170] sm:$0xff] }
 0x1f6   :  { %3103 = vmatprep.subr.bf16.mxu1 %v6952_v60 }
 0x1f8   :  { %3051 = vmatpush2.bf16.msra.mxu0 %v6823_v41  ;;  %v8645_v41 = vld [vmem:[#allocation12 + $0x140] sm:$0xff] }
 0x1f9   :  { %3104 = vmatpush2.bf16.msra.mxu1 %v6951_v42  ;;  %3052 = vmatprep.subr.bf16.mxu0 %v6816_v43  ;;  %v8651_v43 = vld [vmem:[#allocation12 + $0x150] sm:$0xff] }
 0x1fa   :  { %3105 = vmatprep.subr.bf16.mxu1 %v6944_v47 }
 0x1fc   :  { %3053 = vmatpush2.bf16.msra.mxu0 %v6815_v2  ;;  %v8653_v2 = vld [vmem:[#allocation12 + $0x128] sm:$0xff] }
 0x1fd   :  { %3106 = vmatpush2.bf16.msra.mxu1 %v6943_v45  ;;  %3347 = vmatprep.subr.mxu0 %v8556_v49  ;;  %v8657_v45 = vld [vmem:[#allocation12 + $0x138] sm:$0xff] }
 0x1fe   :  { %3418 = vmatprep.subr.mxu1 %v8558_v51 }
 0x1ff   :  { %v2750_v50 = vpop.f32.mrf.mxu0  ;;  %3055 = vmatmul.mubr.bf16.vlgmr.msra.gmra.mxu0 %v8434_v25 }
 0x200   :  { %v2751_v29 = vadd.f32 %v2750_v50, %v8542_v5  ;;  %v2803_v59 = vpop.f32.mrf.mxu1  ;;  %3108 = vmatmul.mubr.bf16.vlgmr.msra.gmra.mxu1 %v8454_v57  ;;  %3348 = vmatpush1.msra.mxu0 %v8562_v55  ;;  %v8591_v5 = vld [vmem:[#allocation12 + $0x1b8] sm:$0xff]  ;;  %v8599_v57 = vrot.slane %v8501_v40, %v9799_v62  ;;  %v8659_v50 = vld [vmem:[#allocation12 + $0x120] sm:$0xff]  ;;  %v8767_v62 = vld [vmem:[#allocation12 + $0x8] sm:$0xff] }
 0x201   :  { %3419 = vmatpush1.msra.mxu1 %v8567_v56  ;;  %v2752_v25 = vpop.f32.mrf.mxu0  ;;  %3349 = vmatprep.subr.mxu0 %v8570_v0  ;;  %9909 = vst [vmem:[#allocation33_spill] sm:$0xff] %v8767_v62 }
 0x202   :  { %v2804_v9 = vadd.f32 %v2803_v59, %v2751_v29  ;;  %v2753_v61 = vadd.f32 %v2752_v25, %v8544_v11  ;;  %v2805_v12 = vpop.f32.mrf.mxu1  ;;  %3420 = vmatprep.subr.mxu1 %v8573_v3  ;;  %3350 = vmatpush1.msra.mxu0 %v8575_v27  ;;  %v8609_v11 = vld [vmem:[#allocation12 + $0x198] sm:$0xff]  ;;  %v8665_v25 = vld [vmem:[#allocation12 + $0x130] sm:$0xff] }
 0x203   :  { %3421 = vmatpush1.msra.mxu1 %v8585_v7  ;;  %v2754_v38 = vpop.f32.mrf.mxu0  ;;  %3351 = vmatprep.subr.mxu0 %v8587_v8 }
 0x204   :  { %v3245_v21 = vadd.f32 %v8581_v6, %v2804_v9  ;;  %v2806_v10 = vadd.f32 %v2805_v12, %v2753_v61  ;;  %v2755_v40 = vadd.f32 %v2754_v38, %v8546_v16  ;;  %v2807_v15 = vpop.f32.mrf.mxu1  ;;  %3422 = vmatprep.subr.mxu1 %v8591_v5  ;;  %3352 = vmatpush1.msra.mxu0 %v8593_v63  ;;  %v8667_v9 = vld [vmem:[#allocation12 + $0x108] sm:$0xff]  ;;  %v8671_v12 = vld [vmem:[#allocation12 + $0x118] sm:$0xff]  ;;  %v8673_v38 = vld [vmem:[#allocation12 + $0x100] sm:$0xff] }
 0x205   :  { %3423 = vmatpush1.msra.mxu1 %v8603_v46  ;;  %v2756_v20 = vpop.f32.mrf.mxu0  ;;  %3353 = vmatprep.subr.mxu0 %v8605_v13 }
 0x206   :  { %3261 = vst [vmem:[#allocation2 + $0x10] sm:$0xff] %v3245_v21  ;;  %v3246_v58 = vadd.f32 %v8599_v57, %v2806_v10  ;;  %v2808_v16 = vadd.f32 %v2807_v15, %v2755_v40  ;;  %v2757_v23 = vadd.f32 %v2756_v20, %v8548_v26  ;;  %v2809_v24 = vpop.f32.mrf.mxu1  ;;  %3424 = vmatprep.subr.mxu1 %v8609_v11  ;;  %v8679_v40 = vld [vmem:[#allocation12 + $0x110] sm:$0xff]  ;;  %v8681_v20 = vld [vmem:[#allocation12 + $0xe8] sm:$0xff] }
 0x207   :  { %3064 = vmatprep.mubr.bf16.mxu0 %v8439_v37  ;;  %3354 = vmatpush1.msra.mxu0 %v8615_v52  ;;  %v2760_v28 = vpop.f32.mrf.mxu0 }
 0x208   :  { %3425 = vmatpush1.msra.mxu1 %v8617_v18  ;;  %3262 = vst [vmem:[#allocation2 + $0x18] sm:$0xff] %v3246_v58  ;;  %v3249_v60 = vadd.f32 %v8581_v6, %v2808_v16  ;;  %v2810_v26 = vadd.f32 %v2809_v24, %v2757_v23  ;;  %v2761_v33 = vadd.f32 %v2760_v28, %v8550_v34  ;;  %v2813_v37 = vpop.f32.mrf.mxu1  ;;  %v8685_v58 = vld [vmem:[#allocation12 + $0xf8] sm:$0xff]  ;;  %v8687_v16 = vld [vmem:[#allocation12 + $0xe0] sm:$0xff]  ;;  %v8692_v24 = vld [vmem:[#allocation12 + $0xf0] sm:$0xff] }
 0x209   :  { %3065 = vmatmul.mubr.bf16.gmra.mxu0 %v8446_v54  ;;  %3355 = vmatprep.subr.mxu0 %v8621_v22  ;;  %v2762_v36 = vpop.f32.mrf.mxu0  ;;  %v8694_v28 = vld [vmem:[#allocation12 + $0xc8] sm:$0xff] }
 0x20a   :  { %3426 = vmatprep.subr.mxu1 %v8627_v1  ;;  %3117 = vmatprep.mubr.bf16.mxu1 %v8456_v4  ;;  %3265 = vst [vmem:[#allocation2 + $0x30] sm:$0xff] %v3249_v60  ;;  %v3250_v42 = vadd.f32 %v8599_v57, %v2810_v26  ;;  %v2763_v54 = vadd.f32 %v2762_v36, %v8552_v44  ;;  %v2815_v47 = vpop.f32.mrf.mxu1  ;;  %v8698_v60 = vld [vmem:[#allocation12 + $0xd8] sm:$0xff]  ;;  %v8700_v26 = vld [vmem:[#allocation12 + $0xc0] sm:$0xff] }
 0x20b   :  { %3356 = vmatpush1.msra.mxu0 %v8631_v30  ;;  %3427 = vmatpush1.msra.mxu1 %v8633_v31  ;;  %v2814_v34 = vadd.f32 %v2813_v37, %v2761_v33  ;;  %v2764_v4 = vpop.f32.mrf.mxu0  ;;  %v8705_v33 = vld [vmem:[#allocation12 + $0xd0] sm:$0xff]  ;;  %v8707_v37 = vld [vmem:[#allocation12 + $0xa8] sm:$0xff]  ;;  %v8711_v36 = vld [vmem:[#allocation12 + $0xb8] sm:$0xff] }
 0x20c   :  { %3118 = vmatmul.mubr.bf16.gmra.mxu1 %v8461_v17  ;;  %3357 = vmatprep.subr.mxu0 %v8639_v35  ;;  %3266 = vst [vmem:[#allocation2 + $0x38] sm:$0xff] %v3250_v42  ;;  %v2765_v44 = vadd.f32 %v2764_v4, %v8554_v48  ;;  %v2816_v59 = vadd.f32 %v2815_v47, %v2763_v54  ;;  %v2817_v17 = vpop.f32.mrf.mxu1  ;;  %v8713_v42 = vld [vmem:[#allocation12 + $0xa0] sm:$0xff]  ;;  %v8719_v54 = vld [vmem:[#allocation12 + $0x88] sm:$0xff]  ;;  %v8729_v4 = vld [vmem:[#allocation12 + $0x90] sm:$0xff] }
 0x20d   :  { %v3253_v29 = vadd.f32 %v8581_v6, %v2814_v34  ;;  %3428 = vmatprep.subr.mxu1 %v8643_v39  ;;  %3358 = vmatpush1.msra.mxu0 %v8645_v41  ;;  %v2766_v61 = vpop.f32.mrf.mxu0  ;;  %v8723_v34 = vld [vmem:[#allocation12 + $0x98] sm:$0xff]  ;;  %v8725_v47 = vld [vmem:[#allocation12 + $0x80] sm:$0xff] }
 0x20e   :  { %3429 = vmatpush1.msra.mxu1 %v8651_v43  ;;  %3359 = vmatprep.subr.mxu0 %v8653_v2  ;;  %v3254_v21 = vadd.f32 %v8599_v57, %v2816_v59  ;;  %v2767_v48 = vadd.f32 %v2766_v61, %v8564_v14  ;;  %v2818_v10 = vadd.f32 %v2817_v17, %v2765_v44  ;;  %v2819_v15 = vpop.f32.mrf.mxu1  ;;  %v8735_v44 = vld [vmem:[#allocation12 + $0x78] sm:$0xff]  ;;  %v8737_v59 = vld [vmem:[#allocation12 + $0x60] sm:$0xff]  ;;  %v8741_v17 = vld [vmem:[#allocation12 + $0x70] sm:$0xff] }
 0x20f   :  { %3269 = vst [vmem:[#allocation2 + $0x50] sm:$0xff] %v3253_v29  ;;  %3430 = vmatprep.subr.mxu1 %v8657_v45  ;;  %3360 = vmatpush1.msra.mxu0 %v8659_v50  ;;  %v8731_v29 = vld [vmem:[#allocation12 + $0x68] sm:$0xff] }
 0x210   :  { %3431 = vmatpush1.msra.mxu1 %v8665_v25  ;;  %3361 = vmatprep.subr.mxu0 %v8667_v9  ;;  %3270 = vst [vmem:[#allocation2 + $0x58] sm:$0xff] %v3254_v21  ;;  %v3257_v23 = vadd.f32 %v8581_v6, %v2818_v10  ;;  %v2820_v14 = vadd.f32 %v2819_v15, %v2767_v48  ;;  %v8743_v61 = vld [vmem:[#allocation12 + $0x48] sm:$0xff]  ;;  %v8747_v21 = vld [vmem:[#allocation12 + $0x58] sm:$0xff]  ;;  %v8749_v48 = vld [vmem:[#allocation12 + $0x40] sm:$0xff] }
 0x211   :  { %3432 = vmatprep.subr.mxu1 %v8671_v12  ;;  %3362 = vmatpush1.msra.mxu0 %v8673_v38  ;;  %v8753_v10 = vld [vmem:[#allocation12 + $0x50] sm:$0xff]  ;;  %v8755_v15 = vld [vmem:[#allocation12 + $0x28] sm:$0xff] }
 0x212   :  { %3433 = vmatpush1.msra.mxu1 %v8679_v40  ;;  %3363 = vmatprep.subr.mxu0 %v8681_v20  ;;  %3273 = vst [vmem:[#allocation2 + $0x70] sm:$0xff] %v3257_v23  ;;  %v3258_v6 = vadd.f32 %v8599_v57, %v2820_v14  ;;  %v8717_v57 = vld [vmem:[#allocation12 + $0xb0] sm:$0xff]  ;;  %9905 = vst [vmem:[#allocation29_spill] sm:$0xff] %v8753_v10  ;;  %v8759_v23 = vld [vmem:[#allocation12 + $0x38] sm:$0xff] }
 0x213   :  { %3434 = vmatprep.subr.mxu1 %v8685_v58  ;;  %3364 = vmatpush1.msra.mxu0 %v8687_v16  ;;  %9906 = vst [vmem:[#allocation30_spill] sm:$0xff] %v8759_v23  ;;  %v8761_v14 = vld [vmem:[#allocation12 + $0x20] sm:$0xff] }
 0x214   :  { %3435 = vmatpush1.msra.mxu1 %v8692_v24  ;;  %3365 = vmatprep.subr.mxu0 %v8694_v28  ;;  %3274 = vst [vmem:[#allocation2 + $0x78] sm:$0xff] %v3258_v6  ;;  %9907 = vst [vmem:[#allocation31_spill] sm:$0xff] %v8761_v14  ;;  %v8765_v6 = vld [vmem:[#allocation12 + $0x30] sm:$0xff] }
 0x215   :  { %3436 = vmatprep.subr.mxu1 %v8698_v60  ;;  %3366 = vmatpush1.msra.mxu0 %v8700_v26  ;;  %9908 = vst [vmem:[#allocation32_spill] sm:$0xff] %v8765_v6 }
 0x216   :  { %3437 = vmatpush1.msra.mxu1 %v8705_v33  ;;  %3367 = vmatprep.subr.mxu0 %v8707_v37 }
 0x217   :  { %3438 = vmatprep.subr.mxu1 %v8711_v36  ;;  %3368 = vmatpush1.msra.mxu0 %v8713_v42 }
 0x218   :  { %3439 = vmatpush1.msra.mxu1 %v8717_v57  ;;  %3369 = vmatprep.subr.mxu0 %v8719_v54 }
 0x219   :  { %3440 = vmatprep.subr.mxu1 %v8723_v34  ;;  %3370 = vmatpush1.msra.mxu0 %v8725_v47 }
 0x21a   :  { %3441 = vmatpush1.msra.mxu1 %v8729_v4  ;;  %3371 = vmatprep.subr.mxu0 %v8731_v29 }
 0x21b   :  { %3442 = vmatprep.subr.mxu1 %v8735_v44  ;;  %3372 = vmatpush1.msra.mxu0 %v8737_v59 }
 0x21c   :  { %3443 = vmatpush1.msra.mxu1 %v8741_v17  ;;  %3373 = vmatprep.subr.mxu0 %v8743_v61 }
 0x21d   :  { %3444 = vmatprep.subr.mxu1 %v8747_v21  ;;  %3374 = vmatpush1.msra.mxu0 %v8749_v48 }
 0x21e   :  { %3445 = vmatpush1.msra.mxu1 %v8753_v10  ;;  %3375 = vmatprep.subr.mxu0 %v8755_v15  ;;  %v9806_v10 = vmov 0.0  }
 0x21f   :  { %3446 = vmatprep.subr.mxu1 %v8759_v23  ;;  %3376 = vmatpush1.msra.mxu0 %v8761_v14 }
 0x220   :  { %3447 = vmatpush1.msra.mxu1 %v8765_v6  ;;  %3377 = vmatprep.subr.mxu0 %v8767_v62 }
 0x221   :  { %3448 = vmatprep.subr.mxu1 %v8771_v53  ;;  %3378 = vmatpush1.msra.mxu0 %v8773_v32 }
 0x222   :  { %3411 = vmatprep.mubr.f32.mxu0 %v9806_v10  ;;  %3449 = vmatpush1.msra.mxu1 %v8777_v19 }
 0x223   :  { %3482 = vmatprep.mubr.f32.mxu1 %v9806_v10  ;;  %3412 = vmatmul.mubr.f32.vlgmr.msra.gmra.mxu0 %v9806_v10 }
 0x224   :  { %3483 = vmatmul.mubr.f32.vlgmr.msra.gmra.mxu1 %v9806_v10  ;;  %3696 = vmatprep.subr.mxu0 %v8556_v49 }
 0x225   :  { %3767 = vmatprep.subr.mxu1 %v8558_v51  ;;  %3697 = vmatpush1.msra.mxu0 %v8562_v55 }
 0x226   :  { %3768 = vmatpush1.msra.mxu1 %v8567_v56  ;;  %3698 = vmatprep.subr.mxu0 %v8570_v0  ;;  %v9913_v56 = vld [vmem:[#allocation29_spill] sm:$0xff] }
 0x227   :  { %3769 = vmatprep.subr.mxu1 %v8573_v3  ;;  %3699 = vmatpush1.msra.mxu0 %v8575_v27 }
 0x228   :  { %3770 = vmatpush1.msra.mxu1 %v8585_v7  ;;  %3700 = vmatprep.subr.mxu0 %v8587_v8 }
 0x229   :  { %3771 = vmatprep.subr.mxu1 %v8591_v5  ;;  %3701 = vmatpush1.msra.mxu0 %v8593_v63 }
 0x22a   :  { %3772 = vmatpush1.msra.mxu1 %v8603_v46  ;;  %3702 = vmatprep.subr.mxu0 %v8605_v13 }
 0x22b   :  { %3773 = vmatprep.subr.mxu1 %v8609_v11  ;;  %3703 = vmatpush1.msra.mxu0 %v8615_v52 }
 0x22c   :  { %3774 = vmatpush1.msra.mxu1 %v8617_v18  ;;  %3704 = vmatprep.subr.mxu0 %v8621_v22 }
 0x22d   :  { %3775 = vmatprep.subr.mxu1 %v8627_v1  ;;  %3705 = vmatpush1.msra.mxu0 %v8631_v30 }
 0x22e   :  { %3776 = vmatpush1.msra.mxu1 %v8633_v31  ;;  %3706 = vmatprep.subr.mxu0 %v8639_v35 }
 0x22f   :  { %3777 = vmatprep.subr.mxu1 %v8643_v39  ;;  %3707 = vmatpush1.msra.mxu0 %v8645_v41 }
 0x230   :  { %3778 = vmatpush1.msra.mxu1 %v8651_v43  ;;  %3708 = vmatprep.subr.mxu0 %v8653_v2 }
 0x231   :  { %3779 = vmatprep.subr.mxu1 %v8657_v45  ;;  %3709 = vmatpush1.msra.mxu0 %v8659_v50 }
 0x232   :  { %3780 = vmatpush1.msra.mxu1 %v8665_v25  ;;  %3710 = vmatprep.subr.mxu0 %v8667_v9 }
 0x233   :  { %3781 = vmatprep.subr.mxu1 %v8671_v12  ;;  %3711 = vmatpush1.msra.mxu0 %v8673_v38 }
 0x234   :  { %3782 = vmatpush1.msra.mxu1 %v8679_v40  ;;  %3712 = vmatprep.subr.mxu0 %v8681_v20 }
 0x235   :  { %3783 = vmatprep.subr.mxu1 %v8685_v58  ;;  %3713 = vmatpush1.msra.mxu0 %v8687_v16 }
 0x236   :  { %3784 = vmatpush1.msra.mxu1 %v8692_v24  ;;  %3714 = vmatprep.subr.mxu0 %v8694_v28 }
 0x237   :  { %3785 = vmatprep.subr.mxu1 %v8698_v60  ;;  %3715 = vmatpush1.msra.mxu0 %v8700_v26 }
 0x238   :  { %3786 = vmatpush1.msra.mxu1 %v8705_v33  ;;  %3716 = vmatprep.subr.mxu0 %v8707_v37 }
 0x239   :  { %3787 = vmatprep.subr.mxu1 %v8711_v36  ;;  %3717 = vmatpush1.msra.mxu0 %v8713_v42 }
 0x23a   :  { %3788 = vmatpush1.msra.mxu1 %v8717_v57  ;;  %3718 = vmatprep.subr.mxu0 %v8719_v54 }
 0x23b   :  { %3789 = vmatprep.subr.mxu1 %v8723_v34  ;;  %3719 = vmatpush1.msra.mxu0 %v8725_v47 }
 0x23c   :  { %3790 = vmatpush1.msra.mxu1 %v8729_v4  ;;  %3720 = vmatprep.subr.mxu0 %v8731_v29 }
 0x23d   :  { %3791 = vmatprep.subr.mxu1 %v8735_v44  ;;  %3721 = vmatpush1.msra.mxu0 %v8737_v59 }
 0x23e   :  { %3792 = vmatpush1.msra.mxu1 %v8741_v17  ;;  %3722 = vmatprep.subr.mxu0 %v8743_v61 }
 0x23f   :  { %3793 = vmatprep.subr.mxu1 %v8747_v21  ;;  %3723 = vmatpush1.msra.mxu0 %v8749_v48  ;;  %v2856_v55 = vpop.f32.mrf.mxu0 }
 0x240   :  { %3794 = vmatpush1.msra.mxu1 %v9913_v56  ;;  %3724 = vmatprep.subr.mxu0 %v8755_v15  ;;  %v2905_v0 = vpop.f32.mrf.mxu1 }
 0x241   :  { %3795 = vmatprep.subr.mxu1 %v8759_v23  ;;  %3725 = vmatpush1.msra.mxu0 %v8761_v14  ;;  %v2906_v3 = vadd.f32 %v2905_v0, %v2856_v55  ;;  %v2858_v27 = vpop.f32.mrf.mxu0 }
 0x242   :  { %3796 = vmatpush1.msra.mxu1 %v8765_v6  ;;  %3726 = vmatprep.subr.mxu0 %v8767_v62  ;;  %v2907_v7 = vpop.f32.mrf.mxu1  ;;  %v3128_v27 = vld [vmem:[#allocation9] sm:$0xf] }
 0x243   :  { %3797 = vmatprep.subr.mxu1 %v8771_v53  ;;  %3727 = vmatpush1.msra.mxu0 %v8773_v32  ;;  %v2859_v8 = vpop.f32.mrf.mxu0 }
 0x244   :  { %3760 = vmatprep.mubr.f32.mxu0 %v9806_v10  ;;  %3798 = vmatpush1.msra.mxu1 %v8777_v19  ;;  %v2908_v5 = vpop.f32.mrf.mxu1 }
 0x245   :  { %3831 = vmatprep.mubr.f32.mxu1 %v9806_v10  ;;  %4045 = vmatprep.subr.mxu0 %v8556_v49  ;;  %v2909_v63 = vadd.f32 %v2908_v5, %v2859_v8  ;;  %v2861_v46 = vpop.f32.mrf.mxu0 }
 0x246   :  { %4116 = vmatprep.subr.mxu1 %v8558_v51  ;;  %v2910_v13 = vpop.f32.mrf.mxu1  ;;  %v9914_v51 = vld [vmem:[#allocation28_spill] sm:$0xff] }
 0x247   :  { %v2864_v11 = vpop.f32.mrf.mxu0  ;;  %v9915_v5 = vsub.s32 0, %v9914_v51 }
 0x248   :  { %v2913_v52 = vpop.f32.mrf.mxu1 }
 0x249   :  { %v2914_v18 = vadd.f32 %v2913_v52, %v2864_v11  ;;  %v2866_v22 = vpop.f32.mrf.mxu0  ;;  %v3133_v46 = vrot.slane %v3128_v27, %v9915_v5 }
 0x24a   :  { %v2915_v1 = vpop.f32.mrf.mxu1 }
 0x24b   :  { %v2867_v30 = vpop.f32.mrf.mxu0 }
 0x24c   :  { %v2916_v31 = vpop.f32.mrf.mxu1 }
 0x24d   :  { %v2917_v35 = vadd.f32 %v2916_v31, %v2867_v30  ;;  %v2869_v39 = vpop.f32.mrf.mxu0 }
 0x24e   :  { %v2918_v41 = vpop.f32.mrf.mxu1 }
 0x27f   :  { %v2954_v43 = vpop.f32.mrf.mxu0 }
 0x280   :  { %v2955_v2 = vadd.f32 %v2954_v43, %v2906_v3  ;;  %v3003_v31 = vpop.f32.mrf.mxu1 }
 0x281   :  { %v2956_v55 = vpop.f32.mrf.mxu0 }
 0x282   :  { %v3005_v39 = vpop.f32.mrf.mxu1  ;;  %v3145_v41 = vadd.f32 %v3133_v46, %v2955_v2  ;;  %v9916_v2 = vsub.s32 2, %v9914_v51 }
 0x283   :  { %v2957_v0 = vpop.f32.mrf.mxu0 }
 0x284   :  { %v2958_v49 = vadd.f32 %v2957_v0, %v2909_v63  ;;  %v3007_v3 = vpop.f32.mrf.mxu1  ;;  %v7001_v43 = vmul.f32 -1.442695, %v3145_v41 }
 0x285   :  { %v2959_v7 = vpop.f32.mrf.mxu0 }
 0x286   :  { %v3148_v55 = vadd.f32 %v3133_v46, %v2958_v49  ;;  %v3009_v63 = vpop.f32.mrf.mxu1  ;;  %7387 = vpow2.f32 %v7001_v43 }
 0x287   :  { %v2962_v8 = vpop.f32.mrf.mxu0 }
 0x288   :  { %v2963_v13 = vadd.f32 %v2962_v8, %v2914_v18  ;;  %v7002_v0 = vmul.f32 -1.442695, %v3148_v55  ;;  %v3013_v7 = vpop.f32.mrf.mxu1 }
 0x289   :  { %v2964_v11 = vpop.f32.mrf.mxu0 }
 0x28a   :  { %v3151_v52 = vadd.f32 %v3133_v46, %v2963_v13  ;;  %7389 = vpow2.f32 %v7002_v0  ;;  %v3015_v19 = vpop.f32.mrf.mxu1 }
 0x28b   :  { %v2965_v22 = vpop.f32.mrf.mxu0 }
 0x28c   :  { %v2966_v1 = vadd.f32 %v2965_v22, %v2917_v35  ;;  %v7003_v5 = vmul.f32 -1.442695, %v3151_v52  ;;  %v3017_v18 = vpop.f32.mrf.mxu1  ;;  %v9917_v52 = vsub.s32 3, %v9914_v51 }
 0x28d   :  { %v2967_v10 = vpop.f32.mrf.mxu0 }
 0x28e   :  { %v3154_v30 = vadd.f32 %v3133_v46, %v2966_v1  ;;  %7391 = vpow2.f32 %v7003_v5  ;;  %v3019_v35 = vpop.f32.mrf.mxu1  ;;  %v3137_v1 = vrot.slane %v3128_v27, %v9916_v2  ;;  %v3141_v32 = vrot.slane %v3128_v27, %v9917_v52 }
 0x290   :  { %v7004_v8 = vmul.f32 -1.442695, %v3154_v30 }
 0x292   :  { %7393 = vpow2.f32 %v7004_v8 }
 0x293   :  { %v7388_v13 = vpop.eup %7387 }
 0x294   :  { %v3169_v49 = vadd.f32 1.0, %v7388_v13 }
 0x296   :  { %7395 = vrcp.f32 %v3169_v49 }
 0x297   :  { %v7390_v41 = vpop.eup %7389 }
 0x29b   :  { %v7392_v23 = vpop.eup %7391 }
 0x2bf   :  { %v3056_v10 = vpop.f32.mrf.mxu0 }
 0x2c0   :  { %v3057_v11 = vadd.f32 %v3056_v10, %v3003_v31  ;;  %v3109_v22 = vpop.f32.mrf.mxu1  ;;  %v3170_v31 = vadd.f32 1.0, %v7390_v41 }
 0x2c1   :  { %v3058_v46 = vpop.f32.mrf.mxu0 }
 0x2c2   :  { %v3110_v43 = vadd.f32 %v3109_v22, %v3057_v11  ;;  %v3059_v55 = vadd.f32 %v3058_v46, %v3005_v39  ;;  %v3111_v0 = vpop.f32.mrf.mxu1 }
 0x2c3   :  { %v3060_v5 = vpop.f32.mrf.mxu0 }
 0x2c4   :  { %v3146_v30 = vadd.f32 %v3137_v1, %v3110_v43  ;;  %v3112_v53 = vadd.f32 %v3111_v0, %v3059_v55  ;;  %v3061_v62 = vadd.f32 %v3060_v5, %v3007_v3  ;;  %v3113_v8 = vpop.f32.mrf.mxu1  ;;  %v3171_v3 = vadd.f32 1.0, %v7392_v23  ;;  %v7394_v0 = vpop.eup %7393 }
 0x2c5   :  { %v3062_v10 = vpop.f32.mrf.mxu0 }
 0x2c6   :  { %7397 = vtanh.f32 %v3146_v30  ;;  %v3147_v6 = vadd.f32 %v3141_v32, %v3112_v53  ;;  %v3114_v2 = vadd.f32 %v3113_v8, %v3061_v62  ;;  %v3063_v13 = vadd.f32 %v3062_v10, %v3009_v63  ;;  %v3115_v14 = vpop.f32.mrf.mxu1 }
 0x2c7   :  { %7399 = vrcp.f32 %v3170_v31  ;;  %v3172_v8 = vadd.f32 1.0, %v7394_v0  ;;  %v8326_v0 = vmov 1966171168  }
 0x2c8   :  { %v7005_v11 = vmul.f32 -1.442695, %v3147_v6  ;;  %v3149_v39 = vadd.f32 %v3137_v1, %v3114_v2  ;;  %v3116_v22 = vadd.f32 %v3115_v14, %v3063_v13 }
 0x2c9   :  { %v3066_v46 = vpop.f32.mrf.mxu0 }
 0x2ca   :  { %v3067_v27 = vadd.f32 %v3066_v46, %v3013_v7  ;;  %7401 = vpow2.f32 %v7005_v11  ;;  %v3150_v43 = vadd.f32 %v3141_v32, %v3116_v22 }
 0x2cb   :  { %v3068_v55 = vpop.f32.mrf.mxu0  ;;  %7403 = vtanh.f32 %v3149_v39 }
 0x2cc   :  { %v3069_v49 = vadd.f32 %v3068_v55, %v3015_v19  ;;  %v3119_v41 = vpop.f32.mrf.mxu1  ;;  %v7006_v52 = vmul.f32 -1.442695, %v3150_v43  ;;  %v7396_v19 = vpop.eup %7395 }
 0x2cd   :  { %v3120_v53 = vadd.f32 %v3119_v41, %v3067_v27  ;;  %v3070_v62 = vpop.f32.mrf.mxu0 }
 0x2ce   :  { %v3071_v63 = vadd.f32 %v3070_v62, %v3017_v18  ;;  %v3121_v5 = vpop.f32.mrf.mxu1  ;;  %7405 = vpow2.f32 %v7006_v52  ;;  %v3496_v52 = vunpack.c.l.s4 %v8326_v0 }
 0x2cf   :  { %v3152_v6 = vadd.f32 %v3137_v1, %v3120_v53  ;;  %v3122_v30 = vadd.f32 %v3121_v5, %v3069_v49  ;;  %v3072_v14 = vpop.f32.mrf.mxu0  ;;  %7407 = vrcp.f32 %v3171_v3 }
 0x2d0   :  { %v3073_v7 = vadd.f32 %v3072_v14, %v3019_v35  ;;  %v3123_v31 = vpop.f32.mrf.mxu1 }
 0x2d1   :  { %7409 = vtanh.f32 %v3152_v6  ;;  %v3153_v10 = vadd.f32 %v3141_v32, %v3122_v30  ;;  %v3124_v23 = vadd.f32 %v3123_v31, %v3071_v63 }
 0x2d2   :  { %v3125_v2 = vpop.f32.mrf.mxu1  ;;  %7411 = vrcp.f32 %v3172_v8 }
 0x2d3   :  { %v7007_v13 = vmul.f32 -1.442695, %v3153_v10  ;;  %v3155_v11 = vadd.f32 %v3137_v1, %v3124_v23  ;;  %v3126_v39 = vadd.f32 %v3125_v2, %v3073_v7  ;;  %v7398_v22 = vpop.eup %7397 }
 0x2d4   :  { %v3209_v18 = vmul.f32 %v7398_v22, %v7396_v19  ;;  %v7400_v27 = vpop.eup %7399 }
 0x2d5   :  { %7413 = vpow2.f32 %v7007_v13  ;;  %v3156_v46 = vadd.f32 %v3141_v32, %v3126_v39  ;;  %v3497_v32 = vunpack.c.0.s8 %v3496_v52  ;;  %v3276_v52 = vld [vmem:[#allocation2 + $0x7] ss:$8 sm:$0xf] }
 0x2d6   :  { %7415 = vtanh.f32 %v3155_v11 }
 0x2d7   :  { %v7008_v43 = vmul.f32 -1.442695, %v3156_v46  ;;  %v7402_v55 = vpop.eup %7401  ;;  %v8863_v8 = vsub.s32 %v3497_v32, %v9914_v51 }
 0x2d8   :  { %v7404_v3 = vpop.eup %7403  ;;  %v3197_v35 = vadd.f32 1.0, %v7402_v55 }
 0x2d9   :  { %7417 = vpow2.f32 %v7008_v43  ;;  %v3210_v49 = vmul.f32 %v7404_v3, %v7400_v27 }
 0x2da   :  { %7419 = vtanh.f32 %v3209_v18 }
 0x2db   :  { %7421 = vrcp.f32 %v3197_v35  ;;  %v7406_v41 = vpop.eup %7405 }
 0x2dc   :  { %v7408_v1 = vpop.eup %7407  ;;  %v3198_v53 = vadd.f32 1.0, %v7406_v41  ;;  %7423 = vtanh.f32 %v3210_v49 }
 0x2de   :  { %v7410_v62 = vpop.eup %7409  ;;  %7425 = vrcp.f32 %v3198_v53 }
 0x2df   :  { %v3211_v63 = vmul.f32 %v7410_v62, %v7408_v1  ;;  %v7412_v5 = vpop.eup %7411  ;;  %v3278_v1 = vld [vmem:[#allocation2 + $0x27] ss:$8 sm:$0xf] }
 0x2e2   :  { %v7414_v6 = vpop.eup %7413 }
 0x2e3   :  { %v7416_v30 = vpop.eup %7415  ;;  %v3413_v14 = vpop.f32.mrf.mxu0  ;;  %v3199_v7 = vadd.f32 1.0, %v7414_v6  ;;  %v3280_v6 = vld [vmem:[#allocation2 + $0x47] ss:$8 sm:$0xf] }
 0x2e4   :  { %v3212_v31 = vmul.f32 %v7416_v30, %v7412_v5  ;;  %v3484_v10 = vpop.f32.mrf.mxu1  ;;  %v3282_v30 = vld [vmem:[#allocation2 + $0x67] ss:$8 sm:$0xf] }
 0x2e5   :  { %v3415_v23 = vpop.f32.mrf.mxu0  ;;  %7427 = vrcp.f32 %v3199_v7 }
 0x2e6   :  { %v7418_v2 = vpop.eup %7417  ;;  %v3493_v19 = vcombine.low %v3413_v14, %v3415_v23  ;;  %v3486_v13 = vpop.f32.mrf.mxu1 }
 0x2e7   :  { %v7420_v11 = vpop.eup %7419  ;;  %v3200_v39 = vadd.f32 1.0, %v7418_v2  ;;  %v3494_v22 = vcombine.low %v3484_v10, %v3486_v13 }
 0x2e8   :  { %v7422_v18 = vpop.eup %7421  ;;  %v3501_v46 = vrot.slane %v3493_v19, %v8863_v8 }
 0x2e9   :  { %7429 = vrcp.f32 %v3200_v39  ;;  %v3508_v27 = vrot.slane %v3494_v22, %v8863_v8  ;;  %v3217_v43 = vmul.f32 %v7422_v18, %v7420_v11  ;;  %v7424_v51 = vpop.eup %7423 }
 0x2ea   :  { %7431 = vtanh.f32 %v3211_v63 }
 0x2eb   :  { %7433 = vtanh.f32 %v3212_v31  ;;  %v3509_v55 = vcombine.low %v3501_v46, %v3508_v27  ;;  %v3510_v3 = vcombine.high %v3501_v46, %v3508_v27  ;;  %v7426_v35 = vpop.eup %7425 }
 0x2ec   :  { %v3218_v0 = vmul.f32 %v7426_v35, %v7424_v51 }
 0x2ed   :  { %v3517_v49 = vrot.slane %v3509_v55, %v8863_v8  ;;  %v3524_v41 = vrot.slane %v3510_v3, %v8863_v8 }
 0x2ee   :  { %v6223_v2 = vrot.slane %v3218_v0, 7 }
 0x2ef   :  { %v3525_v53 = vcombine.high %v3517_v49, %v3517_v49  ;;  %v3526_v62 = vcombine.high %v3524_v41, %v3524_v41  ;;  %v3531_v32 = vadd.f32 %v3517_v49, %v3276_v52  ;;  %v3532_v5 = vadd.f32 %v3524_v41, %v3278_v1 }
 0x2f0   :  { %v8870_v41 = vsel %vm6224_vm0, %v6223_v2, %v3217_v43 }
 0x2f1   :  { %v3533_v14 = vadd.f32 %v3525_v53, %v3280_v6  ;;  %v3534_v63 = vadd.f32 %v3526_v62, %v3282_v30  ;;  %v7009_v7 = vmul.f32 -1.442695, %v3531_v32  ;;  %v7010_v31 = vmul.f32 -1.442695, %v3532_v5  ;;  %9918 = vst [vmem:[#allocation29_spill] sm:$0xff] %v8870_v41  ;;  %v9148_v41 = vld [vmem:[#allocation12 + $0x38] sm:$0xff] }
 0x2f2   :  { %v3563_v10 = vrot.slane %v3531_v32, 1  ;;  %v3564_v23 = vrot.slane %v3532_v5, 1  ;;  %v7428_v46 = vpop.eup %7427  ;;  %v3595_v35 = vrot.slane %v3531_v32, 2  ;;  %v3607_v49 = vrot.slane %v3531_v32, 3  ;;  %9951 = vst [vmem:[#allocation53_spill] sm:$0xff] %v9148_v41 }
 0x2f3   :  { %7435 = vpow2.f32 %v7009_v7  ;;  %v7011_v19 = vmul.f32 -1.442695, %v3533_v14  ;;  %v7012_v13 = vmul.f32 -1.442695, %v3534_v63  ;;  %v3565_v11 = vrot.slane %v3533_v14, 1 }
 0x2f4   :  { %7437 = vpow2.f32 %v7010_v31  ;;  %v3566_v39 = vrot.slane %v3534_v63, 1  ;;  %v7013_v22 = vmul.f32 -1.442695, %v3563_v10  ;;  %v7014_v18 = vmul.f32 -1.442695, %v3564_v23 }
 0x2f5   :  { %7439 = vpow2.f32 %v7011_v19  ;;  %v7015_v27 = vmul.f32 -1.442695, %v3565_v11  ;;  %v3596_v52 = vrot.slane %v3532_v5, 2  ;;  %v3608_v1 = vrot.slane %v3532_v5, 3 }
 0x2f6   :  { %v7430_v51 = vpop.eup %7429  ;;  %7441 = vpow2.f32 %v7012_v13  ;;  %v7016_v55 = vmul.f32 -1.442695, %v3566_v39  ;;  %v3597_v62 = vrot.slane %v3533_v14, 2  ;;  %v3609_v6 = vrot.slane %v3533_v14, 3 }
 0x2f7   :  { %v7432_v3 = vpop.eup %7431  ;;  %7443 = vpow2.f32 %v7013_v22  ;;  %v3598_v7 = vrot.slane %v3534_v63, 2  ;;  %v3610_v31 = vrot.slane %v3534_v63, 3  ;;  %v7017_v10 = vmul.f32 -1.442695, %v3607_v49 }
 0x2f8   :  { %v7434_v0 = vpop.eup %7433  ;;  %7445 = vpow2.f32 %v7014_v18  ;;  %v3219_v53 = vmul.f32 %v7432_v3, %v7428_v46  ;;  %v7018_v32 = vmul.f32 -1.442695, %v3608_v1  ;;  %v7019_v43 = vmul.f32 -1.442695, %v3609_v6 }
 0x2f9   :  { %7447 = vpow2.f32 %v7015_v27  ;;  %v3220_v30 = vmul.f32 %v7434_v0, %v7430_v51  ;;  %v7020_v5 = vmul.f32 -1.442695, %v3610_v31 }
 0x2fa   :  { %7449 = vpow2.f32 %v7016_v55 }
 0x2fb   :  { %7451 = vtanh.f32 %v3595_v35  ;;  %v6315_v23 = vrot.slane %v3220_v30, 7 }
 0x2fc   :  { %7453 = vtanh.f32 %v3596_v52 }
 0x2fd   :  { %7455 = vtanh.f32 %v3597_v62  ;;  %v8873_v2 = vsel %vm6224_vm0, %v6315_v23, %v3219_v53 }
 0x2fe   :  { %9919 = vst [vmem:[#allocation28_spill] sm:$0xff] %v8873_v2  ;;  %7457 = vtanh.f32 %v3598_v7  ;;  %v9145_v2 = vld [vmem:[#allocation12 + $0x28] sm:$0xff] }
 0x2ff   :  { %7459 = vpow2.f32 %v7017_v10  ;;  %9950 = vst [vmem:[#allocation52_spill] sm:$0xff] %v9145_v2 }
 0x300   :  { %v7436_v19 = vpop.eup %7435  ;;  %7461 = vpow2.f32 %v7018_v32 }
 0x301   :  { %v7438_v14 = vpop.eup %7437  ;;  %v3547_v13 = vadd.f32 1.0, %v7436_v19  ;;  %7463 = vpow2.f32 %v7019_v43 }
 0x302   :  { %v7440_v11 = vpop.eup %7439  ;;  %v3548_v63 = vadd.f32 1.0, %v7438_v14  ;;  %7465 = vpow2.f32 %v7020_v5 }
 0x303   :  { %v7442_v39 = vpop.eup %7441  ;;  %v3549_v22 = vadd.f32 1.0, %v7440_v11  ;;  %7467 = vrcp.f32 %v3547_v13 }
 0x304   :  { %v7444_v18 = vpop.eup %7443  ;;  %v3550_v46 = vadd.f32 1.0, %v7442_v39  ;;  %7469 = vrcp.f32 %v3548_v63 }
 0x305   :  { %v7446_v27 = vpop.eup %7445  ;;  %7471 = vrcp.f32 %v3549_v22  ;;  %v3583_v51 = vadd.f32 1.0, %v7444_v18 }
 0x306   :  { %v7448_v55 = vpop.eup %7447  ;;  %7473 = vrcp.f32 %v3550_v46  ;;  %v3584_v3 = vadd.f32 1.0, %v7446_v27 }
 0x307   :  { %v7450_v35 = vpop.eup %7449  ;;  %v3585_v49 = vadd.f32 1.0, %v7448_v55  ;;  %7475 = vrcp.f32 %v3583_v51 }
 0x308   :  { %v7452_v0 = vpop.eup %7451  ;;  %v3586_v52 = vadd.f32 1.0, %v7450_v35  ;;  %7477 = vrcp.f32 %v3584_v3 }
 0x309   :  { %v7454_v1 = vpop.eup %7453  ;;  %7479 = vrcp.f32 %v3585_v49 }
 0x30a   :  { %v7456_v53 = vpop.eup %7455  ;;  %7481 = vrcp.f32 %v3586_v52 }
 0x30b   :  { %v7458_v62 = vpop.eup %7457 }
 0x30c   :  { %v7460_v6 = vpop.eup %7459 }
 0x30d   :  { %v7462_v30 = vpop.eup %7461  ;;  %v3627_v32 = vadd.f32 1.0, %v7460_v6 }
 0x30e   :  { %v7464_v7 = vpop.eup %7463  ;;  %v3628_v5 = vadd.f32 1.0, %v7462_v30 }
 0x30f   :  { %v7466_v31 = vpop.eup %7465  ;;  %v3629_v14 = vadd.f32 1.0, %v7464_v7  ;;  %7483 = vrcp.f32 %v3627_v32 }
 0x310   :  { %v7468_v10 = vpop.eup %7467  ;;  %v3630_v11 = vadd.f32 1.0, %v7466_v31  ;;  %7485 = vrcp.f32 %v3628_v5 }
 0x311   :  { %v7470_v23 = vpop.eup %7469  ;;  %v3643_v22 = vmul.f32 %v7468_v10, %v7452_v0  ;;  %7487 = vrcp.f32 %v3629_v14 }
 0x312   :  { %v7472_v43 = vpop.eup %7471  ;;  %v3644_v27 = vmul.f32 %v7470_v23, %v7454_v1  ;;  %7489 = vrcp.f32 %v3630_v11 }
 0x313   :  { %v7474_v19 = vpop.eup %7473  ;;  %v3645_v3 = vmul.f32 %v7472_v43, %v7456_v53 }
 0x314   :  { %v7476_v13 = vpop.eup %7475  ;;  %v3646_v52 = vmul.f32 %v7474_v19, %v7458_v62 }
 0x315   :  { %v7478_v63 = vpop.eup %7477  ;;  %v3639_v39 = vmul.f32 0.0, %v7476_v13 }
 0x316   :  { %v7480_v18 = vpop.eup %7479  ;;  %v3640_v46 = vmul.f32 0.0, %v7478_v63 }
 0x317   :  { %v7482_v51 = vpop.eup %7481  ;;  %v3641_v55 = vmul.f32 0.0, %v7480_v18  ;;  %v8875_v35 = vadd.f32 %v3643_v22, %v3639_v39 }
 0x318   :  { %v3642_v49 = vmul.f32 0.0, %v7482_v51  ;;  %v8877_v6 = vadd.f32 %v3644_v27, %v3640_v46  ;;  %v8890_v46 = vld [vmem:[#allocation12 + $0x1e0] sm:$0xff]  ;;  %v8893_v27 = vld [vmem:[#allocation12 + $0x1f0] sm:$0xff]  ;;  %v8896_v51 = vld [vmem:[#allocation12 + $0x1c8] sm:$0xff] }
 0x319   :  { %v8879_v30 = vadd.f32 %v3645_v3, %v3641_v55  ;;  %7491 = vtanh.f32 %v8875_v35  ;;  %v8899_v55 = vld [vmem:[#allocation12 + $0x1d8] sm:$0xff]  ;;  %v8902_v3 = vld [vmem:[#allocation12 + $0x1c0] sm:$0xff] }
 0x31a   :  { %v8882_v0 = vadd.f32 %v3646_v52, %v3642_v49  ;;  %7493 = vtanh.f32 %v8877_v6  ;;  %v8905_v49 = vld [vmem:[#allocation12 + $0x1d0] sm:$0xff]  ;;  %v8908_v52 = vld [vmem:[#allocation12 + $0x1a8] sm:$0xff] }
 0x31b   :  { %7495 = vtanh.f32 %v8879_v30 }
 0x31c   :  { %7497 = vtanh.f32 %v8882_v0  ;;  %v7484_v1 = vpop.eup %7483 }
 0x31d   :  { %v7486_v53 = vpop.eup %7485 }
 0x31e   :  { %v7488_v7 = vpop.eup %7487 }
 0x31f   :  { %v7490_v31 = vpop.eup %7489 }
 0x326   :  { %v7492_v10 = vpop.eup %7491 }
 0x327   :  { %v7494_v62 = vpop.eup %7493  ;;  %v3655_v23 = vmul.f32 %v7492_v10, %v7484_v1  ;;  %v8911_v1 = vld [vmem:[#allocation12 + $0x1b8] sm:$0xff] }
 0x328   :  { %v7496_v32 = vpop.eup %7495  ;;  %v3656_v43 = vmul.f32 %v7494_v62, %v7486_v53  ;;  %v8914_v53 = vld [vmem:[#allocation12 + $0x1a0] sm:$0xff]  ;;  %v8923_v10 = vld [vmem:[#allocation12 + $0x198] sm:$0xff] }
 0x329   :  { %v7498_v5 = vpop.eup %7497  ;;  %v3657_v19 = vmul.f32 %v7496_v32, %v7488_v7  ;;  %v8917_v7 = vld [vmem:[#allocation12 + $0x1b0] sm:$0xff]  ;;  %v8926_v62 = vld [vmem:[#allocation12 + $0x180] sm:$0xff]  ;;  %v8932_v32 = vld [vmem:[#allocation12 + $0x168] sm:$0xff] }
 0x32a   :  { %v3658_v14 = vmul.f32 %v7498_v5, %v7490_v31  ;;  %v3671_v13 = vcombine.low %v3655_v23, %v3656_v43  ;;  %v8920_v31 = vld [vmem:[#allocation12 + $0x188] sm:$0xff]  ;;  %v8929_v23 = vld [vmem:[#allocation12 + $0x190] sm:$0xff]  ;;  %v8935_v43 = vld [vmem:[#allocation12 + $0x178] sm:$0xff] }
 0x32b   :  { %v8938_v5 = vld [vmem:[#allocation12 + $0x160] sm:$0xff] }
 0x32c   :  { %v3672_v11 = vcombine.low %v3657_v19, %v3658_v14  ;;  %v3679_v63 = vrot.slane %v3671_v13, %v8863_v8  ;;  %v8941_v19 = vld [vmem:[#allocation12 + $0x170] sm:$0xff]  ;;  %v8944_v14 = vld [vmem:[#allocation12 + $0x148] sm:$0xff]  ;;  %v8947_v13 = vld [vmem:[#allocation12 + $0x158] sm:$0xff] }
 0x32e   :  { %v3686_v39 = vrot.slane %v3672_v11, %v8863_v8  ;;  %v8950_v11 = vld [vmem:[#allocation12 + $0x140] sm:$0xff] }
 0x330   :  { %v3687_v22 = vcombine.low %v3679_v63, %v3686_v39  ;;  %v8953_v63 = vld [vmem:[#allocation12 + $0x150] sm:$0xff]  ;;  %v8956_v39 = vld [vmem:[#allocation12 + $0x128] sm:$0xff] }
 0x332   :  { %v3694_v18 = vrot.slane %v3687_v22, %v8863_v8 }
 0x334   :  { %3761 = vmatmul.mubr.f32.vlgmr.msra.gmra.mxu0 %v3694_v18  ;;  %3832 = vmatmul.mubr.f32.vlgmr.msra.gmra.mxu1 %v3694_v18 }
 0x335   :  { %4046 = vmatpush1.msra.mxu0 %v8890_v46  ;;  %4117 = vmatpush1.msra.mxu1 %v8893_v27 }
 0x336   :  { %4047 = vmatprep.subr.mxu0 %v8896_v51  ;;  %4118 = vmatprep.subr.mxu1 %v8899_v55 }
 0x337   :  { %4048 = vmatpush1.msra.mxu0 %v8902_v3  ;;  %4119 = vmatpush1.msra.mxu1 %v8905_v49 }
 0x338   :  { %4049 = vmatprep.subr.mxu0 %v8908_v52  ;;  %4120 = vmatprep.subr.mxu1 %v8911_v1 }
 0x339   :  { %4050 = vmatpush1.msra.mxu0 %v8914_v53  ;;  %4121 = vmatpush1.msra.mxu1 %v8917_v7 }
 0x33a   :  { %4051 = vmatprep.subr.mxu0 %v8920_v31  ;;  %4122 = vmatprep.subr.mxu1 %v8923_v10 }
 0x33b   :  { %4052 = vmatpush1.msra.mxu0 %v8926_v62  ;;  %4123 = vmatpush1.msra.mxu1 %v8929_v23 }
 0x33c   :  { %4053 = vmatprep.subr.mxu0 %v8932_v32  ;;  %4124 = vmatprep.subr.mxu1 %v8935_v43 }
 0x33d   :  { %4054 = vmatpush1.msra.mxu0 %v8938_v5  ;;  %4125 = vmatpush1.msra.mxu1 %v8941_v19 }
 0x33e   :  { %4055 = vmatprep.subr.mxu0 %v8944_v14  ;;  %4126 = vmatprep.subr.mxu1 %v8947_v13 }
 0x33f   :  { %4056 = vmatpush1.msra.mxu0 %v8950_v11  ;;  %4127 = vmatpush1.msra.mxu1 %v8953_v63 }
 0x340   :  { %4057 = vmatprep.subr.mxu0 %v8956_v39  ;;  %4128 = vmatprep.subr.mxu1 %v8657_v45  ;;  %v9920_v45 = vld [vmem:[#allocation30_spill] sm:$0xff] }
 0x341   :  { %4058 = vmatpush1.msra.mxu0 %v8659_v50  ;;  %4129 = vmatpush1.msra.mxu1 %v8665_v25  ;;  %v9921_v50 = vld [vmem:[#allocation31_spill] sm:$0xff]  ;;  %v9922_v25 = vld [vmem:[#allocation32_spill] sm:$0xff] }
 0x342   :  { %4059 = vmatprep.subr.mxu0 %v8667_v9  ;;  %4130 = vmatprep.subr.mxu1 %v8671_v12  ;;  %v9923_v9 = vld [vmem:[#allocation33_spill] sm:$0xff]  ;;  %v9924_v12 = vld [vmem:[#allocation34_spill] sm:$0xff] }
 0x343   :  { %4060 = vmatpush1.msra.mxu0 %v8673_v38  ;;  %4131 = vmatpush1.msra.mxu1 %v8679_v40  ;;  %v9925_v38 = vld [vmem:[#allocation35_spill] sm:$0xff]  ;;  %v9926_v40 = vmov 0.0  }
 0x344   :  { %4061 = vmatprep.subr.mxu0 %v8681_v20  ;;  %4132 = vmatprep.subr.mxu1 %v8685_v58  ;;  %v9927_v20 = vld [vmem:[#allocation36_spill] sm:$0xff] }
 0x345   :  { %4062 = vmatpush1.msra.mxu0 %v8687_v16  ;;  %4133 = vmatpush1.msra.mxu1 %v8692_v24  ;;  %v9000_v58 = vld [vmem:[#allocation12 + $0x1e8] sm:$0xff]  ;;  %v9003_v16 = vld [vmem:[#allocation12 + $0x1f8] sm:$0xff] }
 0x346   :  { %4063 = vmatprep.subr.mxu0 %v8694_v28  ;;  %4134 = vmatprep.subr.mxu1 %v8698_v60  ;;  %9928 = vst [vmem:[#allocation30_spill] sm:$0xff] %v9000_v58  ;;  %9929 = vst [vmem:[#allocation31_spill] sm:$0xff] %v9003_v16 }
 0x347   :  { %4064 = vmatpush1.msra.mxu0 %v8700_v26  ;;  %4135 = vmatpush1.msra.mxu1 %v8705_v33 }
 0x348   :  { %4065 = vmatprep.subr.mxu0 %v8707_v37  ;;  %4136 = vmatprep.subr.mxu1 %v8711_v36 }
 0x349   :  { %4066 = vmatpush1.msra.mxu0 %v8713_v42  ;;  %4137 = vmatpush1.msra.mxu1 %v8717_v57 }
 0x34a   :  { %4067 = vmatprep.subr.mxu0 %v8719_v54  ;;  %4138 = vmatprep.subr.mxu1 %v8723_v34 }
 0x34b   :  { %4068 = vmatpush1.msra.mxu0 %v8725_v47  ;;  %4139 = vmatpush1.msra.mxu1 %v8729_v4  ;;  %v3660_v4 = vld [vmem:[#allocation2 + $0x6] ss:$8 sm:$0xf] }
 0x34c   :  { %4069 = vmatprep.subr.mxu0 %v8731_v29  ;;  %4140 = vmatprep.subr.mxu1 %v8735_v44  ;;  %v3662_v29 = vld [vmem:[#allocation2 + $0x26] ss:$8 sm:$0xf] }
 0x34d   :  { %4070 = vmatpush1.msra.mxu0 %v8737_v59  ;;  %4141 = vmatpush1.msra.mxu1 %v8741_v17 }
 0x34e   :  { %4071 = vmatprep.subr.mxu0 %v8743_v61  ;;  %4142 = vmatprep.subr.mxu1 %v8747_v21  ;;  %v3664_v21 = vld [vmem:[#allocation2 + $0x46] ss:$8 sm:$0xf] }
 0x34f   :  { %4072 = vmatpush1.msra.mxu0 %v8749_v48  ;;  %4143 = vmatpush1.msra.mxu1 %v9913_v56  ;;  %v3666_v48 = vld [vmem:[#allocation2 + $0x66] ss:$8 sm:$0xf] }
 0x350   :  { %4073 = vmatprep.subr.mxu0 %v8755_v15  ;;  %4144 = vmatprep.subr.mxu1 %v9920_v45 }
 0x351   :  { %4074 = vmatpush1.msra.mxu0 %v9921_v50  ;;  %4145 = vmatpush1.msra.mxu1 %v9922_v25 }
 0x352   :  { %4075 = vmatprep.subr.mxu0 %v9923_v9  ;;  %4146 = vmatprep.subr.mxu1 %v9924_v12 }
 0x353   :  { %4076 = vmatpush1.msra.mxu0 %v9925_v38  ;;  %4109 = vmatprep.mubr.f32.mxu0 %v9926_v40 }
 0x354   :  { %4147 = vmatpush1.msra.mxu1 %v9927_v20  ;;  %4180 = vmatprep.mubr.f32.mxu1 %v9926_v40 }
 0x355   :  { %4394 = vmatprep.subr.mxu0 %v9000_v58  ;;  %4465 = vmatprep.subr.mxu1 %v9003_v16 }
 0x3f4   :  { %v3762_v24 = vpop.f32.mrf.mxu0  ;;  %v3833_v28 = vpop.f32.mrf.mxu1 }
 0x3f6   :  { %v3764_v60 = vpop.f32.mrf.mxu0  ;;  %v3835_v26 = vpop.f32.mrf.mxu1 }
 0x3f7   :  { %v3842_v33 = vcombine.low %v3762_v24, %v3764_v60  ;;  %v3843_v37 = vcombine.low %v3833_v28, %v3835_v26 }
 0x3f9   :  { %v3850_v36 = vrot.slane %v3842_v33, %v8863_v8  ;;  %v3857_v42 = vrot.slane %v3843_v37, %v8863_v8 }
 0x3fb   :  { %v3858_v57 = vcombine.low %v3850_v36, %v3857_v42  ;;  %v3859_v54 = vcombine.high %v3850_v36, %v3857_v42 }
 0x3fd   :  { %v3866_v34 = vrot.slane %v3858_v57, %v8863_v8  ;;  %v3873_v47 = vrot.slane %v3859_v54, %v8863_v8 }
 0x3ff   :  { %v3874_v44 = vcombine.high %v3866_v34, %v3866_v34  ;;  %v3875_v59 = vcombine.high %v3873_v47, %v3873_v47  ;;  %v3880_v17 = vadd.f32 %v3866_v34, %v3660_v4  ;;  %v3881_v61 = vadd.f32 %v3873_v47, %v3662_v29 }
 0x401   :  { %v3882_v15 = vadd.f32 %v3874_v44, %v3664_v21  ;;  %v3883_v56 = vadd.f32 %v3875_v59, %v3666_v48  ;;  %v7021_v22 = vmul.f32 -1.442695, %v3880_v17  ;;  %v7022_v18 = vmul.f32 -1.442695, %v3881_v61 }
 0x402   :  { %v3912_v45 = vrot.slane %v3880_v17, 1  ;;  %v3913_v50 = vrot.slane %v3881_v61, 1  ;;  %v3944_v26 = vrot.slane %v3880_v17, 2  ;;  %v3956_v33 = vrot.slane %v3880_v17, 3 }
 0x403   :  { %7499 = vpow2.f32 %v7021_v22  ;;  %v7023_v25 = vmul.f32 -1.442695, %v3882_v15  ;;  %v7024_v9 = vmul.f32 -1.442695, %v3883_v56  ;;  %v3914_v12 = vrot.slane %v3882_v15, 1 }
 0x404   :  { %7501 = vpow2.f32 %v7022_v18  ;;  %v3915_v38 = vrot.slane %v3883_v56, 1  ;;  %v7025_v20 = vmul.f32 -1.442695, %v3912_v45  ;;  %v7026_v24 = vmul.f32 -1.442695, %v3913_v50 }
 0x405   :  { %7503 = vpow2.f32 %v7023_v25  ;;  %v7027_v28 = vmul.f32 -1.442695, %v3914_v12  ;;  %v3945_v37 = vrot.slane %v3881_v61, 2  ;;  %v3957_v36 = vrot.slane %v3881_v61, 3 }
 0x406   :  { %7505 = vpow2.f32 %v7024_v9  ;;  %v7028_v60 = vmul.f32 -1.442695, %v3915_v38  ;;  %v3946_v42 = vrot.slane %v3882_v15, 2  ;;  %v3958_v57 = vrot.slane %v3882_v15, 3 }
 0x407   :  { %7507 = vpow2.f32 %v7025_v20  ;;  %v3947_v54 = vrot.slane %v3883_v56, 2  ;;  %v3959_v34 = vrot.slane %v3883_v56, 3  ;;  %v7029_v47 = vmul.f32 -1.442695, %v3956_v33 }
 0x408   :  { %7509 = vpow2.f32 %v7026_v24  ;;  %v7030_v4 = vmul.f32 -1.442695, %v3957_v36  ;;  %v7031_v29 = vmul.f32 -1.442695, %v3958_v57 }
 0x409   :  { %7511 = vpow2.f32 %v7027_v28  ;;  %v7032_v44 = vmul.f32 -1.442695, %v3959_v34 }
 0x40a   :  { %7513 = vpow2.f32 %v7028_v60 }
 0x40b   :  { %7515 = vtanh.f32 %v3944_v26 }
 0x40c   :  { %7517 = vtanh.f32 %v3945_v37 }
 0x40d   :  { %7519 = vtanh.f32 %v3946_v42 }
 0x40e   :  { %7521 = vtanh.f32 %v3947_v54 }
 0x40f   :  { %7523 = vpow2.f32 %v7029_v47 }
 0x410   :  { %v7500_v59 = vpop.eup %7499  ;;  %7525 = vpow2.f32 %v7030_v4 }
 0x411   :  { %v7502_v17 = vpop.eup %7501  ;;  %v3896_v21 = vadd.f32 1.0, %v7500_v59  ;;  %7527 = vpow2.f32 %v7031_v29 }
 0x412   :  { %v7504_v61 = vpop.eup %7503  ;;  %v3897_v48 = vadd.f32 1.0, %v7502_v17  ;;  %7529 = vpow2.f32 %v7032_v44 }
 0x413   :  { %v7506_v15 = vpop.eup %7505  ;;  %v3898_v22 = vadd.f32 1.0, %v7504_v61  ;;  %7531 = vrcp.f32 %v3896_v21 }
 0x414   :  { %v7508_v56 = vpop.eup %7507  ;;  %v3899_v18 = vadd.f32 1.0, %v7506_v15  ;;  %7533 = vrcp.f32 %v3897_v48 }
 0x415   :  { %v7510_v45 = vpop.eup %7509  ;;  %7535 = vrcp.f32 %v3898_v22  ;;  %v3932_v50 = vadd.f32 1.0, %v7508_v56 }
 0x416   :  { %v7512_v25 = vpop.eup %7511  ;;  %7537 = vrcp.f32 %v3899_v18  ;;  %v3933_v9 = vadd.f32 1.0, %v7510_v45 }
 0x417   :  { %v7514_v12 = vpop.eup %7513  ;;  %v3934_v38 = vadd.f32 1.0, %v7512_v25  ;;  %7539 = vrcp.f32 %v3932_v50 }
 0x418   :  { %v7516_v20 = vpop.eup %7515  ;;  %v3935_v24 = vadd.f32 1.0, %v7514_v12  ;;  %7541 = vrcp.f32 %v3933_v9 }
 0x419   :  { %v7518_v28 = vpop.eup %7517  ;;  %7543 = vrcp.f32 %v3934_v38 }
 0x41a   :  { %v7520_v60 = vpop.eup %7519  ;;  %7545 = vrcp.f32 %v3935_v24 }
 0x41b   :  { %v7522_v26 = vpop.eup %7521 }
 0x41c   :  { %v7524_v33 = vpop.eup %7523 }
 0x41d   :  { %v7526_v37 = vpop.eup %7525  ;;  %v3976_v34 = vadd.f32 1.0, %v7524_v33 }
 0x41e   :  { %v7528_v36 = vpop.eup %7527  ;;  %v3977_v4 = vadd.f32 1.0, %v7526_v37 }
 0x41f   :  { %v7530_v42 = vpop.eup %7529  ;;  %v3978_v44 = vadd.f32 1.0, %v7528_v36  ;;  %7547 = vrcp.f32 %v3976_v34 }
 0x420   :  { %v7532_v57 = vpop.eup %7531  ;;  %v3979_v17 = vadd.f32 1.0, %v7530_v42  ;;  %7549 = vrcp.f32 %v3977_v4 }
 0x421   :  { %v7534_v54 = vpop.eup %7533  ;;  %v3992_v61 = vmul.f32 %v7532_v57, %v7516_v20  ;;  %7551 = vrcp.f32 %v3978_v44 }
 0x422   :  { %v7536_v47 = vpop.eup %7535  ;;  %v3993_v22 = vmul.f32 %v7534_v54, %v7518_v28  ;;  %7553 = vrcp.f32 %v3979_v17  ;;  %v9055_v17 = vld [vmem:[#allocation12 + $0x120] sm:$0xff] }
 0x423   :  { %v7538_v29 = vpop.eup %7537  ;;  %v3994_v45 = vmul.f32 %v7536_v47, %v7520_v60 }
 0x424   :  { %v7540_v59 = vpop.eup %7539  ;;  %v3995_v9 = vmul.f32 %v7538_v29, %v7522_v26 }
 0x425   :  { %v7542_v21 = vpop.eup %7541  ;;  %v3988_v48 = vmul.f32 %v7540_v59, %v8875_v35  ;;  %v9052_v59 = vld [vmem:[#allocation12 + $0x138] sm:$0xff] }
 0x426   :  { %v7544_v15 = vpop.eup %7543  ;;  %v3989_v56 = vmul.f32 %v7542_v21, %v8877_v6  ;;  %v9058_v21 = vld [vmem:[#allocation12 + $0x130] sm:$0xff] }
 0x427   :  { %v7546_v18 = vpop.eup %7545  ;;  %v3990_v50 = vmul.f32 %v7544_v15, %v8879_v30  ;;  %v9013_v25 = vadd.f32 %v3992_v61, %v3988_v48  ;;  %v9061_v61 = vld [vmem:[#allocation12 + $0x108] sm:$0xff]  ;;  %v9064_v48 = vld [vmem:[#allocation12 + $0x118] sm:$0xff]  ;;  %v9067_v15 = vld [vmem:[#allocation12 + $0x100] sm:$0xff] }
 0x428   :  { %v3991_v12 = vmul.f32 %v7546_v18, %v8882_v0  ;;  %v9016_v38 = vadd.f32 %v3993_v22, %v3989_v56  ;;  %v9070_v22 = vld [vmem:[#allocation12 + $0x110] sm:$0xff]  ;;  %v9073_v56 = vld [vmem:[#allocation12 + $0xe8] sm:$0xff]  ;;  %v9076_v18 = vld [vmem:[#allocation12 + $0xf8] sm:$0xff] }
 0x429   :  { %v9018_v20 = vadd.f32 %v3994_v45, %v3990_v50  ;;  %7555 = vtanh.f32 %v9013_v25  ;;  %v9079_v45 = vld [vmem:[#allocation12 + $0xe0] sm:$0xff]  ;;  %v9082_v50 = vld [vmem:[#allocation12 + $0xf0] sm:$0xff] }
 0x42a   :  { %v9021_v35 = vadd.f32 %v3995_v9, %v3991_v12  ;;  %7557 = vtanh.f32 %v9016_v38  ;;  %v9085_v9 = vld [vmem:[#allocation12 + $0xc8] sm:$0xff]  ;;  %v9088_v12 = vld [vmem:[#allocation12 + $0xd8] sm:$0xff] }
 0x42b   :  { %7559 = vtanh.f32 %v9018_v20  ;;  %9930 = vst [vmem:[#allocation32_spill] sm:$0xff] %v9085_v9  ;;  %9931 = vst [vmem:[#allocation33_spill] sm:$0xff] %v9088_v12 }
 0x42c   :  { %7561 = vtanh.f32 %v9021_v35  ;;  %v7548_v6 = vpop.eup %7547 }
 0x42d   :  { %v7550_v30 = vpop.eup %7549 }
 0x42e   :  { %v7552_v24 = vpop.eup %7551 }
 0x42f   :  { %v7554_v28 = vpop.eup %7553 }
 0x436   :  { %v7556_v60 = vpop.eup %7555 }
 0x437   :  { %v7558_v0 = vpop.eup %7557  ;;  %v4004_v26 = vmul.f32 %v7556_v60, %v7548_v6  ;;  %v9091_v6 = vld [vmem:[#allocation12 + $0xc0] sm:$0xff] }
 0x438   :  { %v7560_v33 = vpop.eup %7559  ;;  %v4005_v37 = vmul.f32 %v7558_v0, %v7550_v30  ;;  %9932 = vst [vmem:[#allocation34_spill] sm:$0xff] %v9091_v6  ;;  %v9094_v30 = vld [vmem:[#allocation12 + $0xd0] sm:$0xff]  ;;  %v9103_v60 = vld [vmem:[#allocation12 + $0xa0] sm:$0xff] }
 0x439   :  { %v7562_v36 = vpop.eup %7561  ;;  %v4006_v42 = vmul.f32 %v7560_v33, %v7552_v24  ;;  %9933 = vst [vmem:[#allocation35_spill] sm:$0xff] %v9094_v30  ;;  %v9097_v24 = vld [vmem:[#allocation12 + $0xa8] sm:$0xff]  ;;  %9936 = vst [vmem:[#allocation38_spill] sm:$0xff] %v9103_v60  ;;  %v9106_v0 = vld [vmem:[#allocation12 + $0xb0] sm:$0xff] }
 0x43a   :  { %v4007_v57 = vmul.f32 %v7562_v36, %v7554_v28  ;;  %v4020_v54 = vcombine.low %v4004_v26, %v4005_v37  ;;  %9934 = vst [vmem:[#allocation36_spill] sm:$0xff] %v9097_v24  ;;  %v9100_v28 = vld [vmem:[#allocation12 + $0xb8] sm:$0xff]  ;;  %9937 = vst [vmem:[#allocation39_spill] sm:$0xff] %v9106_v0  ;;  %v9109_v26 = vld [vmem:[#allocation12 + $0x88] sm:$0xff] }
 0x43b   :  { %9935 = vst [vmem:[#allocation37_spill] sm:$0xff] %v9100_v28  ;;  %9938 = vst [vmem:[#allocation40_spill] sm:$0xff] %v9109_v26  ;;  %v9112_v33 = vld [vmem:[#allocation12 + $0x98] sm:$0xff]  ;;  %v9115_v37 = vld [vmem:[#allocation12 + $0x80] sm:$0xff] }
 0x43c   :  { %v4021_v34 = vcombine.low %v4006_v42, %v4007_v57  ;;  %v4028_v47 = vrot.slane %v4020_v54, %v8863_v8  ;;  %9939 = vst [vmem:[#allocation41_spill] sm:$0xff] %v9112_v33  ;;  %9940 = vst [vmem:[#allocation42_spill] sm:$0xff] %v9115_v37  ;;  %v9118_v36 = vld [vmem:[#allocation12 + $0x90] sm:$0xff]  ;;  %v9121_v42 = vld [vmem:[#allocation12 + $0x68] sm:$0xff] }
 0x43d   :  { %9941 = vst [vmem:[#allocation43_spill] sm:$0xff] %v9118_v36  ;;  %9942 = vst [vmem:[#allocation44_spill] sm:$0xff] %v9121_v42  ;;  %v9124_v57 = vld [vmem:[#allocation12 + $0x78] sm:$0xff]  ;;  %v9127_v54 = vld [vmem:[#allocation12 + $0x60] sm:$0xff] }
 0x43e   :  { %v4035_v4 = vrot.slane %v4021_v34, %v8863_v8  ;;  %9943 = vst [vmem:[#allocation45_spill] sm:$0xff] %v9124_v57  ;;  %9944 = vst [vmem:[#allocation46_spill] sm:$0xff] %v9127_v54  ;;  %v9130_v34 = vld [vmem:[#allocation12 + $0x70] sm:$0xff] }
 0x43f   :  { %9945 = vst [vmem:[#allocation47_spill] sm:$0xff] %v9130_v34 }
 0x440   :  { %v4036_v29 = vcombine.low %v4028_v47, %v4035_v4  ;;  %v9133_v47 = vld [vmem:[#allocation12 + $0x48] sm:$0xff]  ;;  %v9136_v4 = vld [vmem:[#allocation12 + $0x58] sm:$0xff] }
 0x441   :  { %9946 = vst [vmem:[#allocation48_spill] sm:$0xff] %v9133_v47  ;;  %9947 = vst [vmem:[#allocation49_spill] sm:$0xff] %v9136_v4 }
 0x442   :  { %v4043_v44 = vrot.slane %v4036_v29, %v8863_v8  ;;  %v9139_v29 = vld [vmem:[#allocation12 + $0x40] sm:$0xff] }
 0x443   :  { %9948 = vst [vmem:[#allocation50_spill] sm:$0xff] %v9139_v29 }
 0x444   :  { %4110 = vmatmul.mubr.f32.vlgmr.msra.gmra.mxu0 %v4043_v44  ;;  %4181 = vmatmul.mubr.f32.vlgmr.msra.gmra.mxu1 %v4043_v44  ;;  %v9142_v44 = vld [vmem:[#allocation12 + $0x50] sm:$0xff] }
 0x445   :  { %4395 = vmatpush1.msra.mxu0 %v8890_v46  ;;  %4466 = vmatpush1.msra.mxu1 %v8893_v27  ;;  %9949 = vst [vmem:[#allocation51_spill] sm:$0xff] %v9142_v44 }
 0x446   :  { %4396 = vmatprep.subr.mxu0 %v8896_v51  ;;  %4467 = vmatprep.subr.mxu1 %v8899_v55 }
 0x447   :  { %4397 = vmatpush1.msra.mxu0 %v8902_v3  ;;  %4468 = vmatpush1.msra.mxu1 %v8905_v49 }
 0x448   :  { %4398 = vmatprep.subr.mxu0 %v8908_v52  ;;  %4469 = vmatprep.subr.mxu1 %v8911_v1 }
 0x449   :  { %4399 = vmatpush1.msra.mxu0 %v8914_v53  ;;  %4470 = vmatpush1.msra.mxu1 %v8917_v7 }
 0x44a   :  { %4400 = vmatprep.subr.mxu0 %v8920_v31  ;;  %4471 = vmatprep.subr.mxu1 %v8923_v10 }
 0x44b   :  { %4401 = vmatpush1.msra.mxu0 %v8926_v62  ;;  %4472 = vmatpush1.msra.mxu1 %v8929_v23 }
 0x44c   :  { %4402 = vmatprep.subr.mxu0 %v8932_v32  ;;  %4473 = vmatprep.subr.mxu1 %v8935_v43 }
 0x44d   :  { %4403 = vmatpush1.msra.mxu0 %v8938_v5  ;;  %4474 = vmatpush1.msra.mxu1 %v8941_v19 }
 0x44e   :  { %4404 = vmatprep.subr.mxu0 %v8944_v14  ;;  %4475 = vmatprep.subr.mxu1 %v8947_v13 }
 0x44f   :  { %4405 = vmatpush1.msra.mxu0 %v8950_v11  ;;  %4476 = vmatpush1.msra.mxu1 %v8953_v63 }
 0x450   :  { %4406 = vmatprep.subr.mxu0 %v8956_v39  ;;  %4477 = vmatprep.subr.mxu1 %v9052_v59 }
 0x451   :  { %4407 = vmatpush1.msra.mxu0 %v9055_v17  ;;  %4478 = vmatpush1.msra.mxu1 %v9058_v21 }
 0x452   :  { %4408 = vmatprep.subr.mxu0 %v9061_v61  ;;  %4479 = vmatprep.subr.mxu1 %v9064_v48 }
 0x453   :  { %4409 = vmatpush1.msra.mxu0 %v9067_v15  ;;  %4480 = vmatpush1.msra.mxu1 %v9070_v22 }
 0x454   :  { %4410 = vmatprep.subr.mxu0 %v9073_v56  ;;  %4481 = vmatprep.subr.mxu1 %v9076_v18 }
 0x455   :  { %4411 = vmatpush1.msra.mxu0 %v9079_v45  ;;  %4482 = vmatpush1.msra.mxu1 %v9082_v50 }
 0x456   :  { %4412 = vmatprep.subr.mxu0 %v9085_v9  ;;  %4483 = vmatprep.subr.mxu1 %v9088_v12 }
 0x457   :  { %4413 = vmatpush1.msra.mxu0 %v9091_v6  ;;  %4484 = vmatpush1.msra.mxu1 %v9094_v30 }
 0x458   :  { %4414 = vmatprep.subr.mxu0 %v9097_v24  ;;  %4485 = vmatprep.subr.mxu1 %v9100_v28  ;;  %v4015_v28 = vld [vmem:[#allocation2 + $0x65] ss:$8 sm:$0xf] }
 0x459   :  { %4415 = vmatpush1.msra.mxu0 %v9103_v60  ;;  %4486 = vmatpush1.msra.mxu1 %v9106_v0  ;;  %v4013_v60 = vld [vmem:[#allocation2 + $0x45] ss:$8 sm:$0xf] }
 0x45a   :  { %4416 = vmatprep.subr.mxu0 %v9109_v26  ;;  %4487 = vmatprep.subr.mxu1 %v9112_v33 }
 0x45b   :  { %4417 = vmatpush1.msra.mxu0 %v9115_v37  ;;  %4488 = vmatpush1.msra.mxu1 %v9118_v36  ;;  %v4009_v37 = vld [vmem:[#allocation2 + $0x5] ss:$8 sm:$0xf] }
 0x45c   :  { %4418 = vmatprep.subr.mxu0 %v9121_v42  ;;  %4489 = vmatprep.subr.mxu1 %v9124_v57 }
 0x45d   :  { %4419 = vmatpush1.msra.mxu0 %v9127_v54  ;;  %4490 = vmatpush1.msra.mxu1 %v9130_v34 }
 0x45e   :  { %4420 = vmatprep.subr.mxu0 %v9133_v47  ;;  %4491 = vmatprep.subr.mxu1 %v9136_v4  ;;  %v9151_v47 = vld [vmem:[#allocation12 + $0x20] sm:$0xff]  ;;  %v9154_v4 = vld [vmem:[#allocation12 + $0x30] sm:$0xff] }
 0x45f   :  { %4421 = vmatpush1.msra.mxu0 %v9139_v29  ;;  %4492 = vmatpush1.msra.mxu1 %v9142_v44  ;;  %9952 = vst [vmem:[#allocation54_spill] sm:$0xff] %v9151_v47  ;;  %9953 = vst [vmem:[#allocation55_spill] sm:$0xff] %v9154_v4  ;;  %v9157_v29 = vld [vmem:[#allocation12 + $0x8] sm:$0xff]  ;;  %v9160_v44 = vld [vmem:[#allocation12 + $0x18] sm:$0xff] }
 0x460   :  { %4422 = vmatprep.subr.mxu0 %v9145_v2  ;;  %4493 = vmatprep.subr.mxu1 %v9148_v41  ;;  %9954 = vst [vmem:[#allocation56_spill] sm:$0xff] %v9157_v29  ;;  %9955 = vst [vmem:[#allocation57_spill] sm:$0xff] %v9160_v44  ;;  %v9163_v2 = vld [vmem:[#allocation12] sm:$0xff]  ;;  %v9167_v41 = vld [vmem:[#allocation12 + $0x10] sm:$0xff] }
 0x461   :  { %4423 = vmatpush1.msra.mxu0 %v9151_v47  ;;  %4494 = vmatpush1.msra.mxu1 %v9154_v4  ;;  %9956 = vst [vmem:[#allocation58_spill] sm:$0xff] %v9163_v2  ;;  %9957 = vst [vmem:[#allocation59_spill] sm:$0xff] %v9167_v41 }
 0x462   :  { %4424 = vmatprep.subr.mxu0 %v9157_v29  ;;  %4495 = vmatprep.subr.mxu1 %v9160_v44 }
 0x463   :  { %4425 = vmatpush1.msra.mxu0 %v9163_v2  ;;  %4458 = vmatprep.mubr.f32.mxu0 %v9926_v40 }
 0x464   :  { %4496 = vmatpush1.msra.mxu1 %v9167_v41  ;;  %4529 = vmatprep.mubr.f32.mxu1 %v9926_v40 }
 0x465   :  { %4743 = vmatprep.subr.mxu0 %v9000_v58  ;;  %4814 = vmatprep.subr.mxu1 %v9003_v16  ;;  %v4011_v58 = vld [vmem:[#allocation2 + $0x25] ss:$8 sm:$0xf] }
 0x504   :  { %v4111_v29 = vpop.f32.mrf.mxu0  ;;  %v4182_v4 = vpop.f32.mrf.mxu1 }
 0x506   :  { %v4113_v47 = vpop.f32.mrf.mxu0  ;;  %v4184_v44 = vpop.f32.mrf.mxu1 }
 0x507   :  { %v4191_v34 = vcombine.low %v4111_v29, %v4113_v47  ;;  %v4192_v54 = vcombine.low %v4182_v4, %v4184_v44 }
 0x509   :  { %v4199_v2 = vrot.slane %v4191_v34, %v8863_v8  ;;  %v4206_v57 = vrot.slane %v4192_v54, %v8863_v8 }
 0x50b   :  { %v4207_v42 = vcombine.low %v4199_v2, %v4206_v57  ;;  %v4208_v36 = vcombine.high %v4199_v2, %v4206_v57 }
 0x50d   :  { %v4215_v41 = vrot.slane %v4207_v42, %v8863_v8  ;;  %v4222_v40 = vrot.slane %v4208_v36, %v8863_v8 }
 0x50f   :  { %v4223_v33 = vcombine.high %v4215_v41, %v4215_v41  ;;  %v4224_v16 = vcombine.high %v4222_v40, %v4222_v40  ;;  %v4229_v26 = vadd.f32 %v4215_v41, %v4009_v37  ;;  %v4230_v0 = vadd.f32 %v4222_v40, %v4011_v58 }
 0x511   :  { %v4231_v47 = vadd.f32 %v4223_v33, %v4013_v60  ;;  %v4232_v4 = vadd.f32 %v4224_v16, %v4015_v28  ;;  %v7033_v29 = vmul.f32 -1.442695, %v4229_v26  ;;  %v7034_v34 = vmul.f32 -1.442695, %v4230_v0 }
 0x512   :  { %v4261_v44 = vrot.slane %v4229_v26, 1  ;;  %v4262_v54 = vrot.slane %v4230_v0, 1  ;;  %v4293_v40 = vrot.slane %v4229_v26, 2  ;;  %v4305_v58 = vrot.slane %v4229_v26, 3 }
 0x513   :  { %7563 = vpow2.f32 %v7033_v29  ;;  %v7035_v2 = vmul.f32 -1.442695, %v4231_v47  ;;  %v7036_v57 = vmul.f32 -1.442695, %v4232_v4  ;;  %v4263_v42 = vrot.slane %v4231_v47, 1 }
 0x514   :  { %7565 = vpow2.f32 %v7034_v34  ;;  %v4264_v36 = vrot.slane %v4232_v4, 1  ;;  %v7037_v24 = vmul.f32 -1.442695, %v4261_v44  ;;  %v7038_v30 = vmul.f32 -1.442695, %v4262_v54 }
 0x515   :  { %7567 = vpow2.f32 %v7035_v2  ;;  %v7039_v6 = vmul.f32 -1.442695, %v4263_v42  ;;  %v4294_v16 = vrot.slane %v4230_v0, 2  ;;  %v4306_v28 = vrot.slane %v4230_v0, 3 }
 0x516   :  { %7569 = vpow2.f32 %v7036_v57  ;;  %v7040_v41 = vmul.f32 -1.442695, %v4264_v36  ;;  %v4295_v60 = vrot.slane %v4231_v47, 2  ;;  %v4307_v33 = vrot.slane %v4231_v47, 3 }
 0x517   :  { %7571 = vpow2.f32 %v7037_v24  ;;  %v4296_v37 = vrot.slane %v4232_v4, 2  ;;  %v4308_v29 = vrot.slane %v4232_v4, 3  ;;  %v7041_v34 = vmul.f32 -1.442695, %v4305_v58 }
 0x518   :  { %7573 = vpow2.f32 %v7038_v30  ;;  %v7042_v44 = vmul.f32 -1.442695, %v4306_v28  ;;  %v7043_v54 = vmul.f32 -1.442695, %v4307_v33 }
 0x519   :  { %7575 = vpow2.f32 %v7039_v6  ;;  %v7044_v2 = vmul.f32 -1.442695, %v4308_v29 }
 0x51a   :  { %7577 = vpow2.f32 %v7040_v41 }
 0x51b   :  { %7579 = vtanh.f32 %v4293_v40 }
 0x51c   :  { %7581 = vtanh.f32 %v4294_v16 }
 0x51d   :  { %7583 = vtanh.f32 %v4295_v60 }
 0x51e   :  { %7585 = vtanh.f32 %v4296_v37 }
 0x51f   :  { %7587 = vpow2.f32 %v7041_v34 }
 0x520   :  { %v7564_v24 = vpop.eup %7563  ;;  %7589 = vpow2.f32 %v7042_v44 }
 0x521   :  { %v7566_v30 = vpop.eup %7565  ;;  %v4245_v26 = vadd.f32 1.0, %v7564_v24  ;;  %7591 = vpow2.f32 %v7043_v54 }
 0x522   :  { %v7568_v6 = vpop.eup %7567  ;;  %v4246_v0 = vadd.f32 1.0, %v7566_v30  ;;  %7593 = vpow2.f32 %v7044_v2 }
 0x523   :  { %v7570_v47 = vpop.eup %7569  ;;  %v4247_v57 = vadd.f32 1.0, %v7568_v6  ;;  %7595 = vrcp.f32 %v4245_v26 }
 0x524   :  { %v7572_v4 = vpop.eup %7571  ;;  %v4248_v42 = vadd.f32 1.0, %v7570_v47  ;;  %7597 = vrcp.f32 %v4246_v0 }
 0x525   :  { %v7574_v36 = vpop.eup %7573  ;;  %7599 = vrcp.f32 %v4247_v57  ;;  %v4281_v41 = vadd.f32 1.0, %v7572_v4 }
 0x526   :  { %v7576_v40 = vpop.eup %7575  ;;  %7601 = vrcp.f32 %v4248_v42  ;;  %v4282_v58 = vadd.f32 1.0, %v7574_v36 }
 0x527   :  { %v7578_v16 = vpop.eup %7577  ;;  %v4283_v28 = vadd.f32 1.0, %v7576_v40  ;;  %7603 = vrcp.f32 %v4281_v41 }
 0x528   :  { %v7580_v60 = vpop.eup %7579  ;;  %v4284_v33 = vadd.f32 1.0, %v7578_v16  ;;  %7605 = vrcp.f32 %v4282_v58 }
 0x529   :  { %v7582_v37 = vpop.eup %7581  ;;  %7607 = vrcp.f32 %v4283_v28 }
 0x52a   :  { %v7584_v29 = vpop.eup %7583  ;;  %7609 = vrcp.f32 %v4284_v33 }
 0x52b   :  { %v7586_v34 = vpop.eup %7585 }
 0x52c   :  { %v7588_v44 = vpop.eup %7587 }
 0x52d   :  { %v7590_v54 = vpop.eup %7589  ;;  %v4325_v6 = vadd.f32 1.0, %v7588_v44 }
 0x52e   :  { %v7592_v2 = vpop.eup %7591  ;;  %v4326_v47 = vadd.f32 1.0, %v7590_v54 }
 0x52f   :  { %v7594_v24 = vpop.eup %7593  ;;  %v4327_v4 = vadd.f32 1.0, %v7592_v2  ;;  %7611 = vrcp.f32 %v4325_v6 }
 0x530   :  { %v7596_v30 = vpop.eup %7595  ;;  %v4328_v36 = vadd.f32 1.0, %v7594_v24  ;;  %7613 = vrcp.f32 %v4326_v47 }
 0x531   :  { %v7598_v26 = vpop.eup %7597  ;;  %v4341_v40 = vmul.f32 %v7596_v30, %v7580_v60  ;;  %7615 = vrcp.f32 %v4327_v4 }
 0x532   :  { %v7600_v0 = vpop.eup %7599  ;;  %v4342_v28 = vmul.f32 %v7598_v26, %v7582_v37  ;;  %7617 = vrcp.f32 %v4328_v36 }
 0x533   :  { %v7602_v57 = vpop.eup %7601  ;;  %v4343_v9 = vmul.f32 %v7600_v0, %v7584_v29 }
 0x534   :  { %v7604_v42 = vpop.eup %7603  ;;  %v4344_v2 = vmul.f32 %v7602_v57, %v7586_v34 }
 0x535   :  { %v7606_v41 = vpop.eup %7605  ;;  %v4337_v58 = vmul.f32 %v7604_v42, %v9013_v25 }
 0x536   :  { %v7608_v16 = vpop.eup %7607  ;;  %v4338_v33 = vmul.f32 %v7606_v41, %v9016_v38 }
 0x537   :  { %v7610_v12 = vpop.eup %7609  ;;  %v4339_v44 = vmul.f32 %v7608_v16, %v9018_v20  ;;  %v9180_v54 = vadd.f32 %v4341_v40, %v4337_v58  ;;  %v9981_v58 = vld [vmem:[#allocation55_spill] sm:$0xff]  ;;  %v9982_v16 = vld [vmem:[#allocation56_spill] sm:$0xff] }
 0x538   :  { %v4340_v24 = vmul.f32 %v7610_v12, %v9021_v35  ;;  %v9183_v6 = vadd.f32 %v4342_v28, %v4338_v33  ;;  %v9983_v28 = vld [vmem:[#allocation57_spill] sm:$0xff]  ;;  %v9984_v33 = vld [vmem:[#allocation58_spill] sm:$0xff] }
 0x539   :  { %v9185_v60 = vadd.f32 %v4343_v9, %v4339_v44  ;;  %7619 = vtanh.f32 %v9180_v54  ;;  %v9985_v44 = vmov 0.0  }
 0x53a   :  { %v9188_v25 = vadd.f32 %v4344_v2, %v4340_v24  ;;  %7621 = vtanh.f32 %v9183_v6  ;;  %v9986_v2 = vld [vmem:[#allocation59_spill] sm:$0xff]  ;;  %v9987_v24 = vld [vmem:[#allocation30_spill] sm:$0xff] }
 0x53b   :  { %7623 = vtanh.f32 %v9185_v60 }
 0x53c   :  { %7625 = vtanh.f32 %v9188_v25  ;;  %v7612_v38 = vpop.eup %7611 }
 0x53d   :  { %v7614_v20 = vpop.eup %7613 }
 0x53e   :  { %v7616_v37 = vpop.eup %7615 }
 0x53f   :  { %v7618_v29 = vpop.eup %7617 }
 0x546   :  { %v7620_v34 = vpop.eup %7619 }
 0x547   :  { %v7622_v35 = vpop.eup %7621  ;;  %v4353_v12 = vmul.f32 %v7620_v34, %v7612_v38  ;;  %v9988_v38 = vld [vmem:[#allocation31_spill] sm:$0xff] }
 0x548   :  { %v7624_v30 = vpop.eup %7623  ;;  %v4354_v9 = vmul.f32 %v7622_v35, %v7614_v20 }
 0x549   :  { %v7626_v26 = vpop.eup %7625  ;;  %v4355_v0 = vmul.f32 %v7624_v30, %v7616_v37 }
 0x54a   :  { %v4356_v47 = vmul.f32 %v7626_v26, %v7618_v29  ;;  %v4369_v57 = vcombine.low %v4353_v12, %v4354_v9 }
 0x54c   :  { %v4370_v4 = vcombine.low %v4355_v0, %v4356_v47  ;;  %v4377_v42 = vrot.slane %v4369_v57, %v8863_v8 }
 0x54e   :  { %v4384_v36 = vrot.slane %v4370_v4, %v8863_v8  ;;  %v4358_v4 = vld [vmem:[#allocation2 + $0x4] ss:$8 sm:$0xf] }
 0x550   :  { %v4385_v41 = vcombine.low %v4377_v42, %v4384_v36  ;;  %v4360_v42 = vld [vmem:[#allocation2 + $0x24] ss:$8 sm:$0xf] }
 0x552   :  { %v4392_v40 = vrot.slane %v4385_v41, %v8863_v8 }
 0x554   :  { %4459 = vmatmul.mubr.f32.vlgmr.msra.gmra.mxu0 %v4392_v40  ;;  %4530 = vmatmul.mubr.f32.vlgmr.msra.gmra.mxu1 %v4392_v40 }
 0x555   :  { %4744 = vmatpush1.msra.mxu0 %v8890_v46  ;;  %4815 = vmatpush1.msra.mxu1 %v8893_v27  ;;  %v9958_v46 = vld [vmem:[#allocation32_spill] sm:$0xff]  ;;  %v9959_v27 = vld [vmem:[#allocation33_spill] sm:$0xff] }
 0x556   :  { %4745 = vmatprep.subr.mxu0 %v8896_v51  ;;  %4816 = vmatprep.subr.mxu1 %v8899_v55  ;;  %v9960_v51 = vld [vmem:[#allocation34_spill] sm:$0xff]  ;;  %v9961_v55 = vld [vmem:[#allocation35_spill] sm:$0xff] }
 0x557   :  { %4746 = vmatpush1.msra.mxu0 %v8902_v3  ;;  %4817 = vmatpush1.msra.mxu1 %v8905_v49  ;;  %v9962_v3 = vld [vmem:[#allocation36_spill] sm:$0xff]  ;;  %v9963_v49 = vld [vmem:[#allocation37_spill] sm:$0xff] }
 0x558   :  { %4747 = vmatprep.subr.mxu0 %v8908_v52  ;;  %4818 = vmatprep.subr.mxu1 %v8911_v1  ;;  %v9964_v52 = vld [vmem:[#allocation38_spill] sm:$0xff]  ;;  %v9965_v1 = vld [vmem:[#allocation39_spill] sm:$0xff] }
 0x559   :  { %4748 = vmatpush1.msra.mxu0 %v8914_v53  ;;  %4819 = vmatpush1.msra.mxu1 %v8917_v7  ;;  %v9966_v53 = vld [vmem:[#allocation40_spill] sm:$0xff]  ;;  %v9967_v7 = vld [vmem:[#allocation41_spill] sm:$0xff] }
 0x55a   :  { %4749 = vmatprep.subr.mxu0 %v8920_v31  ;;  %4820 = vmatprep.subr.mxu1 %v8923_v10  ;;  %v9968_v31 = vld [vmem:[#allocation42_spill] sm:$0xff]  ;;  %v9969_v10 = vld [vmem:[#allocation43_spill] sm:$0xff] }
 0x55b   :  { %4750 = vmatpush1.msra.mxu0 %v8926_v62  ;;  %4821 = vmatpush1.msra.mxu1 %v8929_v23  ;;  %v9970_v62 = vld [vmem:[#allocation44_spill] sm:$0xff]  ;;  %v9971_v23 = vld [vmem:[#allocation45_spill] sm:$0xff] }
 0x55c   :  { %4751 = vmatprep.subr.mxu0 %v8932_v32  ;;  %4822 = vmatprep.subr.mxu1 %v8935_v43  ;;  %v9972_v32 = vld [vmem:[#allocation46_spill] sm:$0xff]  ;;  %v9973_v43 = vld [vmem:[#allocation47_spill] sm:$0xff] }
 0x55d   :  { %4752 = vmatpush1.msra.mxu0 %v8938_v5  ;;  %4823 = vmatpush1.msra.mxu1 %v8941_v19  ;;  %v9974_v5 = vld [vmem:[#allocation48_spill] sm:$0xff]  ;;  %v9975_v19 = vld [vmem:[#allocation49_spill] sm:$0xff] }
 0x55e   :  { %4753 = vmatprep.subr.mxu0 %v8944_v14  ;;  %4824 = vmatprep.subr.mxu1 %v8947_v13  ;;  %v9976_v14 = vld [vmem:[#allocation50_spill] sm:$0xff]  ;;  %v9977_v13 = vld [vmem:[#allocation51_spill] sm:$0xff] }
 0x55f   :  { %4754 = vmatpush1.msra.mxu0 %v8950_v11  ;;  %4825 = vmatpush1.msra.mxu1 %v8953_v63  ;;  %v9978_v11 = vld [vmem:[#allocation52_spill] sm:$0xff]  ;;  %v9979_v63 = vld [vmem:[#allocation53_spill] sm:$0xff] }
 0x560   :  { %4755 = vmatprep.subr.mxu0 %v8956_v39  ;;  %4826 = vmatprep.subr.mxu1 %v9052_v59  ;;  %v9980_v39 = vld [vmem:[#allocation54_spill] sm:$0xff] }
 0x561   :  { %4756 = vmatpush1.msra.mxu0 %v9055_v17  ;;  %4827 = vmatpush1.msra.mxu1 %v9058_v21 }
 0x562   :  { %4757 = vmatprep.subr.mxu0 %v9061_v61  ;;  %4828 = vmatprep.subr.mxu1 %v9064_v48 }
 0x563   :  { %4758 = vmatpush1.msra.mxu0 %v9067_v15  ;;  %4829 = vmatpush1.msra.mxu1 %v9070_v22 }
 0x564   :  { %4759 = vmatprep.subr.mxu0 %v9073_v56  ;;  %4830 = vmatprep.subr.mxu1 %v9076_v18 }
 0x565   :  { %4760 = vmatpush1.msra.mxu0 %v9079_v45  ;;  %4831 = vmatpush1.msra.mxu1 %v9082_v50 }
 0x566   :  { %4761 = vmatprep.subr.mxu0 %v9958_v46  ;;  %4832 = vmatprep.subr.mxu1 %v9959_v27 }
 0x567   :  { %4762 = vmatpush1.msra.mxu0 %v9960_v51  ;;  %4833 = vmatpush1.msra.mxu1 %v9961_v55 }
 0x568   :  { %4763 = vmatprep.subr.mxu0 %v9962_v3  ;;  %4834 = vmatprep.subr.mxu1 %v9963_v49 }
 0x569   :  { %4764 = vmatpush1.msra.mxu0 %v9964_v52  ;;  %4835 = vmatpush1.msra.mxu1 %v9965_v1 }
 0x56a   :  { %4765 = vmatprep.subr.mxu0 %v9966_v53  ;;  %4836 = vmatprep.subr.mxu1 %v9967_v7 }
 0x56b   :  { %4766 = vmatpush1.msra.mxu0 %v9968_v31  ;;  %4837 = vmatpush1.msra.mxu1 %v9969_v10 }
 0x56c   :  { %4767 = vmatprep.subr.mxu0 %v9970_v62  ;;  %4838 = vmatprep.subr.mxu1 %v9971_v23 }
 0x56d   :  { %4768 = vmatpush1.msra.mxu0 %v9972_v32  ;;  %4839 = vmatpush1.msra.mxu1 %v9973_v43 }
 0x56e   :  { %4769 = vmatprep.subr.mxu0 %v9974_v5  ;;  %4840 = vmatprep.subr.mxu1 %v9975_v19 }
 0x56f   :  { %4770 = vmatpush1.msra.mxu0 %v9976_v14  ;;  %4841 = vmatpush1.msra.mxu1 %v9977_v13 }
 0x570   :  { %4771 = vmatprep.subr.mxu0 %v9978_v11  ;;  %4842 = vmatprep.subr.mxu1 %v9979_v63 }
 0x571   :  { %4772 = vmatpush1.msra.mxu0 %v9980_v39  ;;  %4843 = vmatpush1.msra.mxu1 %v9981_v58 }
 0x572   :  { %4773 = vmatprep.subr.mxu0 %v9982_v16  ;;  %4844 = vmatprep.subr.mxu1 %v9983_v28 }
 0x573   :  { %4774 = vmatpush1.msra.mxu0 %v9984_v33  ;;  %4807 = vmatprep.mubr.f32.mxu0 %v9985_v44 }
 0x574   :  { %4845 = vmatpush1.msra.mxu1 %v9986_v2  ;;  %4878 = vmatprep.mubr.f32.mxu1 %v9985_v44  ;;  %v4364_v2 = vld [vmem:[#allocation2 + $0x64] ss:$8 sm:$0xf] }
 0x575   :  { %5092 = vmatprep.subr.mxu0 %v9987_v24  ;;  %5163 = vmatprep.subr.mxu1 %v9988_v38  ;;  %v4362_v38 = vld [vmem:[#allocation2 + $0x44] ss:$8 sm:$0xf] }
 0x614   :  { %v4460_v20 = vpop.f32.mrf.mxu0  ;;  %v4531_v37 = vpop.f32.mrf.mxu1 }
 0x616   :  { %v4462_v29 = vpop.f32.mrf.mxu0  ;;  %v4533_v34 = vpop.f32.mrf.mxu1 }
 0x617   :  { %v4540_v35 = vcombine.low %v4460_v20, %v4462_v29  ;;  %v4541_v12 = vcombine.low %v4531_v37, %v4533_v34 }
 0x619   :  { %v4548_v30 = vrot.slane %v4540_v35, %v8863_v8  ;;  %v4555_v9 = vrot.slane %v4541_v12, %v8863_v8 }
 0x61b   :  { %v4556_v26 = vcombine.low %v4548_v30, %v4555_v9  ;;  %v4557_v0 = vcombine.high %v4548_v30, %v4555_v9 }
 0x61d   :  { %v4564_v47 = vrot.slane %v4556_v26, %v8863_v8  ;;  %v4571_v57 = vrot.slane %v4557_v0, %v8863_v8 }
 0x61f   :  { %v4572_v36 = vcombine.high %v4564_v47, %v4564_v47  ;;  %v4573_v41 = vcombine.high %v4571_v57, %v4571_v57  ;;  %v4578_v40 = vadd.f32 %v4564_v47, %v4358_v4  ;;  %v4579_v24 = vadd.f32 %v4571_v57, %v4360_v42 }
 0x621   :  { %v4580_v20 = vadd.f32 %v4572_v36, %v4362_v38  ;;  %v4581_v37 = vadd.f32 %v4573_v41, %v4364_v2  ;;  %v7045_v29 = vmul.f32 -1.442695, %v4578_v40  ;;  %v7046_v34 = vmul.f32 -1.442695, %v4579_v24 }
 0x622   :  { %v4610_v35 = vrot.slane %v4578_v40, 1  ;;  %v4611_v12 = vrot.slane %v4579_v24, 1  ;;  %v4642_v57 = vrot.slane %v4578_v40, 2  ;;  %v4654_v4 = vrot.slane %v4578_v40, 3 }
 0x623   :  { %7627 = vpow2.f32 %v7045_v29  ;;  %v7047_v30 = vmul.f32 -1.442695, %v4580_v20  ;;  %v7048_v9 = vmul.f32 -1.442695, %v4581_v37  ;;  %v4612_v26 = vrot.slane %v4580_v20, 1 }
 0x624   :  { %7629 = vpow2.f32 %v7046_v34  ;;  %v4613_v0 = vrot.slane %v4581_v37, 1  ;;  %v7049_v44 = vmul.f32 -1.442695, %v4610_v35  ;;  %v7050_v33 = vmul.f32 -1.442695, %v4611_v12 }
 0x625   :  { %7631 = vpow2.f32 %v7047_v30  ;;  %v7051_v28 = vmul.f32 -1.442695, %v4612_v26  ;;  %v4643_v2 = vrot.slane %v4579_v24, 2  ;;  %v4655_v42 = vrot.slane %v4579_v24, 3 }
 0x626   :  { %7633 = vpow2.f32 %v7048_v9  ;;  %v7052_v47 = vmul.f32 -1.442695, %v4613_v0  ;;  %v4644_v36 = vrot.slane %v4580_v20, 2  ;;  %v4656_v41 = vrot.slane %v4580_v20, 3 }
 0x627   :  { %7635 = vpow2.f32 %v7049_v44  ;;  %v4645_v38 = vrot.slane %v4581_v37, 2  ;;  %v4657_v29 = vrot.slane %v4581_v37, 3  ;;  %v7053_v34 = vmul.f32 -1.442695, %v4654_v4 }
 0x628   :  { %7637 = vpow2.f32 %v7050_v33  ;;  %v7054_v35 = vmul.f32 -1.442695, %v4655_v42  ;;  %v7055_v12 = vmul.f32 -1.442695, %v4656_v41 }
 0x629   :  { %7639 = vpow2.f32 %v7051_v28  ;;  %v7056_v30 = vmul.f32 -1.442695, %v4657_v29 }
 0x62a   :  { %7641 = vpow2.f32 %v7052_v47 }
 0x62b   :  { %7643 = vtanh.f32 %v4642_v57 }
 0x62c   :  { %7645 = vtanh.f32 %v4643_v2 }
 0x62d   :  { %7647 = vtanh.f32 %v4644_v36 }
 0x62e   :  { %7649 = vtanh.f32 %v4645_v38 }
 0x62f   :  { %7651 = vpow2.f32 %v7053_v34 }
 0x630   :  { %v7628_v44 = vpop.eup %7627  ;;  %7653 = vpow2.f32 %v7054_v35 }
 0x631   :  { %v7630_v33 = vpop.eup %7629  ;;  %v4594_v40 = vadd.f32 1.0, %v7628_v44  ;;  %7655 = vpow2.f32 %v7055_v12 }
 0x632   :  { %v7632_v28 = vpop.eup %7631  ;;  %v4595_v24 = vadd.f32 1.0, %v7630_v33  ;;  %7657 = vpow2.f32 %v7056_v30 }
 0x633   :  { %v7634_v20 = vpop.eup %7633  ;;  %v4596_v9 = vadd.f32 1.0, %v7632_v28  ;;  %7659 = vrcp.f32 %v4594_v40 }
 0x634   :  { %v7636_v37 = vpop.eup %7635  ;;  %v4597_v26 = vadd.f32 1.0, %v7634_v20  ;;  %7661 = vrcp.f32 %v4595_v24 }
 0x635   :  { %v7638_v0 = vpop.eup %7637  ;;  %7663 = vrcp.f32 %v4596_v9  ;;  %v4630_v47 = vadd.f32 1.0, %v7636_v37 }
 0x636   :  { %v7640_v57 = vpop.eup %7639  ;;  %7665 = vrcp.f32 %v4597_v26  ;;  %v4631_v4 = vadd.f32 1.0, %v7638_v0 }
 0x637   :  { %v7642_v2 = vpop.eup %7641  ;;  %v4632_v42 = vadd.f32 1.0, %v7640_v57  ;;  %7667 = vrcp.f32 %v4630_v47 }
 0x638   :  { %v7644_v36 = vpop.eup %7643  ;;  %v4633_v41 = vadd.f32 1.0, %v7642_v2  ;;  %7669 = vrcp.f32 %v4631_v4 }
 0x639   :  { %v7646_v38 = vpop.eup %7645  ;;  %7671 = vrcp.f32 %v4632_v42 }
 0x63a   :  { %v7648_v29 = vpop.eup %7647  ;;  %7673 = vrcp.f32 %v4633_v41 }
 0x63b   :  { %v7650_v34 = vpop.eup %7649 }
 0x63c   :  { %v7652_v35 = vpop.eup %7651 }
 0x63d   :  { %v7654_v12 = vpop.eup %7653  ;;  %v4674_v28 = vadd.f32 1.0, %v7652_v35 }
 0x63e   :  { %v7656_v30 = vpop.eup %7655  ;;  %v4675_v20 = vadd.f32 1.0, %v7654_v12 }
 0x63f   :  { %v7658_v44 = vpop.eup %7657  ;;  %v4676_v37 = vadd.f32 1.0, %v7656_v30  ;;  %7675 = vrcp.f32 %v4674_v28 }
 0x640   :  { %v7660_v33 = vpop.eup %7659  ;;  %v4677_v0 = vadd.f32 1.0, %v7658_v44  ;;  %7677 = vrcp.f32 %v4675_v20 }
 0x641   :  { %v7662_v40 = vpop.eup %7661  ;;  %v4690_v57 = vmul.f32 %v7660_v33, %v7644_v36  ;;  %7679 = vrcp.f32 %v4676_v37 }
 0x642   :  { %v7664_v24 = vpop.eup %7663  ;;  %v4691_v42 = vmul.f32 %v7662_v40, %v7646_v38  ;;  %7681 = vrcp.f32 %v4677_v0 }
 0x643   :  { %v7666_v9 = vpop.eup %7665  ;;  %v4692_v58 = vmul.f32 %v7664_v24, %v7648_v29 }
 0x644   :  { %v7668_v26 = vpop.eup %7667  ;;  %v4693_v30 = vmul.f32 %v7666_v9, %v7650_v34 }
 0x645   :  { %v7670_v47 = vpop.eup %7669  ;;  %v4686_v4 = vmul.f32 %v7668_v26, %v9180_v54 }
 0x646   :  { %v7672_v2 = vpop.eup %7671  ;;  %v4687_v41 = vmul.f32 %v7670_v47, %v9183_v6 }
 0x647   :  { %v7674_v16 = vpop.eup %7673  ;;  %v4688_v35 = vmul.f32 %v7672_v2, %v9185_v60  ;;  %v9269_v12 = vadd.f32 %v4690_v57, %v4686_v4  ;;  %v9285_v4 = vld [vmem:[#allocation12 + $0x1e0] sm:$0xff]  ;;  %v9288_v2 = vld [vmem:[#allocation12 + $0x1f0] sm:$0xff] }
 0x648   :  { %v4689_v44 = vmul.f32 %v7674_v16, %v9188_v25  ;;  %v9272_v28 = vadd.f32 %v4691_v42, %v4687_v41  ;;  %v9291_v42 = vld [vmem:[#allocation12 + $0x1c8] sm:$0xff]  ;;  %v9294_v41 = vld [vmem:[#allocation12 + $0x1d8] sm:$0xff] }
 0x649   :  { %v9274_v36 = vadd.f32 %v4692_v58, %v4688_v35  ;;  %7683 = vtanh.f32 %v9269_v12  ;;  %v9297_v35 = vld [vmem:[#allocation12 + $0x1c0] sm:$0xff] }
 0x64a   :  { %v9277_v54 = vadd.f32 %v4693_v30, %v4689_v44  ;;  %7685 = vtanh.f32 %v9272_v28  ;;  %v9300_v30 = vld [vmem:[#allocation12 + $0x1d0] sm:$0xff]  ;;  %v9303_v44 = vld [vmem:[#allocation12 + $0x1a8] sm:$0xff] }
 0x64b   :  { %7687 = vtanh.f32 %v9274_v36 }
 0x64c   :  { %7689 = vtanh.f32 %v9277_v54  ;;  %v7676_v6 = vpop.eup %7675 }
 0x64d   :  { %v7678_v60 = vpop.eup %7677 }
 0x64e   :  { %v7680_v38 = vpop.eup %7679 }
 0x64f   :  { %v7682_v29 = vpop.eup %7681 }
 0x656   :  { %v7684_v34 = vpop.eup %7683 }
 0x657   :  { %v7686_v25 = vpop.eup %7685  ;;  %v4702_v16 = vmul.f32 %v7684_v34, %v7676_v6  ;;  %v9306_v6 = vld [vmem:[#allocation12 + $0x1b8] sm:$0xff] }
 0x658   :  { %v7688_v33 = vpop.eup %7687  ;;  %v4703_v58 = vmul.f32 %v7686_v25, %v7678_v60  ;;  %v9309_v60 = vld [vmem:[#allocation12 + $0x1a0] sm:$0xff]  ;;  %v9318_v34 = vld [vmem:[#allocation12 + $0x198] sm:$0xff] }
 0x659   :  { %v7690_v40 = vpop.eup %7689  ;;  %v4704_v24 = vmul.f32 %v7688_v33, %v7680_v38  ;;  %v9312_v38 = vld [vmem:[#allocation12 + $0x1b0] sm:$0xff]  ;;  %v9321_v25 = vld [vmem:[#allocation12 + $0x180] sm:$0xff]  ;;  %v9327_v33 = vld [vmem:[#allocation12 + $0x168] sm:$0xff] }
 0x65a   :  { %v4705_v20 = vmul.f32 %v7690_v40, %v7682_v29  ;;  %v4718_v9 = vcombine.low %v4702_v16, %v4703_v58  ;;  %v9315_v29 = vld [vmem:[#allocation12 + $0x188] sm:$0xff]  ;;  %v9324_v16 = vld [vmem:[#allocation12 + $0x190] sm:$0xff]  ;;  %v9330_v58 = vld [vmem:[#allocation12 + $0x178] sm:$0xff] }
 0x65b   :  { %v9333_v40 = vld [vmem:[#allocation12 + $0x160] sm:$0xff] }
 0x65c   :  { %v4719_v37 = vcombine.low %v4704_v24, %v4705_v20  ;;  %v4726_v26 = vrot.slane %v4718_v9, %v8863_v8  ;;  %v9336_v24 = vld [vmem:[#allocation12 + $0x170] sm:$0xff]  ;;  %v9339_v20 = vld [vmem:[#allocation12 + $0x148] sm:$0xff]  ;;  %v9342_v9 = vld [vmem:[#allocation12 + $0x158] sm:$0xff] }
 0x65e   :  { %v4733_v0 = vrot.slane %v4719_v37, %v8863_v8  ;;  %v9345_v37 = vld [vmem:[#allocation12 + $0x140] sm:$0xff] }
 0x660   :  { %v4734_v47 = vcombine.low %v4726_v26, %v4733_v0  ;;  %v9348_v26 = vld [vmem:[#allocation12 + $0x150] sm:$0xff]  ;;  %v9351_v0 = vld [vmem:[#allocation12 + $0x128] sm:$0xff] }
 0x662   :  { %v4741_v57 = vrot.slane %v4734_v47, %v8863_v8 }
 0x664   :  { %4808 = vmatmul.mubr.f32.vlgmr.msra.gmra.mxu0 %v4741_v57  ;;  %4879 = vmatmul.mubr.f32.vlgmr.msra.gmra.mxu1 %v4741_v57 }
 0x665   :  { %5093 = vmatpush1.msra.mxu0 %v9285_v4  ;;  %5164 = vmatpush1.msra.mxu1 %v9288_v2 }
 0x666   :  { %5094 = vmatprep.subr.mxu0 %v9291_v42  ;;  %5165 = vmatprep.subr.mxu1 %v9294_v41 }
 0x667   :  { %5095 = vmatpush1.msra.mxu0 %v9297_v35  ;;  %5166 = vmatpush1.msra.mxu1 %v9300_v30 }
 0x668   :  { %5096 = vmatprep.subr.mxu0 %v9303_v44  ;;  %5167 = vmatprep.subr.mxu1 %v9306_v6 }
 0x669   :  { %5097 = vmatpush1.msra.mxu0 %v9309_v60  ;;  %5168 = vmatpush1.msra.mxu1 %v9312_v38 }
 0x66a   :  { %5098 = vmatprep.subr.mxu0 %v9315_v29  ;;  %5169 = vmatprep.subr.mxu1 %v9318_v34 }
 0x66b   :  { %5099 = vmatpush1.msra.mxu0 %v9321_v25  ;;  %5170 = vmatpush1.msra.mxu1 %v9324_v16 }
 0x66c   :  { %5100 = vmatprep.subr.mxu0 %v9327_v33  ;;  %5171 = vmatprep.subr.mxu1 %v9330_v58 }
 0x66d   :  { %5101 = vmatpush1.msra.mxu0 %v9333_v40  ;;  %5172 = vmatpush1.msra.mxu1 %v9336_v24 }
 0x66e   :  { %5102 = vmatprep.subr.mxu0 %v9339_v20  ;;  %5173 = vmatprep.subr.mxu1 %v9342_v9 }
 0x66f   :  { %5103 = vmatpush1.msra.mxu0 %v9345_v37  ;;  %5174 = vmatpush1.msra.mxu1 %v9348_v26 }
 0x670   :  { %5104 = vmatprep.subr.mxu0 %v9351_v0  ;;  %5175 = vmatprep.subr.mxu1 %v9052_v59  ;;  %v9989_v59 = vld [vmem:[#allocation55_spill] sm:$0xff] }
 0x671   :  { %5105 = vmatpush1.msra.mxu0 %v9055_v17  ;;  %5176 = vmatpush1.msra.mxu1 %v9058_v21  ;;  %v9990_v17 = vld [vmem:[#allocation56_spill] sm:$0xff]  ;;  %v9991_v21 = vld [vmem:[#allocation57_spill] sm:$0xff] }
 0x672   :  { %5106 = vmatprep.subr.mxu0 %v9061_v61  ;;  %5177 = vmatprep.subr.mxu1 %v9064_v48  ;;  %v9992_v61 = vld [vmem:[#allocation58_spill] sm:$0xff]  ;;  %v9993_v48 = vmov 0.0  }
 0x673   :  { %5107 = vmatpush1.msra.mxu0 %v9067_v15  ;;  %5178 = vmatpush1.msra.mxu1 %v9070_v22  ;;  %v9994_v15 = vld [vmem:[#allocation59_spill] sm:$0xff]  ;;  %v9395_v22 = vld [vmem:[#allocation12 + $0x1e8] sm:$0xff] }
 0x674   :  { %5108 = vmatprep.subr.mxu0 %v9073_v56  ;;  %5179 = vmatprep.subr.mxu1 %v9076_v18  ;;  %v9398_v56 = vld [vmem:[#allocation12 + $0x1f8] sm:$0xff] }
 0x675   :  { %5109 = vmatpush1.msra.mxu0 %v9079_v45  ;;  %5180 = vmatpush1.msra.mxu1 %v9082_v50 }
 0x676   :  { %5110 = vmatprep.subr.mxu0 %v9958_v46  ;;  %5181 = vmatprep.subr.mxu1 %v9959_v27 }
 0x677   :  { %5111 = vmatpush1.msra.mxu0 %v9960_v51  ;;  %5182 = vmatpush1.msra.mxu1 %v9961_v55 }
 0x678   :  { %5112 = vmatprep.subr.mxu0 %v9962_v3  ;;  %5183 = vmatprep.subr.mxu1 %v9963_v49 }
 0x679   :  { %5113 = vmatpush1.msra.mxu0 %v9964_v52  ;;  %5184 = vmatpush1.msra.mxu1 %v9965_v1 }
 0x67a   :  { %5114 = vmatprep.subr.mxu0 %v9966_v53  ;;  %5185 = vmatprep.subr.mxu1 %v9967_v7  ;;  %v4707_v7 = vld [vmem:[#allocation2 + $0x3] ss:$8 sm:$0xf] }
 0x67b   :  { %5115 = vmatpush1.msra.mxu0 %v9968_v31  ;;  %5186 = vmatpush1.msra.mxu1 %v9969_v10  ;;  %v4709_v31 = vld [vmem:[#allocation2 + $0x23] ss:$8 sm:$0xf] }
 0x67c   :  { %5116 = vmatprep.subr.mxu0 %v9970_v62  ;;  %5187 = vmatprep.subr.mxu1 %v9971_v23 }
 0x67d   :  { %5117 = vmatpush1.msra.mxu0 %v9972_v32  ;;  %5188 = vmatpush1.msra.mxu1 %v9973_v43  ;;  %v4711_v43 = vld [vmem:[#allocation2 + $0x43] ss:$8 sm:$0xf] }
 0x67e   :  { %5118 = vmatprep.subr.mxu0 %v9974_v5  ;;  %5189 = vmatprep.subr.mxu1 %v9975_v19  ;;  %v4713_v5 = vld [vmem:[#allocation2 + $0x63] ss:$8 sm:$0xf] }
 0x67f   :  { %5119 = vmatpush1.msra.mxu0 %v9976_v14  ;;  %5190 = vmatpush1.msra.mxu1 %v9977_v13 }
 0x680   :  { %5120 = vmatprep.subr.mxu0 %v9978_v11  ;;  %5191 = vmatprep.subr.mxu1 %v9979_v63 }
 0x681   :  { %5121 = vmatpush1.msra.mxu0 %v9980_v39  ;;  %5192 = vmatpush1.msra.mxu1 %v9989_v59 }
 0x682   :  { %5122 = vmatprep.subr.mxu0 %v9990_v17  ;;  %5193 = vmatprep.subr.mxu1 %v9991_v21 }
 0x683   :  { %5123 = vmatpush1.msra.mxu0 %v9992_v61  ;;  %5156 = vmatprep.mubr.f32.mxu0 %v9993_v48 }
 0x684   :  { %5194 = vmatpush1.msra.mxu1 %v9994_v15  ;;  %5227 = vmatprep.mubr.f32.mxu1 %v9993_v48 }
 0x685   :  { %5441 = vmatprep.subr.mxu0 %v9395_v22  ;;  %5512 = vmatprep.subr.mxu1 %v9398_v56 }
 0x724   :  { %v4809_v18 = vpop.f32.mrf.mxu0  ;;  %v4880_v45 = vpop.f32.mrf.mxu1 }
 0x726   :  { %v4811_v50 = vpop.f32.mrf.mxu0  ;;  %v4882_v46 = vpop.f32.mrf.mxu1 }
 0x727   :  { %v4889_v27 = vcombine.low %v4809_v18, %v4811_v50  ;;  %v4890_v51 = vcombine.low %v4880_v45, %v4882_v46 }
 0x729   :  { %v4897_v55 = vrot.slane %v4889_v27, %v8863_v8  ;;  %v4904_v3 = vrot.slane %v4890_v51, %v8863_v8 }
 0x72b   :  { %v4905_v49 = vcombine.low %v4897_v55, %v4904_v3  ;;  %v4906_v52 = vcombine.high %v4897_v55, %v4904_v3 }
 0x72d   :  { %v4913_v1 = vrot.slane %v4905_v49, %v8863_v8  ;;  %v4920_v53 = vrot.slane %v4906_v52, %v8863_v8 }
 0x72f   :  { %v4921_v10 = vcombine.high %v4913_v1, %v4913_v1  ;;  %v4922_v62 = vcombine.high %v4920_v53, %v4920_v53  ;;  %v4927_v23 = vadd.f32 %v4913_v1, %v4707_v7  ;;  %v4928_v32 = vadd.f32 %v4920_v53, %v4709_v31 }
 0x731   :  { %v4929_v19 = vadd.f32 %v4921_v10, %v4711_v43  ;;  %v4930_v14 = vadd.f32 %v4922_v62, %v4713_v5  ;;  %v7057_v13 = vmul.f32 -1.442695, %v4927_v23  ;;  %v7058_v11 = vmul.f32 -1.442695, %v4928_v32 }
 0x732   :  { %v4959_v63 = vrot.slane %v4927_v23, 1  ;;  %v4960_v39 = vrot.slane %v4928_v32, 1  ;;  %v4991_v45 = vrot.slane %v4927_v23, 2  ;;  %v5003_v50 = vrot.slane %v4927_v23, 3 }
 0x733   :  { %7691 = vpow2.f32 %v7057_v13  ;;  %v7059_v47 = vmul.f32 -1.442695, %v4929_v19  ;;  %v7060_v57 = vmul.f32 -1.442695, %v4930_v14  ;;  %v4961_v59 = vrot.slane %v4929_v19, 1 }
 0x734   :  { %7693 = vpow2.f32 %v7058_v11  ;;  %v4962_v17 = vrot.slane %v4930_v14, 1  ;;  %v7061_v21 = vmul.f32 -1.442695, %v4959_v63  ;;  %v7062_v61 = vmul.f32 -1.442695, %v4960_v39 }
 0x735   :  { %7695 = vpow2.f32 %v7059_v47  ;;  %v7063_v15 = vmul.f32 -1.442695, %v4961_v59  ;;  %v4992_v46 = vrot.slane %v4928_v32, 2  ;;  %v5004_v27 = vrot.slane %v4928_v32, 3 }
 0x736   :  { %7697 = vpow2.f32 %v7060_v57  ;;  %v7064_v18 = vmul.f32 -1.442695, %v4962_v17  ;;  %v4993_v51 = vrot.slane %v4929_v19, 2  ;;  %v5005_v55 = vrot.slane %v4929_v19, 3 }
 0x737   :  { %7699 = vpow2.f32 %v7061_v21  ;;  %v4994_v3 = vrot.slane %v4930_v14, 2  ;;  %v5006_v49 = vrot.slane %v4930_v14, 3  ;;  %v7065_v52 = vmul.f32 -1.442695, %v5003_v50 }
 0x738   :  { %7701 = vpow2.f32 %v7062_v61  ;;  %v7066_v1 = vmul.f32 -1.442695, %v5004_v27  ;;  %v7067_v53 = vmul.f32 -1.442695, %v5005_v55 }
 0x739   :  { %7703 = vpow2.f32 %v7063_v15  ;;  %v7068_v7 = vmul.f32 -1.442695, %v5006_v49 }
 0x73a   :  { %7705 = vpow2.f32 %v7064_v18 }
 0x73b   :  { %7707 = vtanh.f32 %v4991_v45 }
 0x73c   :  { %7709 = vtanh.f32 %v4992_v46 }
 0x73d   :  { %7711 = vtanh.f32 %v4993_v51 }
 0x73e   :  { %7713 = vtanh.f32 %v4994_v3 }
 0x73f   :  { %7715 = vpow2.f32 %v7065_v52 }
 0x740   :  { %v7692_v31 = vpop.eup %7691  ;;  %7717 = vpow2.f32 %v7066_v1 }
 0x741   :  { %v7694_v10 = vpop.eup %7693  ;;  %v4943_v62 = vadd.f32 1.0, %v7692_v31  ;;  %7719 = vpow2.f32 %v7067_v53 }
 0x742   :  { %v7696_v23 = vpop.eup %7695  ;;  %v4944_v32 = vadd.f32 1.0, %v7694_v10  ;;  %7721 = vpow2.f32 %v7068_v7 }
 0x743   :  { %v7698_v43 = vpop.eup %7697  ;;  %v4945_v5 = vadd.f32 1.0, %v7696_v23  ;;  %7723 = vrcp.f32 %v4943_v62 }
 0x744   :  { %v7700_v19 = vpop.eup %7699  ;;  %v4946_v14 = vadd.f32 1.0, %v7698_v43  ;;  %7725 = vrcp.f32 %v4944_v32 }
 0x745   :  { %v7702_v13 = vpop.eup %7701  ;;  %7727 = vrcp.f32 %v4945_v5  ;;  %v4979_v11 = vadd.f32 1.0, %v7700_v19 }
 0x746   :  { %v7704_v63 = vpop.eup %7703  ;;  %7729 = vrcp.f32 %v4946_v14  ;;  %v4980_v39 = vadd.f32 1.0, %v7702_v13 }
 0x747   :  { %v7706_v47 = vpop.eup %7705  ;;  %v4981_v57 = vadd.f32 1.0, %v7704_v63  ;;  %7731 = vrcp.f32 %v4979_v11 }
 0x748   :  { %v7708_v59 = vpop.eup %7707  ;;  %v4982_v17 = vadd.f32 1.0, %v7706_v47  ;;  %7733 = vrcp.f32 %v4980_v39 }
 0x749   :  { %v7710_v21 = vpop.eup %7709  ;;  %7735 = vrcp.f32 %v4981_v57 }
 0x74a   :  { %v7712_v61 = vpop.eup %7711  ;;  %7737 = vrcp.f32 %v4982_v17 }
 0x74b   :  { %v7714_v15 = vpop.eup %7713 }
 0x74c   :  { %v7716_v18 = vpop.eup %7715 }
 0x74d   :  { %v7718_v45 = vpop.eup %7717  ;;  %v5023_v55 = vadd.f32 1.0, %v7716_v18 }
 0x74e   :  { %v7720_v50 = vpop.eup %7719  ;;  %v5024_v49 = vadd.f32 1.0, %v7718_v45 }
 0x74f   :  { %v7722_v46 = vpop.eup %7721  ;;  %v5025_v1 = vadd.f32 1.0, %v7720_v50  ;;  %7739 = vrcp.f32 %v5023_v55 }
 0x750   :  { %v7724_v27 = vpop.eup %7723  ;;  %v5026_v7 = vadd.f32 1.0, %v7722_v46  ;;  %7741 = vrcp.f32 %v5024_v49 }
 0x751   :  { %v7726_v51 = vpop.eup %7725  ;;  %v5039_v10 = vmul.f32 %v7724_v27, %v7708_v59  ;;  %7743 = vrcp.f32 %v5025_v1  ;;  %v9450_v1 = vld [vmem:[#allocation12 + $0x120] sm:$0xff] }
 0x752   :  { %v7728_v3 = vpop.eup %7727  ;;  %v5040_v32 = vmul.f32 %v7726_v51, %v7710_v21  ;;  %7745 = vrcp.f32 %v5026_v7  ;;  %v9456_v7 = vld [vmem:[#allocation12 + $0x108] sm:$0xff] }
 0x753   :  { %v7730_v52 = vpop.eup %7729  ;;  %v5041_v19 = vmul.f32 %v7728_v3, %v7712_v61 }
 0x754   :  { %v7732_v53 = vpop.eup %7731  ;;  %v5042_v11 = vmul.f32 %v7730_v52, %v7714_v15  ;;  %v9447_v52 = vld [vmem:[#allocation12 + $0x138] sm:$0xff] }
 0x755   :  { %v7734_v31 = vpop.eup %7733  ;;  %v5035_v62 = vmul.f32 %v7732_v53, %v9269_v12  ;;  %v9453_v53 = vld [vmem:[#allocation12 + $0x130] sm:$0xff] }
 0x756   :  { %v7736_v23 = vpop.eup %7735  ;;  %v5036_v43 = vmul.f32 %v7734_v31, %v9272_v28  ;;  %v9459_v31 = vld [vmem:[#allocation12 + $0x118] sm:$0xff] }
 0x757   :  { %v7738_v5 = vpop.eup %7737  ;;  %v5037_v14 = vmul.f32 %v7736_v23, %v9274_v36  ;;  %v9408_v13 = vadd.f32 %v5039_v10, %v5035_v62  ;;  %v9462_v10 = vld [vmem:[#allocation12 + $0x100] sm:$0xff]  ;;  %v9465_v62 = vld [vmem:[#allocation12 + $0x110] sm:$0xff]  ;;  %v9468_v23 = vld [vmem:[#allocation12 + $0xe8] sm:$0xff] }
 0x758   :  { %v5038_v63 = vmul.f32 %v7738_v5, %v9277_v54  ;;  %v9411_v39 = vadd.f32 %v5040_v32, %v5036_v43  ;;  %v9471_v32 = vld [vmem:[#allocation12 + $0xf8] sm:$0xff]  ;;  %v9474_v43 = vld [vmem:[#allocation12 + $0xe0] sm:$0xff]  ;;  %v9477_v5 = vld [vmem:[#allocation12 + $0xf0] sm:$0xff] }
 0x759   :  { %v9413_v47 = vadd.f32 %v5041_v19, %v5037_v14  ;;  %7747 = vtanh.f32 %v9408_v13  ;;  %v9480_v19 = vld [vmem:[#allocation12 + $0xc8] sm:$0xff]  ;;  %v9483_v14 = vld [vmem:[#allocation12 + $0xd8] sm:$0xff] }
 0x75a   :  { %v9416_v12 = vadd.f32 %v5042_v11, %v5038_v63  ;;  %7749 = vtanh.f32 %v9411_v39  ;;  %9995 = vst [vmem:[#allocation32_spill] sm:$0xff] %v9480_v19  ;;  %9996 = vst [vmem:[#allocation33_spill] sm:$0xff] %v9483_v14  ;;  %v9486_v11 = vld [vmem:[#allocation12 + $0xc0] sm:$0xff]  ;;  %v9489_v63 = vld [vmem:[#allocation12 + $0xd0] sm:$0xff] }
 0x75b   :  { %7751 = vtanh.f32 %v9413_v47  ;;  %9997 = vst [vmem:[#allocation34_spill] sm:$0xff] %v9486_v11  ;;  %9998 = vst [vmem:[#allocation35_spill] sm:$0xff] %v9489_v63 }
 0x75c   :  { %7753 = vtanh.f32 %v9416_v12  ;;  %v7740_v28 = vpop.eup %7739 }
 0x75d   :  { %v7742_v36 = vpop.eup %7741 }
 0x75e   :  { %v7744_v57 = vpop.eup %7743 }
 0x75f   :  { %v7746_v59 = vpop.eup %7745 }
 0x766   :  { %v7748_v17 = vpop.eup %7747 }
 0x767   :  { %v7750_v54 = vpop.eup %7749  ;;  %v5051_v21 = vmul.f32 %v7748_v17, %v7740_v28  ;;  %v9492_v28 = vld [vmem:[#allocation12 + $0xa8] sm:$0xff] }
 0x768   :  { %v7752_v61 = vpop.eup %7751  ;;  %v5052_v15 = vmul.f32 %v7750_v54, %v7742_v36  ;;  %9999 = vst [vmem:[#allocation36_spill] sm:$0xff] %v9492_v28  ;;  %v9495_v36 = vld [vmem:[#allocation12 + $0xb8] sm:$0xff]  ;;  %v9504_v17 = vld [vmem:[#allocation12 + $0x88] sm:$0xff] }
 0x769   :  { %v7754_v18 = vpop.eup %7753  ;;  %v5053_v45 = vmul.f32 %v7752_v61, %v7744_v57  ;;  %10000 = vst [vmem:[#allocation37_spill] sm:$0xff] %v9495_v36  ;;  %v9498_v57 = vld [vmem:[#allocation12 + $0xa0] sm:$0xff]  ;;  %10003 = vst [vmem:[#allocation40_spill] sm:$0xff] %v9504_v17  ;;  %v9507_v54 = vld [vmem:[#allocation12 + $0x98] sm:$0xff] }
 0x76a   :  { %v5054_v50 = vmul.f32 %v7754_v18, %v7746_v59  ;;  %v5067_v46 = vcombine.low %v5051_v21, %v5052_v15  ;;  %10001 = vst [vmem:[#allocation38_spill] sm:$0xff] %v9498_v57  ;;  %v9501_v59 = vld [vmem:[#allocation12 + $0xb0] sm:$0xff]  ;;  %10004 = vst [vmem:[#allocation41_spill] sm:$0xff] %v9507_v54  ;;  %v9510_v21 = vld [vmem:[#allocation12 + $0x80] sm:$0xff] }
 0x76b   :  { %10002 = vst [vmem:[#allocation39_spill] sm:$0xff] %v9501_v59  ;;  %10005 = vst [vmem:[#allocation42_spill] sm:$0xff] %v9510_v21  ;;  %v9513_v61 = vld [vmem:[#allocation12 + $0x90] sm:$0xff]  ;;  %v9516_v15 = vld [vmem:[#allocation12 + $0x68] sm:$0xff] }
 0x76c   :  { %v5068_v27 = vcombine.low %v5053_v45, %v5054_v50  ;;  %v5075_v51 = vrot.slane %v5067_v46, %v8863_v8  ;;  %10006 = vst [vmem:[#allocation43_spill] sm:$0xff] %v9513_v61  ;;  %10007 = vst [vmem:[#allocation44_spill] sm:$0xff] %v9516_v15  ;;  %v9519_v18 = vld [vmem:[#allocation12 + $0x78] sm:$0xff]  ;;  %v9522_v45 = vld [vmem:[#allocation12 + $0x60] sm:$0xff] }
 0x76d   :  { %10008 = vst [vmem:[#allocation45_spill] sm:$0xff] %v9519_v18  ;;  %10009 = vst [vmem:[#allocation46_spill] sm:$0xff] %v9522_v45  ;;  %v9525_v50 = vld [vmem:[#allocation12 + $0x70] sm:$0xff]  ;;  %v9528_v46 = vld [vmem:[#allocation12 + $0x48] sm:$0xff] }
 0x76e   :  { %v5082_v55 = vrot.slane %v5068_v27, %v8863_v8  ;;  %10010 = vst [vmem:[#allocation47_spill] sm:$0xff] %v9525_v50  ;;  %10011 = vst [vmem:[#allocation48_spill] sm:$0xff] %v9528_v46  ;;  %v9531_v27 = vld [vmem:[#allocation12 + $0x58] sm:$0xff] }
 0x76f   :  { %10012 = vst [vmem:[#allocation49_spill] sm:$0xff] %v9531_v27 }
 0x770   :  { %v5083_v3 = vcombine.low %v5075_v51, %v5082_v55  ;;  %v9534_v51 = vld [vmem:[#allocation12 + $0x40] sm:$0xff]  ;;  %v9537_v55 = vld [vmem:[#allocation12 + $0x50] sm:$0xff] }
 0x771   :  { %10013 = vst [vmem:[#allocation50_spill] sm:$0xff] %v9534_v51  ;;  %10014 = vst [vmem:[#allocation51_spill] sm:$0xff] %v9537_v55 }
 0x772   :  { %v5090_v49 = vrot.slane %v5083_v3, %v8863_v8  ;;  %v9540_v3 = vld [vmem:[#allocation12 + $0x28] sm:$0xff] }
 0x773   :  { %10015 = vst [vmem:[#allocation52_spill] sm:$0xff] %v9540_v3 }
 0x774   :  { %5157 = vmatmul.mubr.f32.vlgmr.msra.gmra.mxu0 %v5090_v49  ;;  %5228 = vmatmul.mubr.f32.vlgmr.msra.gmra.mxu1 %v5090_v49  ;;  %v9543_v49 = vld [vmem:[#allocation12 + $0x38] sm:$0xff] }
 0x775   :  { %5442 = vmatpush1.msra.mxu0 %v9285_v4  ;;  %5513 = vmatpush1.msra.mxu1 %v9288_v2  ;;  %10016 = vst [vmem:[#allocation53_spill] sm:$0xff] %v9543_v49 }
 0x776   :  { %5443 = vmatprep.subr.mxu0 %v9291_v42  ;;  %5514 = vmatprep.subr.mxu1 %v9294_v41 }
 0x777   :  { %5444 = vmatpush1.msra.mxu0 %v9297_v35  ;;  %5515 = vmatpush1.msra.mxu1 %v9300_v30 }
 0x778   :  { %5445 = vmatprep.subr.mxu0 %v9303_v44  ;;  %5516 = vmatprep.subr.mxu1 %v9306_v6 }
 0x779   :  { %5446 = vmatpush1.msra.mxu0 %v9309_v60  ;;  %5517 = vmatpush1.msra.mxu1 %v9312_v38 }
 0x77a   :  { %5447 = vmatprep.subr.mxu0 %v9315_v29  ;;  %5518 = vmatprep.subr.mxu1 %v9318_v34 }
 0x77b   :  { %5448 = vmatpush1.msra.mxu0 %v9321_v25  ;;  %5519 = vmatpush1.msra.mxu1 %v9324_v16 }
 0x77c   :  { %5449 = vmatprep.subr.mxu0 %v9327_v33  ;;  %5520 = vmatprep.subr.mxu1 %v9330_v58 }
 0x77d   :  { %5450 = vmatpush1.msra.mxu0 %v9333_v40  ;;  %5521 = vmatpush1.msra.mxu1 %v9336_v24 }
 0x77e   :  { %5451 = vmatprep.subr.mxu0 %v9339_v20  ;;  %5522 = vmatprep.subr.mxu1 %v9342_v9 }
 0x77f   :  { %5452 = vmatpush1.msra.mxu0 %v9345_v37  ;;  %5523 = vmatpush1.msra.mxu1 %v9348_v26 }
 0x780   :  { %5453 = vmatprep.subr.mxu0 %v9351_v0  ;;  %5524 = vmatprep.subr.mxu1 %v9447_v52 }
 0x781   :  { %5454 = vmatpush1.msra.mxu0 %v9450_v1  ;;  %5525 = vmatpush1.msra.mxu1 %v9453_v53 }
 0x782   :  { %5455 = vmatprep.subr.mxu0 %v9456_v7  ;;  %5526 = vmatprep.subr.mxu1 %v9459_v31 }
 0x783   :  { %5456 = vmatpush1.msra.mxu0 %v9462_v10  ;;  %5527 = vmatpush1.msra.mxu1 %v9465_v62 }
 0x784   :  { %5457 = vmatprep.subr.mxu0 %v9468_v23  ;;  %5528 = vmatprep.subr.mxu1 %v9471_v32 }
 0x785   :  { %5458 = vmatpush1.msra.mxu0 %v9474_v43  ;;  %5529 = vmatpush1.msra.mxu1 %v9477_v5 }
 0x786   :  { %5459 = vmatprep.subr.mxu0 %v9480_v19  ;;  %5530 = vmatprep.subr.mxu1 %v9483_v14 }
 0x787   :  { %5460 = vmatpush1.msra.mxu0 %v9486_v11  ;;  %5531 = vmatpush1.msra.mxu1 %v9489_v63 }
 0x788   :  { %5461 = vmatprep.subr.mxu0 %v9492_v28  ;;  %5532 = vmatprep.subr.mxu1 %v9495_v36  ;;  %v5062_v28 = vld [vmem:[#allocation2 + $0x62] ss:$8 sm:$0xf] }
 0x789   :  { %5462 = vmatpush1.msra.mxu0 %v9498_v57  ;;  %5533 = vmatpush1.msra.mxu1 %v9501_v59  ;;  %v5060_v59 = vld [vmem:[#allocation2 + $0x42] ss:$8 sm:$0xf] }
 0x78a   :  { %5463 = vmatprep.subr.mxu0 %v9504_v17  ;;  %5534 = vmatprep.subr.mxu1 %v9507_v54 }
 0x78b   :  { %5464 = vmatpush1.msra.mxu0 %v9510_v21  ;;  %5535 = vmatpush1.msra.mxu1 %v9513_v61  ;;  %v5056_v61 = vld [vmem:[#allocation2 + $0x2] ss:$8 sm:$0xf] }
 0x78c   :  { %5465 = vmatprep.subr.mxu0 %v9516_v15  ;;  %5536 = vmatprep.subr.mxu1 %v9519_v18 }
 0x78d   :  { %5466 = vmatpush1.msra.mxu0 %v9522_v45  ;;  %5537 = vmatpush1.msra.mxu1 %v9525_v50 }
 0x78e   :  { %5467 = vmatprep.subr.mxu0 %v9528_v46  ;;  %5538 = vmatprep.subr.mxu1 %v9531_v27  ;;  %v9546_v46 = vld [vmem:[#allocation12 + $0x20] sm:$0xff]  ;;  %v9549_v27 = vld [vmem:[#allocation12 + $0x30] sm:$0xff] }
 0x78f   :  { %5468 = vmatpush1.msra.mxu0 %v9534_v51  ;;  %5539 = vmatpush1.msra.mxu1 %v9537_v55  ;;  %10017 = vst [vmem:[#allocation54_spill] sm:$0xff] %v9546_v46  ;;  %10018 = vst [vmem:[#allocation30_spill] sm:$0xff] %v9549_v27  ;;  %v9552_v51 = vld [vmem:[#allocation12 + $0x8] sm:$0xff]  ;;  %v9555_v55 = vld [vmem:[#allocation12 + $0x18] sm:$0xff] }
 0x790   :  { %5469 = vmatprep.subr.mxu0 %v9540_v3  ;;  %5540 = vmatprep.subr.mxu1 %v9543_v49  ;;  %10019 = vst [vmem:[#allocation31_spill] sm:$0xff] %v9552_v51  ;;  %10020 = vst [vmem:[#allocation55_spill] sm:$0xff] %v9555_v55  ;;  %v9558_v3 = vld [vmem:[#allocation12] sm:$0xff]  ;;  %v9562_v49 = vld [vmem:[#allocation12 + $0x10] sm:$0xff] }
 0x791   :  { %5470 = vmatpush1.msra.mxu0 %v9546_v46  ;;  %5541 = vmatpush1.msra.mxu1 %v9549_v27  ;;  %10021 = vst [vmem:[#allocation56_spill] sm:$0xff] %v9558_v3  ;;  %10022 = vst [vmem:[#allocation57_spill] sm:$0xff] %v9562_v49 }
 0x792   :  { %5471 = vmatprep.subr.mxu0 %v9552_v51  ;;  %5542 = vmatprep.subr.mxu1 %v9555_v55 }
 0x793   :  { %5472 = vmatpush1.msra.mxu0 %v9558_v3  ;;  %5505 = vmatprep.mubr.f32.mxu0 %v9993_v48 }
 0x794   :  { %5543 = vmatpush1.msra.mxu1 %v9562_v49  ;;  %5576 = vmatprep.mubr.f32.mxu1 %v9993_v48 }
 0x795   :  { %5860 = vmatprep.subr.mxu1 %v9398_v56  ;;  %5789 = vmatprep.subr.mxu0 %v9395_v22  ;;  %v5058_v56 = vld [vmem:[#allocation2 + $0x22] ss:$8 sm:$0xf] }
 0x834   :  { %v5158_v51 = vpop.f32.mrf.mxu0  ;;  %v5229_v46 = vpop.f32.mrf.mxu1 }
 0x836   :  { %v5160_v27 = vpop.f32.mrf.mxu0  ;;  %v5231_v55 = vpop.f32.mrf.mxu1 }
 0x837   :  { %v5238_v45 = vcombine.low %v5158_v51, %v5160_v27  ;;  %v5239_v50 = vcombine.low %v5229_v46, %v5231_v55 }
 0x839   :  { %v5246_v3 = vrot.slane %v5238_v45, %v8863_v8  ;;  %v5253_v15 = vrot.slane %v5239_v50, %v8863_v8 }
 0x83b   :  { %v5254_v18 = vcombine.low %v5246_v3, %v5253_v15  ;;  %v5255_v21 = vcombine.high %v5246_v3, %v5253_v15 }
 0x83d   :  { %v5262_v49 = vrot.slane %v5254_v18, %v8863_v8  ;;  %v5269_v48 = vrot.slane %v5255_v21, %v8863_v8 }
 0x83f   :  { %v5270_v17 = vcombine.high %v5262_v49, %v5262_v49  ;;  %v5271_v22 = vcombine.high %v5269_v48, %v5269_v48  ;;  %v5276_v54 = vadd.f32 %v5262_v49, %v5056_v61  ;;  %v5277_v57 = vadd.f32 %v5269_v48, %v5058_v56 }
 0x841   :  { %v5278_v27 = vadd.f32 %v5270_v17, %v5060_v59  ;;  %v5279_v46 = vadd.f32 %v5271_v22, %v5062_v28  ;;  %v7069_v51 = vmul.f32 -1.442695, %v5276_v54  ;;  %v7070_v45 = vmul.f32 -1.442695, %v5277_v57 }
 0x842   :  { %v5308_v55 = vrot.slane %v5276_v54, 1  ;;  %v5309_v50 = vrot.slane %v5277_v57, 1  ;;  %v5340_v61 = vrot.slane %v5276_v54, 2  ;;  %v5352_v59 = vrot.slane %v5276_v54, 3 }
 0x843   :  { %7755 = vpow2.f32 %v7069_v51  ;;  %v7071_v15 = vmul.f32 -1.442695, %v5278_v27  ;;  %v7072_v3 = vmul.f32 -1.442695, %v5279_v46  ;;  %v5310_v18 = vrot.slane %v5278_v27, 1 }
 0x844   :  { %7757 = vpow2.f32 %v7070_v45  ;;  %v5311_v21 = vrot.slane %v5279_v46, 1  ;;  %v7073_v36 = vmul.f32 -1.442695, %v5308_v55  ;;  %v7074_v11 = vmul.f32 -1.442695, %v5309_v50 }
 0x845   :  { %7759 = vpow2.f32 %v7071_v15  ;;  %v7075_v63 = vmul.f32 -1.442695, %v5310_v18  ;;  %v5341_v28 = vrot.slane %v5277_v57, 2  ;;  %v5353_v17 = vrot.slane %v5277_v57, 3 }
 0x846   :  { %7761 = vpow2.f32 %v7072_v3  ;;  %v7076_v48 = vmul.f32 -1.442695, %v5311_v21  ;;  %v5342_v49 = vrot.slane %v5278_v27, 2  ;;  %v5354_v56 = vrot.slane %v5278_v27, 3 }
 0x847   :  { %7763 = vpow2.f32 %v7073_v36  ;;  %v5343_v22 = vrot.slane %v5279_v46, 2  ;;  %v5355_v51 = vrot.slane %v5279_v46, 3  ;;  %v7077_v45 = vmul.f32 -1.442695, %v5352_v59 }
 0x848   :  { %7765 = vpow2.f32 %v7074_v11  ;;  %v7078_v55 = vmul.f32 -1.442695, %v5353_v17  ;;  %v7079_v50 = vmul.f32 -1.442695, %v5354_v56 }
 0x849   :  { %7767 = vpow2.f32 %v7075_v63  ;;  %v7080_v15 = vmul.f32 -1.442695, %v5355_v51 }
 0x84a   :  { %7769 = vpow2.f32 %v7076_v48 }
 0x84b   :  { %7771 = vtanh.f32 %v5340_v61 }
 0x84c   :  { %7773 = vtanh.f32 %v5341_v28 }
 0x84d   :  { %7775 = vtanh.f32 %v5342_v49 }
 0x84e   :  { %7777 = vtanh.f32 %v5343_v22 }
 0x84f   :  { %7779 = vpow2.f32 %v7077_v45 }
 0x850   :  { %v7756_v36 = vpop.eup %7755  ;;  %7781 = vpow2.f32 %v7078_v55 }
 0x851   :  { %v7758_v11 = vpop.eup %7757  ;;  %v5292_v54 = vadd.f32 1.0, %v7756_v36  ;;  %7783 = vpow2.f32 %v7079_v50 }
 0x852   :  { %v7760_v63 = vpop.eup %7759  ;;  %v5293_v57 = vadd.f32 1.0, %v7758_v11  ;;  %7785 = vpow2.f32 %v7080_v15 }
 0x853   :  { %v7762_v27 = vpop.eup %7761  ;;  %v5294_v3 = vadd.f32 1.0, %v7760_v63  ;;  %7787 = vrcp.f32 %v5292_v54 }
 0x854   :  { %v7764_v46 = vpop.eup %7763  ;;  %v5295_v18 = vadd.f32 1.0, %v7762_v27  ;;  %7789 = vrcp.f32 %v5293_v57 }
 0x855   :  { %v7766_v21 = vpop.eup %7765  ;;  %7791 = vrcp.f32 %v5294_v3  ;;  %v5328_v48 = vadd.f32 1.0, %v7764_v46 }
 0x856   :  { %v7768_v61 = vpop.eup %7767  ;;  %7793 = vrcp.f32 %v5295_v18  ;;  %v5329_v59 = vadd.f32 1.0, %v7766_v21 }
 0x857   :  { %v7770_v28 = vpop.eup %7769  ;;  %v5330_v17 = vadd.f32 1.0, %v7768_v61  ;;  %7795 = vrcp.f32 %v5328_v48 }
 0x858   :  { %v7772_v49 = vpop.eup %7771  ;;  %v5331_v56 = vadd.f32 1.0, %v7770_v28  ;;  %7797 = vrcp.f32 %v5329_v59 }
 0x859   :  { %v7774_v22 = vpop.eup %7773  ;;  %7799 = vrcp.f32 %v5330_v17 }
 0x85a   :  { %v7776_v51 = vpop.eup %7775  ;;  %7801 = vrcp.f32 %v5331_v56 }
 0x85b   :  { %v7778_v45 = vpop.eup %7777 }
 0x85c   :  { %v7780_v55 = vpop.eup %7779 }
 0x85d   :  { %v7782_v50 = vpop.eup %7781  ;;  %v5372_v63 = vadd.f32 1.0, %v7780_v55 }
 0x85e   :  { %v7784_v15 = vpop.eup %7783  ;;  %v5373_v27 = vadd.f32 1.0, %v7782_v50 }
 0x85f   :  { %v7786_v36 = vpop.eup %7785  ;;  %v5374_v46 = vadd.f32 1.0, %v7784_v15  ;;  %7803 = vrcp.f32 %v5372_v63 }
 0x860   :  { %v7788_v11 = vpop.eup %7787  ;;  %v5375_v21 = vadd.f32 1.0, %v7786_v36  ;;  %7805 = vrcp.f32 %v5373_v27 }
 0x861   :  { %v7790_v54 = vpop.eup %7789  ;;  %v5388_v61 = vmul.f32 %v7788_v11, %v7772_v49  ;;  %7807 = vrcp.f32 %v5374_v46 }
 0x862   :  { %v7792_v57 = vpop.eup %7791  ;;  %v5389_v17 = vmul.f32 %v7790_v54, %v7774_v22  ;;  %7809 = vrcp.f32 %v5375_v21 }
 0x863   :  { %v7794_v3 = vpop.eup %7793  ;;  %v5390_v14 = vmul.f32 %v7792_v57, %v7776_v51 }
 0x864   :  { %v7796_v18 = vpop.eup %7795  ;;  %v5391_v15 = vmul.f32 %v7794_v3, %v7778_v45 }
 0x865   :  { %v7798_v48 = vpop.eup %7797  ;;  %v5384_v59 = vmul.f32 %v7796_v18, %v9408_v13 }
 0x866   :  { %v7800_v28 = vpop.eup %7799  ;;  %v5385_v56 = vmul.f32 %v7798_v48, %v9411_v39 }
 0x867   :  { %v7802_v19 = vpop.eup %7801  ;;  %v5386_v55 = vmul.f32 %v7800_v28, %v9413_v47  ;;  %v9575_v50 = vadd.f32 %v5388_v61, %v5384_v59 }
 0x868   :  { %v5387_v36 = vmul.f32 %v7802_v19, %v9416_v12  ;;  %v9578_v63 = vadd.f32 %v5389_v17, %v5385_v56 }
 0x869   :  { %v9580_v49 = vadd.f32 %v5390_v14, %v5386_v55  ;;  %7811 = vtanh.f32 %v9575_v50 }
 0x86a   :  { %v9583_v13 = vadd.f32 %v5391_v15, %v5387_v36  ;;  %7813 = vtanh.f32 %v9578_v63 }
 0x86b   :  { %7815 = vtanh.f32 %v9580_v49 }
 0x86c   :  { %7817 = vtanh.f32 %v9583_v13  ;;  %v7804_v39 = vpop.eup %7803 }
 0x86d   :  { %v7806_v47 = vpop.eup %7805 }
 0x86e   :  { %v7808_v22 = vpop.eup %7807 }
 0x86f   :  { %v7810_v51 = vpop.eup %7809 }
 0x876   :  { %v7812_v45 = vpop.eup %7811 }
 0x877   :  { %v7814_v12 = vpop.eup %7813  ;;  %v5400_v19 = vmul.f32 %v7812_v45, %v7804_v39  ;;  %v5405_v39 = vld [vmem:[#allocation2 + $0x1] ss:$8 sm:$0xf] }
 0x878   :  { %v7816_v11 = vpop.eup %7815  ;;  %v5401_v14 = vmul.f32 %v7814_v12, %v7806_v47  ;;  %v5407_v47 = vld [vmem:[#allocation2 + $0x21] ss:$8 sm:$0xf] }
 0x879   :  { %v7818_v54 = vpop.eup %7817  ;;  %v5402_v57 = vmul.f32 %v7816_v11, %v7808_v22  ;;  %v5411_v11 = vld [vmem:[#allocation2 + $0x61] ss:$8 sm:$0xf] }
 0x87a   :  { %v5403_v27 = vmul.f32 %v7818_v54, %v7810_v51  ;;  %v5416_v3 = vcombine.low %v5400_v19, %v5401_v14  ;;  %v5409_v19 = vld [vmem:[#allocation2 + $0x41] ss:$8 sm:$0xf] }
 0x87c   :  { %v5417_v46 = vcombine.low %v5402_v57, %v5403_v27  ;;  %v5424_v18 = vrot.slane %v5416_v3, %v8863_v8 }
 0x87e   :  { %v5431_v21 = vrot.slane %v5417_v46, %v8863_v8 }
 0x880   :  { %v5432_v48 = vcombine.low %v5424_v18, %v5431_v21 }
 0x882   :  { %v5439_v61 = vrot.slane %v5432_v48, %v8863_v8 }
 0x884   :  { %5506 = vmatmul.mubr.f32.vlgmr.msra.gmra.mxu0 %v5439_v61  ;;  %5577 = vmatmul.mubr.f32.vlgmr.msra.gmra.mxu1 %v5439_v61 }
 0x885   :  { %5861 = vmatpush1.msra.mxu1 %v9288_v2  ;;  %5790 = vmatpush1.msra.mxu0 %v9285_v4  ;;  %v10023_v4 = vld [vmem:[#allocation33_spill] sm:$0xff]  ;;  %v10024_v2 = vld [vmem:[#allocation32_spill] sm:$0xff] }
 0x886   :  { %5862 = vmatprep.subr.mxu1 %v9294_v41  ;;  %5791 = vmatprep.subr.mxu0 %v9291_v42  ;;  %v10025_v42 = vld [vmem:[#allocation35_spill] sm:$0xff]  ;;  %v10026_v41 = vld [vmem:[#allocation34_spill] sm:$0xff] }
 0x887   :  { %5863 = vmatpush1.msra.mxu1 %v9300_v30  ;;  %5792 = vmatpush1.msra.mxu0 %v9297_v35  ;;  %v10027_v35 = vld [vmem:[#allocation37_spill] sm:$0xff]  ;;  %v10028_v30 = vld [vmem:[#allocation36_spill] sm:$0xff] }
 0x888   :  { %5864 = vmatprep.subr.mxu1 %v9306_v6  ;;  %5793 = vmatprep.subr.mxu0 %v9303_v44  ;;  %v10029_v44 = vld [vmem:[#allocation39_spill] sm:$0xff]  ;;  %v10030_v6 = vld [vmem:[#allocation38_spill] sm:$0xff] }
 0x889   :  { %5865 = vmatpush1.msra.mxu1 %v9312_v38  ;;  %5794 = vmatpush1.msra.mxu0 %v9309_v60  ;;  %v10031_v60 = vld [vmem:[#allocation41_spill] sm:$0xff]  ;;  %v10032_v38 = vld [vmem:[#allocation40_spill] sm:$0xff] }
 0x88a   :  { %5866 = vmatprep.subr.mxu1 %v9318_v34  ;;  %5795 = vmatprep.subr.mxu0 %v9315_v29  ;;  %v10033_v29 = vld [vmem:[#allocation43_spill] sm:$0xff]  ;;  %v10034_v34 = vld [vmem:[#allocation42_spill] sm:$0xff] }
 0x88b   :  { %5867 = vmatpush1.msra.mxu1 %v9324_v16  ;;  %5796 = vmatpush1.msra.mxu0 %v9321_v25  ;;  %v10035_v25 = vld [vmem:[#allocation45_spill] sm:$0xff]  ;;  %v10036_v16 = vld [vmem:[#allocation44_spill] sm:$0xff] }
 0x88c   :  { %5868 = vmatprep.subr.mxu1 %v9330_v58  ;;  %5797 = vmatprep.subr.mxu0 %v9327_v33  ;;  %v10037_v33 = vld [vmem:[#allocation47_spill] sm:$0xff]  ;;  %v10038_v58 = vld [vmem:[#allocation46_spill] sm:$0xff] }
 0x88d   :  { %5869 = vmatpush1.msra.mxu1 %v9336_v24  ;;  %5798 = vmatpush1.msra.mxu0 %v9333_v40  ;;  %v10039_v40 = vld [vmem:[#allocation49_spill] sm:$0xff]  ;;  %v10040_v24 = vld [vmem:[#allocation48_spill] sm:$0xff] }
 0x88e   :  { %5870 = vmatprep.subr.mxu1 %v9342_v9  ;;  %5799 = vmatprep.subr.mxu0 %v9339_v20  ;;  %v10041_v20 = vld [vmem:[#allocation51_spill] sm:$0xff]  ;;  %v10042_v9 = vld [vmem:[#allocation50_spill] sm:$0xff] }
 0x88f   :  { %5871 = vmatpush1.msra.mxu1 %v9348_v26  ;;  %5800 = vmatpush1.msra.mxu0 %v9345_v37  ;;  %v10043_v37 = vld [vmem:[#allocation53_spill] sm:$0xff]  ;;  %v10044_v26 = vld [vmem:[#allocation52_spill] sm:$0xff] }
 0x890   :  { %5872 = vmatprep.subr.mxu1 %v9447_v52  ;;  %5801 = vmatprep.subr.mxu0 %v9351_v0  ;;  %v10045_v0 = vld [vmem:[#allocation30_spill] sm:$0xff] }
 0x891   :  { %5873 = vmatpush1.msra.mxu1 %v9453_v53  ;;  %5802 = vmatpush1.msra.mxu0 %v9450_v1  ;;  %v10046_v52 = vld [vmem:[#allocation54_spill] sm:$0xff]  ;;  %v10047_v1 = vld [vmem:[#allocation55_spill] sm:$0xff] }
 0x892   :  { %5874 = vmatprep.subr.mxu1 %v9459_v31  ;;  %5803 = vmatprep.subr.mxu0 %v9456_v7  ;;  %v10048_v53 = vld [vmem:[#allocation31_spill] sm:$0xff]  ;;  %v10049_v7 = vld [vmem:[#allocation57_spill] sm:$0xff]  ;;  %v10050_v31 = vld [vmem:[#allocation56_spill] sm:$0xff] }
 0x893   :  { %5875 = vmatpush1.msra.mxu1 %v9465_v62  ;;  %5804 = vmatpush1.msra.mxu0 %v9462_v10  ;;  %v10051_v10 = vmov 0.0  }
 0x894   :  { %5876 = vmatprep.subr.mxu1 %v9471_v32  ;;  %5805 = vmatprep.subr.mxu0 %v9468_v23 }
 0x895   :  { %5877 = vmatpush1.msra.mxu1 %v9477_v5  ;;  %5806 = vmatpush1.msra.mxu0 %v9474_v43 }
 0x896   :  { %5878 = vmatprep.subr.mxu1 %v10023_v4  ;;  %5807 = vmatprep.subr.mxu0 %v10024_v2 }
 0x897   :  { %5879 = vmatpush1.msra.mxu1 %v10025_v42  ;;  %5808 = vmatpush1.msra.mxu0 %v10026_v41 }
 0x898   :  { %5880 = vmatprep.subr.mxu1 %v10027_v35  ;;  %5809 = vmatprep.subr.mxu0 %v10028_v30 }
 0x899   :  { %5881 = vmatpush1.msra.mxu1 %v10029_v44  ;;  %5810 = vmatpush1.msra.mxu0 %v10030_v6 }
 0x89a   :  { %5882 = vmatprep.subr.mxu1 %v10031_v60  ;;  %5811 = vmatprep.subr.mxu0 %v10032_v38 }
 0x89b   :  { %5883 = vmatpush1.msra.mxu1 %v10033_v29  ;;  %5812 = vmatpush1.msra.mxu0 %v10034_v34 }
 0x89c   :  { %5884 = vmatprep.subr.mxu1 %v10035_v25  ;;  %5813 = vmatprep.subr.mxu0 %v10036_v16 }
 0x89d   :  { %5885 = vmatpush1.msra.mxu1 %v10037_v33  ;;  %5814 = vmatpush1.msra.mxu0 %v10038_v58 }
 0x89e   :  { %5886 = vmatprep.subr.mxu1 %v10039_v40  ;;  %5815 = vmatprep.subr.mxu0 %v10040_v24 }
 0x89f   :  { %5887 = vmatpush1.msra.mxu1 %v10041_v20  ;;  %5816 = vmatpush1.msra.mxu0 %v10042_v9 }
 0x8a0   :  { %5888 = vmatprep.subr.mxu1 %v10043_v37  ;;  %5817 = vmatprep.subr.mxu0 %v10044_v26 }
 0x8a1   :  { %5889 = vmatpush1.msra.mxu1 %v10045_v0  ;;  %5818 = vmatpush1.msra.mxu0 %v10046_v52 }
 0x8a2   :  { %5890 = vmatprep.subr.mxu1 %v10047_v1  ;;  %5819 = vmatprep.subr.mxu0 %v10048_v53 }
 0x8a3   :  { %5891 = vmatpush1.msra.mxu1 %v10049_v7  ;;  %5820 = vmatpush1.msra.mxu0 %v10050_v31 }
 0x8a4   :  { %5853 = vmatprep.mubr.f32.mxu0 %v10051_v10  ;;  %5924 = vmatprep.mubr.f32.mxu1 %v10051_v10 }
 0x8a5   :  { %7227 = vmatprep.subr.mxu1 %v10051_v10  ;;  %7192 = vmatprep.subr.mxu0 %v10051_v10 }
 0x944   :  { %v5507_v62 = vpop.f32.mrf.mxu0  ;;  %v5578_v23 = vpop.f32.mrf.mxu1 }
 0x946   :  { %v5509_v32 = vpop.f32.mrf.mxu0  ;;  %v5580_v43 = vpop.f32.mrf.mxu1 }
 0x947   :  { %v5587_v5 = vcombine.low %v5507_v62, %v5509_v32  ;;  %v5588_v59 = vcombine.low %v5578_v23, %v5580_v43 }
 0x949   :  { %v5595_v28 = vrot.slane %v5587_v5, %v8863_v8  ;;  %v5602_v17 = vrot.slane %v5588_v59, %v8863_v8 }
 0x94b   :  { %v5603_v56 = vcombine.low %v5595_v28, %v5602_v17  ;;  %v5604_v55 = vcombine.high %v5595_v28, %v5602_v17 }
 0x94d   :  { %v5611_v15 = vrot.slane %v5603_v56, %v8863_v8  ;;  %v5618_v36 = vrot.slane %v5604_v55, %v8863_v8 }
 0x94f   :  { %v5619_v22 = vcombine.high %v5611_v15, %v5611_v15  ;;  %v5620_v51 = vcombine.high %v5618_v36, %v5618_v36  ;;  %v5625_v45 = vadd.f32 %v5611_v15, %v5405_v39  ;;  %v5626_v12 = vadd.f32 %v5618_v36, %v5407_v47 }
 0x951   :  { %v5627_v14 = vadd.f32 %v5619_v22, %v5409_v19  ;;  %v5628_v54 = vadd.f32 %v5620_v51, %v5411_v11  ;;  %v7081_v57 = vmul.f32 -1.442695, %v5625_v45  ;;  %v7082_v27 = vmul.f32 -1.442695, %v5626_v12 }
 0x952   :  { %v5657_v3 = vrot.slane %v5625_v45, 1  ;;  %v5658_v46 = vrot.slane %v5626_v12, 1  ;;  %v5689_v35 = vrot.slane %v5625_v45, 2  ;;  %v5701_v30 = vrot.slane %v5625_v45, 3 }
 0x953   :  { %7819 = vpow2.f32 %v7081_v57  ;;  %v7083_v18 = vmul.f32 -1.442695, %v5627_v14  ;;  %v7084_v21 = vmul.f32 -1.442695, %v5628_v54  ;;  %v5659_v48 = vrot.slane %v5627_v14, 1 }
 0x954   :  { %7821 = vpow2.f32 %v7082_v27  ;;  %v5660_v61 = vrot.slane %v5628_v54, 1  ;;  %v7085_v4 = vmul.f32 -1.442695, %v5657_v3  ;;  %v7086_v2 = vmul.f32 -1.442695, %v5658_v46 }
 0x955   :  { %7823 = vpow2.f32 %v7083_v18  ;;  %v7087_v42 = vmul.f32 -1.442695, %v5659_v48  ;;  %v5690_v44 = vrot.slane %v5626_v12, 2  ;;  %v5702_v6 = vrot.slane %v5626_v12, 3 }
 0x956   :  { %7825 = vpow2.f32 %v7084_v21  ;;  %v7088_v41 = vmul.f32 -1.442695, %v5660_v61  ;;  %v5691_v60 = vrot.slane %v5627_v14, 2  ;;  %v5703_v38 = vrot.slane %v5627_v14, 3 }
 0x957   :  { %7827 = vpow2.f32 %v7085_v4  ;;  %v5692_v29 = vrot.slane %v5628_v54, 2  ;;  %v5704_v34 = vrot.slane %v5628_v54, 3  ;;  %v7089_v25 = vmul.f32 -1.442695, %v5701_v30 }
 0x958   :  { %7829 = vpow2.f32 %v7086_v2  ;;  %v7090_v16 = vmul.f32 -1.442695, %v5702_v6  ;;  %v7091_v33 = vmul.f32 -1.442695, %v5703_v38 }
 0x959   :  { %7831 = vpow2.f32 %v7087_v42  ;;  %v7092_v58 = vmul.f32 -1.442695, %v5704_v34 }
 0x95a   :  { %7833 = vpow2.f32 %v7088_v41 }
 0x95b   :  { %7835 = vtanh.f32 %v5689_v35 }
 0x95c   :  { %7837 = vtanh.f32 %v5690_v44 }
 0x95d   :  { %7839 = vtanh.f32 %v5691_v60 }
 0x95e   :  { %7841 = vtanh.f32 %v5692_v29 }
 0x95f   :  { %7843 = vpow2.f32 %v7089_v25 }
 0x960   :  { %v7820_v40 = vpop.eup %7819  ;;  %7845 = vpow2.f32 %v7090_v16 }
 0x961   :  { %v7822_v24 = vpop.eup %7821  ;;  %v5641_v20 = vadd.f32 1.0, %v7820_v40  ;;  %7847 = vpow2.f32 %v7091_v33 }
 0x962   :  { %v7824_v9 = vpop.eup %7823  ;;  %v5642_v37 = vadd.f32 1.0, %v7822_v24  ;;  %7849 = vpow2.f32 %v7092_v58 }
 0x963   :  { %v7826_v26 = vpop.eup %7825  ;;  %v5643_v0 = vadd.f32 1.0, %v7824_v9  ;;  %7851 = vrcp.f32 %v5641_v20 }
 0x964   :  { %v7828_v52 = vpop.eup %7827  ;;  %v5644_v1 = vadd.f32 1.0, %v7826_v26  ;;  %7853 = vrcp.f32 %v5642_v37  ;;  %v6116_v37 = vld [vmem:[#allocation14 + $0x78] sm:$0xff]  ;;  %v6115_v26 = vld [vmem:[#allocation14 + $0x70] sm:$0xff] }
 0x965   :  { %v7830_v53 = vpop.eup %7829  ;;  %7855 = vrcp.f32 %v5643_v0  ;;  %v5677_v7 = vadd.f32 1.0, %v7828_v52  ;;  %v6114_v0 = vld [vmem:[#allocation14 + $0x68] sm:$0xff]  ;;  %v6113_v52 = vld [vmem:[#allocation14 + $0x60] sm:$0xff] }
 0x966   :  { %v7832_v31 = vpop.eup %7831  ;;  %7857 = vrcp.f32 %v5644_v1  ;;  %v5678_v62 = vadd.f32 1.0, %v7830_v53  ;;  %v6112_v1 = vld [vmem:[#allocation14 + $0x58] sm:$0xff]  ;;  %v6111_v53 = vld [vmem:[#allocation14 + $0x50] sm:$0xff] }
 0x967   :  { %v7834_v23 = vpop.eup %7833  ;;  %v5679_v32 = vadd.f32 1.0, %v7832_v31  ;;  %7859 = vrcp.f32 %v5677_v7  ;;  %v6110_v7 = vld [vmem:[#allocation14 + $0x48] sm:$0xff]  ;;  %v6109_v31 = vld [vmem:[#allocation14 + $0x40] sm:$0xff] }
 0x968   :  { %v7836_v43 = vpop.eup %7835  ;;  %v5680_v5 = vadd.f32 1.0, %v7834_v23  ;;  %7861 = vrcp.f32 %v5678_v62  ;;  %v6108_v62 = vld [vmem:[#allocation14 + $0x38] sm:$0xff]  ;;  %v6107_v23 = vld [vmem:[#allocation14 + $0x30] sm:$0xff] }
 0x969   :  { %v7838_v59 = vpop.eup %7837  ;;  %7863 = vrcp.f32 %v5679_v32  ;;  %v6106_v32 = vld [vmem:[#allocation14 + $0x28] sm:$0xff] }
 0x96a   :  { %v7840_v28 = vpop.eup %7839  ;;  %7865 = vrcp.f32 %v5680_v5  ;;  %v6104_v5 = vld [vmem:[#allocation14 + $0x18] sm:$0xff] }
 0x96b   :  { %v7842_v17 = vpop.eup %7841 }
 0x96c   :  { %v7844_v56 = vpop.eup %7843 }
 0x96d   :  { %v7846_v55 = vpop.eup %7845  ;;  %v5721_v22 = vadd.f32 1.0, %v7844_v56  ;;  %v10052_v56 = vld [vmem:[#allocation29_spill] sm:$0xff] }
 0x96e   :  { %v7848_v15 = vpop.eup %7847  ;;  %v5722_v45 = vadd.f32 1.0, %v7846_v55  ;;  %v6132_v55 = vld [vmem:[#allocation14 + $0xf8] sm:$0xff] }
 0x96f   :  { %v7850_v36 = vpop.eup %7849  ;;  %v5723_v19 = vadd.f32 1.0, %v7848_v15  ;;  %7867 = vrcp.f32 %v5721_v22  ;;  %v6131_v15 = vld [vmem:[#allocation14 + $0xf0] sm:$0xff]  ;;  %v6402_v22 = vld [vmem:[#allocation14 + $0x1e8] sm:$0xff] }
 0x970   :  { %v7852_v39 = vpop.eup %7851  ;;  %v5724_v14 = vadd.f32 1.0, %v7850_v36  ;;  %7869 = vrcp.f32 %v5722_v45  ;;  %v6404_v36 = vld [vmem:[#allocation14 + $0x1f8] sm:$0xff]  ;;  %v6401_v45 = vld [vmem:[#allocation14 + $0x1e0] sm:$0xff] }
 0x971   :  { %v7854_v47 = vpop.eup %7853  ;;  %v5737_v57 = vmul.f32 %v7852_v39, %v7836_v43  ;;  %7871 = vrcp.f32 %v5723_v19  ;;  %v6105_v43 = vld [vmem:[#allocation14 + $0x20] sm:$0xff]  ;;  %v6403_v39 = vld [vmem:[#allocation14 + $0x1f0] sm:$0xff]  ;;  %v6400_v19 = vld [vmem:[#allocation14 + $0x1d8] sm:$0xff] }
 0x972   :  { %v7856_v51 = vpop.eup %7855  ;;  %v5738_v46 = vmul.f32 %v7854_v47, %v7838_v59  ;;  %7873 = vrcp.f32 %v5724_v14  ;;  %v6103_v59 = vld [vmem:[#allocation14 + $0x10] sm:$0xff]  ;;  %v6130_v47 = vld [vmem:[#allocation14 + $0xe8] sm:$0xff] }
 0x973   :  { %v7858_v12 = vpop.eup %7857  ;;  %v5739_v48 = vmul.f32 %v7856_v51, %v7840_v28  ;;  %v6102_v28 = vld [vmem:[#allocation14 + $0x8] sm:$0xff]  ;;  %v6129_v51 = vld [vmem:[#allocation14 + $0xe0] sm:$0xff]  ;;  %v6399_v14 = vld [vmem:[#allocation14 + $0x1d0] sm:$0xff] }
 0x974   :  { %v7860_v11 = vpop.eup %7859  ;;  %v5740_v2 = vmul.f32 %v7858_v12, %v7842_v17  ;;  %v6101_v17 = vld [vmem:[#allocation14] sm:$0xff]  ;;  %v6128_v12 = vld [vmem:[#allocation14 + $0xd8] sm:$0xff] }
 0x975   :  { %v7862_v54 = vpop.eup %7861  ;;  %v5733_v27 = vmul.f32 %v7860_v11, %v9575_v50  ;;  %v6127_v11 = vld [vmem:[#allocation14 + $0xd0] sm:$0xff] }
 0x976   :  { %v7864_v3 = vpop.eup %7863  ;;  %v5734_v18 = vmul.f32 %v7862_v54, %v9578_v63  ;;  %v6126_v54 = vld [vmem:[#allocation14 + $0xc8] sm:$0xff] }
 0x977   :  { %v7866_v21 = vpop.eup %7865  ;;  %v5735_v61 = vmul.f32 %v7864_v3, %v9580_v49  ;;  %v9664_v4 = vadd.f32 %v5737_v57, %v5733_v27  ;;  %v6398_v57 = vld [vmem:[#allocation14 + $0x1c8] sm:$0xff]  ;;  %v6125_v27 = vld [vmem:[#allocation14 + $0xc0] sm:$0xff] }
 0x978   :  { %v5736_v42 = vmul.f32 %v7866_v21, %v9583_v13  ;;  %v9667_v41 = vadd.f32 %v5738_v46, %v5734_v18  ;;  %v6397_v3 = vld [vmem:[#allocation14 + $0x1c0] sm:$0xff]  ;;  %v6124_v46 = vld [vmem:[#allocation14 + $0xb8] sm:$0xff]  ;;  %v6123_v21 = vld [vmem:[#allocation14 + $0xb0] sm:$0xff] }
 0x979   :  { %v9669_v35 = vadd.f32 %v5739_v48, %v5735_v61  ;;  %7875 = vtanh.f32 %v9664_v4  ;;  %v6396_v18 = vld [vmem:[#allocation14 + $0x1b8] sm:$0xff]  ;;  %v6395_v48 = vld [vmem:[#allocation14 + $0x1b0] sm:$0xff]  ;;  %v6122_v61 = vld [vmem:[#allocation14 + $0xa8] sm:$0xff] }
 0x97a   :  { %v9672_v50 = vadd.f32 %v5740_v2, %v5736_v42  ;;  %7877 = vtanh.f32 %v9667_v41  ;;  %v6394_v2 = vld [vmem:[#allocation14 + $0x1a8] sm:$0xff]  ;;  %v6121_v42 = vld [vmem:[#allocation14 + $0xa0] sm:$0xff] }
 0x97b   :  { %7879 = vtanh.f32 %v9669_v35 }
 0x97c   :  { %7881 = vtanh.f32 %v9672_v50  ;;  %v7868_v63 = vpop.eup %7867 }
 0x97d   :  { %v7870_v49 = vpop.eup %7869 }
 0x97e   :  { %v7872_v30 = vpop.eup %7871 }
 0x97f   :  { %v7874_v44 = vpop.eup %7873 }
 0x986   :  { %v7876_v6 = vpop.eup %7875 }
 0x987   :  { %v7878_v13 = vpop.eup %7877  ;;  %v5749_v60 = vmul.f32 %v7876_v6, %v7868_v63  ;;  %v6393_v63 = vld [vmem:[#allocation14 + $0x1a0] sm:$0xff]  ;;  %v6391_v6 = vld [vmem:[#allocation14 + $0x190] sm:$0xff] }
 0x988   :  { %v7880_v38 = vpop.eup %7879  ;;  %v5750_v29 = vmul.f32 %v7878_v13, %v7870_v49  ;;  %v6120_v49 = vld [vmem:[#allocation14 + $0x98] sm:$0xff]  ;;  %v6118_v13 = vld [vmem:[#allocation14 + $0x88] sm:$0xff] }
 0x989   :  { %v7882_v34 = vpop.eup %7881  ;;  %v5751_v25 = vmul.f32 %v7880_v38, %v7872_v30  ;;  %v6392_v30 = vld [vmem:[#allocation14 + $0x198] sm:$0xff]  ;;  %v6117_v38 = vld [vmem:[#allocation14 + $0x80] sm:$0xff] }
 0x98a   :  { %v5752_v16 = vmul.f32 %v7882_v34, %v7874_v44  ;;  %v5764_v33 = vcombine.low %v5749_v60, %v5750_v29  ;;  %v6119_v44 = vld [vmem:[#allocation14 + $0x90] sm:$0xff]  ;;  %v6390_v60 = vld [vmem:[#allocation14 + $0x188] sm:$0xff]  ;;  %v6389_v29 = vld [vmem:[#allocation14 + $0x180] sm:$0xff] }
 0x98c   :  { %v5765_v58 = vcombine.low %v5751_v25, %v5752_v16  ;;  %v5772_v40 = vrot.slane %v5764_v33, %v8863_v8 }
 0x98e   :  { %v5779_v24 = vrot.slane %v5765_v58, %v8863_v8 }
 0x990   :  { %v5780_v20 = vcombine.low %v5772_v40, %v5779_v24 }
 0x992   :  { %v5787_v9 = vrot.slane %v5780_v20, %v8863_v8 }
 0x994   :  { %5854 = vmatmul.mubr.f32.vlgmr.msra.gmra.mxu0 %v5787_v9  ;;  %5925 = vmatmul.mubr.f32.vlgmr.msra.gmra.mxu1 %v5787_v9 }
 0x995   :  { %7228 = vmatpush3.msra.mxu1 %v6116_v37  ;;  %7259 = vmatprep.mubr.msk.f32.mxu1 %vm8327_vm1, %v10051_v10 }
 0x996   :  { %7229 = vmatprep.subr.mxu1 %v10051_v10  ;;  %7224 = vmatprep.mubr.msk.f32.mxu0 %vm8327_vm1, %v10051_v10 }
 0x997   :  { %7230 = vmatpush3.msra.mxu1 %v6115_v26  ;;  %7193 = vmatpush3.msra.mxu0 %v6132_v55 }
 0x998   :  { %7231 = vmatprep.subr.mxu1 %v10051_v10  ;;  %7194 = vmatprep.subr.mxu0 %v10051_v10 }
 0x999   :  { %7232 = vmatpush3.msra.mxu1 %v6114_v0  ;;  %7195 = vmatpush3.msra.mxu0 %v6131_v15 }
 0x99a   :  { %7233 = vmatprep.subr.mxu1 %v10051_v10  ;;  %7196 = vmatprep.subr.mxu0 %v10051_v10 }
 0x99b   :  { %7234 = vmatpush3.msra.mxu1 %v6113_v52  ;;  %7197 = vmatpush3.msra.mxu0 %v6130_v47  ;;  %v5753_v52 = vld [vmem:[#allocation2] ss:$8 sm:$0xf] }
 0x99c   :  { %7235 = vmatprep.subr.mxu1 %v10051_v10  ;;  %7198 = vmatprep.subr.mxu0 %v10051_v10 }
 0x99d   :  { %7236 = vmatpush3.msra.mxu1 %v6112_v1  ;;  %7199 = vmatpush3.msra.mxu0 %v6129_v51  ;;  %v5755_v1 = vld [vmem:[#allocation2 + $0x20] ss:$8 sm:$0xf] }
 0x99e   :  { %7237 = vmatprep.subr.mxu1 %v10051_v10  ;;  %7200 = vmatprep.subr.mxu0 %v10051_v10 }
 0x99f   :  { %7238 = vmatpush3.msra.mxu1 %v6111_v53  ;;  %7201 = vmatpush3.msra.mxu0 %v6128_v12 }
 0x9a0   :  { %7239 = vmatprep.subr.mxu1 %v10051_v10  ;;  %7202 = vmatprep.subr.mxu0 %v10051_v10 }
 0x9a1   :  { %7240 = vmatpush3.msra.mxu1 %v6110_v7  ;;  %7203 = vmatpush3.msra.mxu0 %v6127_v11 }
 0x9a2   :  { %7241 = vmatprep.subr.mxu1 %v10051_v10  ;;  %7204 = vmatprep.subr.mxu0 %v10051_v10 }
 0x9a3   :  { %7242 = vmatpush3.msra.mxu1 %v6109_v31  ;;  %7205 = vmatpush3.msra.mxu0 %v6126_v54 }
 0x9a4   :  { %7243 = vmatprep.subr.mxu1 %v10051_v10  ;;  %7206 = vmatprep.subr.mxu0 %v10051_v10 }
 0x9a5   :  { %7244 = vmatpush3.msra.mxu1 %v6108_v62  ;;  %7207 = vmatpush3.msra.mxu0 %v6125_v27 }
 0x9a6   :  { %7245 = vmatprep.subr.mxu1 %v10051_v10  ;;  %7208 = vmatprep.subr.mxu0 %v10051_v10 }
 0x9a7   :  { %7246 = vmatpush3.msra.mxu1 %v6107_v23  ;;  %7209 = vmatpush3.msra.mxu0 %v6124_v46  ;;  %v5757_v23 = vld [vmem:[#allocation2 + $0x40] ss:$8 sm:$0xf] }
 0x9a8   :  { %7247 = vmatprep.subr.mxu1 %v10051_v10  ;;  %7210 = vmatprep.subr.mxu0 %v10051_v10 }
 0x9a9   :  { %7248 = vmatpush3.msra.mxu1 %v6106_v32  ;;  %7211 = vmatpush3.msra.mxu0 %v6123_v21  ;;  %v5759_v32 = vld [vmem:[#allocation2 + $0x60] ss:$8 sm:$0xf] }
 0x9aa   :  { %7249 = vmatprep.subr.mxu1 %v10051_v10  ;;  %7212 = vmatprep.subr.mxu0 %v10051_v10 }
 0x9ab   :  { %7250 = vmatpush3.msra.mxu1 %v6105_v43  ;;  %7213 = vmatpush3.msra.mxu0 %v6122_v61 }
 0x9ac   :  { %7251 = vmatprep.subr.mxu1 %v10051_v10  ;;  %7214 = vmatprep.subr.mxu0 %v10051_v10 }
 0x9ad   :  { %7252 = vmatpush3.msra.mxu1 %v6104_v5  ;;  %7215 = vmatpush3.msra.mxu0 %v6121_v42 }
 0x9ae   :  { %7253 = vmatprep.subr.mxu1 %v10051_v10  ;;  %7216 = vmatprep.subr.mxu0 %v10051_v10 }
 0x9af   :  { %7254 = vmatpush3.msra.mxu1 %v6103_v59  ;;  %7217 = vmatpush3.msra.mxu0 %v6120_v49 }
 0x9b0   :  { %7255 = vmatprep.subr.mxu1 %v10051_v10  ;;  %7218 = vmatprep.subr.mxu0 %v10051_v10 }
 0x9b1   :  { %7256 = vmatpush3.msra.mxu1 %v6102_v28  ;;  %7219 = vmatpush3.msra.mxu0 %v6119_v44 }
 0x9b2   :  { %7257 = vmatprep.subr.mxu1 %v10051_v10  ;;  %7220 = vmatprep.subr.mxu0 %v10051_v10 }
 0x9b3   :  { %7258 = vmatpush3.msra.mxu1 %v6101_v17  ;;  %7221 = vmatpush3.msra.mxu0 %v6118_v13 }
 0x9b4   :  { %7260 = vmatmul.mubr.f32.vlgmr.msra.gmra.mxu1 %v10052_v56  ;;  %7297 = vmatprep.subr.mxu1 %v10051_v10 }
 0x9b5   :  { %7329 = vmatprep.mubr.msk.f32.mxu1 %vm8327_vm1, %v10051_v10  ;;  %7298 = vmatpush3.msra.mxu1 %v6404_v36 }
 0x9b6   :  { %7299 = vmatprep.subr.mxu1 %v10051_v10  ;;  %7222 = vmatprep.subr.mxu0 %v10051_v10 }
 0x9b7   :  { %7300 = vmatpush3.msra.mxu1 %v6403_v39  ;;  %7223 = vmatpush3.msra.mxu0 %v6117_v38 }
 0x9b8   :  { %7301 = vmatprep.subr.mxu1 %v10051_v10  ;;  %7262 = vmatprep.subr.mxu0 %v10051_v10 }
 0x9b9   :  { %7302 = vmatpush3.msra.mxu1 %v6402_v22 }
 0x9ba   :  { %7303 = vmatprep.subr.mxu1 %v10051_v10 }
 0x9bb   :  { %7304 = vmatpush3.msra.mxu1 %v6401_v45 }
 0x9bc   :  { %7305 = vmatprep.subr.mxu1 %v10051_v10 }
 0x9bd   :  { %7306 = vmatpush3.msra.mxu1 %v6400_v19 }
 0x9be   :  { %7307 = vmatprep.subr.mxu1 %v10051_v10 }
 0x9bf   :  { %7308 = vmatpush3.msra.mxu1 %v6399_v14 }
 0x9c0   :  { %7309 = vmatprep.subr.mxu1 %v10051_v10 }
 0x9c1   :  { %7310 = vmatpush3.msra.mxu1 %v6398_v57 }
 0x9c2   :  { %7311 = vmatprep.subr.mxu1 %v10051_v10 }
 0x9c3   :  { %7312 = vmatpush3.msra.mxu1 %v6397_v3 }
 0x9c4   :  { %7313 = vmatprep.subr.mxu1 %v10051_v10 }
 0x9c5   :  { %7314 = vmatpush3.msra.mxu1 %v6396_v18 }
 0x9c6   :  { %7315 = vmatprep.subr.mxu1 %v10051_v10 }
 0x9c7   :  { %7316 = vmatpush3.msra.mxu1 %v6395_v48 }
 0x9c8   :  { %7317 = vmatprep.subr.mxu1 %v10051_v10 }
 0x9c9   :  { %7318 = vmatpush3.msra.mxu1 %v6394_v2 }
 0x9ca   :  { %7319 = vmatprep.subr.mxu1 %v10051_v10 }
 0x9cb   :  { %7320 = vmatpush3.msra.mxu1 %v6393_v63 }
 0x9cc   :  { %7321 = vmatprep.subr.mxu1 %v10051_v10 }
 0x9cd   :  { %7322 = vmatpush3.msra.mxu1 %v6392_v30 }
 0x9ce   :  { %7323 = vmatprep.subr.mxu1 %v10051_v10 }
 0x9cf   :  { %7324 = vmatpush3.msra.mxu1 %v6391_v6 }
 0x9d0   :  { %7325 = vmatprep.subr.mxu1 %v10051_v10 }
 0x9d1   :  { %7326 = vmatpush3.msra.mxu1 %v6390_v60 }
 0x9d2   :  { %7327 = vmatprep.subr.mxu1 %v10051_v10 }
 0x9d3   :  { %7328 = vmatpush3.msra.mxu1 %v6389_v29 }
 0xa54   :  { %v5855_v34 = vpop.f32.mrf.mxu0  ;;  %v5926_v25 = vpop.f32.mrf.mxu1 }
 0xa56   :  { %v5857_v16 = vpop.f32.mrf.mxu0  ;;  %v5928_v33 = vpop.f32.mrf.mxu1 }
 0xa57   :  { %v5935_v58 = vcombine.low %v5855_v34, %v5857_v16  ;;  %v5936_v40 = vcombine.low %v5926_v25, %v5928_v33 }
 0xa59   :  { %v5943_v24 = vrot.slane %v5935_v58, %v8863_v8  ;;  %v5950_v20 = vrot.slane %v5936_v40, %v8863_v8 }
 0xa5b   :  { %v5951_v9 = vcombine.low %v5943_v24, %v5950_v20  ;;  %v5952_v37 = vcombine.high %v5943_v24, %v5950_v20 }
 0xa5d   :  { %v5959_v26 = vrot.slane %v5951_v9, %v8863_v8  ;;  %v5966_v0 = vrot.slane %v5952_v37, %v8863_v8 }
 0xa5f   :  { %v5967_v53 = vcombine.high %v5959_v26, %v5959_v26  ;;  %v5968_v7 = vcombine.high %v5966_v0, %v5966_v0  ;;  %v5973_v31 = vadd.f32 %v5959_v26, %v5753_v52  ;;  %v5974_v62 = vadd.f32 %v5966_v0, %v5755_v1 }
 0xa61   :  { %v5975_v43 = vadd.f32 %v5967_v53, %v5757_v23  ;;  %v5976_v5 = vadd.f32 %v5968_v7, %v5759_v32  ;;  %v7093_v59 = vmul.f32 -1.442695, %v5973_v31  ;;  %v7094_v28 = vmul.f32 -1.442695, %v5974_v62 }
 0xa62   :  { %v6005_v17 = vrot.slane %v5973_v31, 1  ;;  %v6006_v56 = vrot.slane %v5974_v62, 1  ;;  %v6037_v12 = vrot.slane %v5973_v31, 2  ;;  %v6049_v19 = vrot.slane %v5973_v31, 3 }
 0xa63   :  { %7883 = vpow2.f32 %v7093_v59  ;;  %v7095_v55 = vmul.f32 -1.442695, %v5975_v43  ;;  %v7096_v15 = vmul.f32 -1.442695, %v5976_v5  ;;  %v6007_v36 = vrot.slane %v5975_v43, 1 }
 0xa64   :  { %7885 = vpow2.f32 %v7094_v28  ;;  %v6008_v39 = vrot.slane %v5976_v5, 1  ;;  %v7097_v47 = vmul.f32 -1.442695, %v6005_v17  ;;  %v7098_v22 = vmul.f32 -1.442695, %v6006_v56 }
 0xa65   :  { %7887 = vpow2.f32 %v7095_v55  ;;  %v7099_v51 = vmul.f32 -1.442695, %v6007_v36  ;;  %v6038_v11 = vrot.slane %v5974_v62, 2  ;;  %v6050_v14 = vrot.slane %v5974_v62, 3 }
 0xa66   :  { %7889 = vpow2.f32 %v7096_v15  ;;  %v7100_v45 = vmul.f32 -1.442695, %v6008_v39  ;;  %v6039_v54 = vrot.slane %v5975_v43, 2  ;;  %v6051_v57 = vrot.slane %v5975_v43, 3 }
 0xa67   :  { %7891 = vpow2.f32 %v7097_v47  ;;  %v6040_v27 = vrot.slane %v5976_v5, 2  ;;  %v6052_v3 = vrot.slane %v5976_v5, 3  ;;  %v7101_v46 = vmul.f32 -1.442695, %v6049_v19 }
 0xa68   :  { %7893 = vpow2.f32 %v7098_v22  ;;  %v7102_v18 = vmul.f32 -1.442695, %v6050_v14  ;;  %v7103_v21 = vmul.f32 -1.442695, %v6051_v57 }
 0xa69   :  { %7895 = vpow2.f32 %v7099_v51  ;;  %v7104_v48 = vmul.f32 -1.442695, %v6052_v3 }
 0xa6a   :  { %7897 = vpow2.f32 %v7100_v45 }
 0xa6b   :  { %7899 = vtanh.f32 %v6037_v12 }
 0xa6c   :  { %7901 = vtanh.f32 %v6038_v11 }
 0xa6d   :  { %7903 = vtanh.f32 %v6039_v54 }
 0xa6e   :  { %7905 = vtanh.f32 %v6040_v27 }
 0xa6f   :  { %7907 = vpow2.f32 %v7101_v46 }
 0xa70   :  { %v7884_v61 = vpop.eup %7883  ;;  %7909 = vpow2.f32 %v7102_v18 }
 0xa71   :  { %v7886_v2 = vpop.eup %7885  ;;  %v5989_v42 = vadd.f32 1.0, %v7884_v61  ;;  %7911 = vpow2.f32 %v7103_v21 }
 0xa72   :  { %v7888_v63 = vpop.eup %7887  ;;  %v5990_v49 = vadd.f32 1.0, %v7886_v2  ;;  %7913 = vpow2.f32 %v7104_v48 }
 0xa73   :  { %v7890_v30 = vpop.eup %7889  ;;  %v5991_v44 = vadd.f32 1.0, %v7888_v63  ;;  %7915 = vrcp.f32 %v5989_v42 }
 0xa74   :  { %v7892_v6 = vpop.eup %7891  ;;  %v5992_v13 = vadd.f32 1.0, %v7890_v30  ;;  %7917 = vrcp.f32 %v5990_v49  ;;  %v9738_v60 = vpop.f32.mrf.mxu1  ;;  %v6312_v49 = vld [vmem:[#allocation14 + $0x178] sm:$0xff] }
 0xa75   :  { %v7894_v38 = vpop.eup %7893  ;;  %7919 = vrcp.f32 %v5991_v44  ;;  %v6025_v29 = vadd.f32 1.0, %v7892_v6  ;;  %v6311_v44 = vld [vmem:[#allocation14 + $0x170] sm:$0xff] }
 0xa76   :  { %v7896_v34 = vpop.eup %7895  ;;  %7921 = vrcp.f32 %v5992_v13  ;;  %v6026_v25 = vadd.f32 1.0, %v7894_v38  ;;  %v7261_v16 = vpop.f32.mrf.mxu1  ;;  %v6310_v13 = vld [vmem:[#allocation14 + $0x168] sm:$0xff]  ;;  %v6309_v38 = vld [vmem:[#allocation14 + $0x160] sm:$0xff] }
 0xa77   :  { %v7898_v33 = vpop.eup %7897  ;;  %v6027_v58 = vadd.f32 1.0, %v7896_v34  ;;  %7923 = vrcp.f32 %v6025_v29  ;;  %v6308_v29 = vld [vmem:[#allocation14 + $0x158] sm:$0xff]  ;;  %v6306_v34 = vld [vmem:[#allocation14 + $0x148] sm:$0xff] }
 0xa78   :  { %v7900_v40 = vpop.eup %7899  ;;  %v6028_v24 = vadd.f32 1.0, %v7898_v33  ;;  %7925 = vrcp.f32 %v6026_v25  ;;  %v6305_v25 = vld [vmem:[#allocation14 + $0x140] sm:$0xff]  ;;  %v6304_v16 = vld [vmem:[#allocation14 + $0x138] sm:$0xff]  ;;  %v6303_v33 = vld [vmem:[#allocation14 + $0x130] sm:$0xff] }
 0xa79   :  { %v7902_v20 = vpop.eup %7901  ;;  %7927 = vrcp.f32 %v6027_v58  ;;  %v6302_v58 = vld [vmem:[#allocation14 + $0x128] sm:$0xff] }
 0xa7a   :  { %v7904_v9 = vpop.eup %7903  ;;  %7929 = vrcp.f32 %v6028_v24  ;;  %v6300_v24 = vld [vmem:[#allocation14 + $0x118] sm:$0xff] }
 0xa7b   :  { %v7906_v37 = vpop.eup %7905 }
 0xa7c   :  { %v7908_v26 = vpop.eup %7907 }
 0xa7d   :  { %v7910_v0 = vpop.eup %7909  ;;  %v6069_v31 = vadd.f32 1.0, %v7908_v26  ;;  %v10053_v26 = vld [vmem:[#allocation28_spill] sm:$0xff] }
 0xa7e   :  { %v7912_v52 = vpop.eup %7911  ;;  %v6070_v23 = vadd.f32 1.0, %v7910_v0  ;;  %v6518_v0 = vld [vmem:[#allocation17 + $0x78] sm:$0xff] }
 0xa7f   :  { %v7914_v1 = vpop.eup %7913  ;;  %v6071_v43 = vadd.f32 1.0, %v7912_v52  ;;  %7931 = vrcp.f32 %v6069_v31  ;;  %v6517_v52 = vld [vmem:[#allocation17 + $0x70] sm:$0xff] }
 0xa80   :  { %v7916_v53 = vpop.eup %7915  ;;  %v6072_v59 = vadd.f32 1.0, %v7914_v1  ;;  %7933 = vrcp.f32 %v6070_v23  ;;  %v6516_v1 = vld [vmem:[#allocation17 + $0x68] sm:$0xff]  ;;  %v6513_v31 = vld [vmem:[#allocation17 + $0x50] sm:$0xff]  ;;  %v6511_v23 = vld [vmem:[#allocation17 + $0x40] sm:$0xff] }
 0xa81   :  { %v7918_v7 = vpop.eup %7917  ;;  %v6085_v56 = vmul.f32 %v7916_v53, %v7900_v40  ;;  %7935 = vrcp.f32 %v6071_v43  ;;  %v6301_v40 = vld [vmem:[#allocation14 + $0x120] sm:$0xff]  ;;  %v6509_v43 = vld [vmem:[#allocation17 + $0x30] sm:$0xff] }
 0xa82   :  { %v7920_v62 = vpop.eup %7919  ;;  %v6086_v36 = vmul.f32 %v7918_v7, %v7902_v20  ;;  %7937 = vrcp.f32 %v6072_v59  ;;  %v6299_v20 = vld [vmem:[#allocation14 + $0x110] sm:$0xff]  ;;  %v6515_v53 = vld [vmem:[#allocation17 + $0x60] sm:$0xff]  ;;  %v6514_v7 = vld [vmem:[#allocation17 + $0x58] sm:$0xff] }
 0xa83   :  { %v7922_v32 = vpop.eup %7921  ;;  %v6087_v51 = vmul.f32 %v7920_v62, %v7904_v9  ;;  %v6298_v9 = vld [vmem:[#allocation14 + $0x108] sm:$0xff] }
 0xa84   :  { %v7924_v5 = vpop.eup %7923  ;;  %v6088_v19 = vmul.f32 %v7922_v32, %v7906_v37  ;;  %v6297_v37 = vld [vmem:[#allocation14 + $0x100] sm:$0xff]  ;;  %v6512_v62 = vld [vmem:[#allocation17 + $0x48] sm:$0xff] }
 0xa85   :  { %v7926_v28 = vpop.eup %7925  ;;  %v6081_v17 = vmul.f32 %v7924_v5, %v9664_v4  ;;  %v6510_v32 = vld [vmem:[#allocation17 + $0x38] sm:$0xff]  ;;  %v6508_v5 = vld [vmem:[#allocation17 + $0x28] sm:$0xff]  ;;  %v6507_v59 = vld [vmem:[#allocation17 + $0x20] sm:$0xff] }
 0xa86   :  { %v7928_v55 = vpop.eup %7927  ;;  %v6082_v15 = vmul.f32 %v7926_v28, %v9667_v41  ;;  %v6506_v28 = vld [vmem:[#allocation17 + $0x18] sm:$0xff] }
 0xa87   :  { %v7930_v39 = vpop.eup %7929  ;;  %v6089_v47 = vadd.f32 %v6085_v56, %v6081_v17  ;;  %v6083_v22 = vmul.f32 %v7928_v55, %v9669_v35  ;;  %v6505_v17 = vld [vmem:[#allocation17 + $0x10] sm:$0xff]  ;;  %v6504_v56 = vld [vmem:[#allocation17 + $0x8] sm:$0xff]  ;;  %v6503_v55 = vld [vmem:[#allocation17] sm:$0xff] }
 0xa88   :  { %v6090_v45 = vadd.f32 %v6086_v36, %v6082_v15  ;;  %v6084_v12 = vmul.f32 %v7930_v39, %v9672_v50 }
 0xa89   :  { %7939 = vtanh.f32 %v6089_v47  ;;  %v6091_v11 = vadd.f32 %v6087_v51, %v6083_v22 }
 0xa8a   :  { %7941 = vtanh.f32 %v6090_v45  ;;  %v6092_v4 = vadd.f32 %v6088_v19, %v6084_v12  ;;  %v7105_v12 = vld [vmem:[#allocation15] ss:$0 sm:$0xff] }
 0xa8b   :  { %7943 = vtanh.f32 %v6091_v11 }
 0xa8c   :  { %7945 = vtanh.f32 %v6092_v4  ;;  %v7932_v14 = vpop.eup %7931 }
 0xa8d   :  { %v7934_v41 = vpop.eup %7933 }
 0xa8e   :  { %v7936_v54 = vpop.eup %7935 }
 0xa8f   :  { %v7938_v57 = vpop.eup %7937 }
 0xa96   :  { %v7940_v27 = vpop.eup %7939 }
 0xa97   :  { %v7942_v3 = vpop.eup %7941  ;;  %v6097_v46 = vmul.f32 %v7940_v27, %v7932_v14 }
 0xa98   :  { %v7944_v35 = vpop.eup %7943  ;;  %v6098_v18 = vmul.f32 %v7942_v3, %v7934_v41  ;;  %v7106_v41 = vld [vmem:[#allocation18] ss:$0 sm:$0xff] }
 0xa99   :  { %v7946_v21 = vpop.eup %7945  ;;  %v6099_v48 = vmul.f32 %v7944_v35, %v7936_v54 }
 0xa9a   :  { %v6135_v61 = vcombine.low %v6097_v46, %v6098_v18  ;;  %v6100_v50 = vmul.f32 %v7946_v21, %v7938_v57 }
 0xa9c   :  { %v6142_v2 = vrot.slane %v6135_v61, %v8863_v8  ;;  %v6407_v42 = vcombine.low %v6099_v48, %v6100_v50 }
 0xa9e   :  { %v6149_v63 = vrot.slane %v6142_v2, %v8863_v8  ;;  %v6414_v30 = vrot.slane %v6407_v42, %v8863_v8 }
 0xaa0   :  { %7225 = vmatmul.mubr.f32.vlgmr.msra.gmra.mxu0 %v6149_v63  ;;  %v6421_v6 = vrot.slane %v6414_v30, %v8863_v8  ;;  %v6307_v8 = vld [vmem:[#allocation14 + $0x150] sm:$0xff] }
 0xaa1   :  { %7263 = vmatpush3.msra.mxu0 %v6312_v49  ;;  %7294 = vmatprep.mubr.msk.f32.mxu0 %vm8327_vm1, %v10051_v10 }
 0xaa2   :  { %7264 = vmatprep.subr.mxu0 %v10051_v10  ;;  %7330 = vmatmul.mubr.f32.vlgmr.msra.gmra.mxu1 %v6421_v6 }
 0xaa3   :  { %7265 = vmatpush3.msra.mxu0 %v6311_v44 }
 0xaa4   :  { %7266 = vmatprep.subr.mxu0 %v10051_v10 }
 0xaa5   :  { %7267 = vmatpush3.msra.mxu0 %v6310_v13 }
 0xaa6   :  { %7268 = vmatprep.subr.mxu0 %v10051_v10 }
 0xaa7   :  { %7269 = vmatpush3.msra.mxu0 %v6309_v38 }
 0xaa8   :  { %7270 = vmatprep.subr.mxu0 %v10051_v10 }
 0xaa9   :  { %7271 = vmatpush3.msra.mxu0 %v6308_v29 }
 0xaaa   :  { %7272 = vmatprep.subr.mxu0 %v10051_v10 }
 0xaab   :  { %7273 = vmatpush3.msra.mxu0 %v6307_v8 }
 0xaac   :  { %7274 = vmatprep.subr.mxu0 %v10051_v10 }
 0xaad   :  { %7275 = vmatpush3.msra.mxu0 %v6306_v34 }
 0xaae   :  { %7276 = vmatprep.subr.mxu0 %v10051_v10 }
 0xaaf   :  { %7277 = vmatpush3.msra.mxu0 %v6305_v25 }
 0xab0   :  { %7278 = vmatprep.subr.mxu0 %v10051_v10 }
 0xab1   :  { %7279 = vmatpush3.msra.mxu0 %v6304_v16 }
 0xab2   :  { %7280 = vmatprep.subr.mxu0 %v10051_v10 }
 0xab3   :  { %7281 = vmatpush3.msra.mxu0 %v6303_v33 }
 0xab4   :  { %7282 = vmatprep.subr.mxu0 %v10051_v10 }
 0xab5   :  { %7283 = vmatpush3.msra.mxu0 %v6302_v58 }
 0xab6   :  { %7284 = vmatprep.subr.mxu0 %v10051_v10 }
 0xab7   :  { %7285 = vmatpush3.msra.mxu0 %v6301_v40 }
 0xab8   :  { %7286 = vmatprep.subr.mxu0 %v10051_v10 }
 0xab9   :  { %7287 = vmatpush3.msra.mxu0 %v6300_v24 }
 0xaba   :  { %7288 = vmatprep.subr.mxu0 %v10051_v10 }
 0xabb   :  { %7289 = vmatpush3.msra.mxu0 %v6299_v20 }
 0xabc   :  { %7290 = vmatprep.subr.mxu0 %v10051_v10 }
 0xabd   :  { %7291 = vmatpush3.msra.mxu0 %v6298_v9 }
 0xabe   :  { %7292 = vmatprep.subr.mxu0 %v10051_v10 }
 0xabf   :  { %7293 = vmatpush3.msra.mxu0 %v6297_v37 }
 0xac0   :  { %7295 = vmatmul.mubr.f32.vlgmr.msra.gmra.mxu0 %v10053_v26  ;;  %7332 = vmatprep.subr.mxu0 %v10051_v10 }
 0xac1   :  { %7364 = vmatprep.mubr.msk.f32.mxu0 %vm8327_vm1, %v10051_v10  ;;  %7333 = vmatpush3.msra.mxu0 %v6518_v0 }
 0xac2   :  { %7334 = vmatprep.subr.mxu0 %v10051_v10 }
 0xac3   :  { %7335 = vmatpush3.msra.mxu0 %v6517_v52 }
 0xac4   :  { %7336 = vmatprep.subr.mxu0 %v10051_v10 }
 0xac5   :  { %7337 = vmatpush3.msra.mxu0 %v6516_v1 }
 0xac6   :  { %7338 = vmatprep.subr.mxu0 %v10051_v10 }
 0xac7   :  { %7339 = vmatpush3.msra.mxu0 %v6515_v53 }
 0xac8   :  { %7340 = vmatprep.subr.mxu0 %v10051_v10 }
 0xac9   :  { %7341 = vmatpush3.msra.mxu0 %v6514_v7 }
 0xaca   :  { %7342 = vmatprep.subr.mxu0 %v10051_v10 }
 0xacb   :  { %7343 = vmatpush3.msra.mxu0 %v6513_v31 }
 0xacc   :  { %7344 = vmatprep.subr.mxu0 %v10051_v10 }
 0xacd   :  { %7345 = vmatpush3.msra.mxu0 %v6512_v62 }
 0xace   :  { %7346 = vmatprep.subr.mxu0 %v10051_v10 }
 0xacf   :  { %7347 = vmatpush3.msra.mxu0 %v6511_v23 }
 0xad0   :  { %7348 = vmatprep.subr.mxu0 %v10051_v10 }
 0xad1   :  { %7349 = vmatpush3.msra.mxu0 %v6510_v32 }
 0xad2   :  { %7350 = vmatprep.subr.mxu0 %v10051_v10 }
 0xad3   :  { %7351 = vmatpush3.msra.mxu0 %v6509_v43 }
 0xad4   :  { %7352 = vmatprep.subr.mxu0 %v10051_v10 }
 0xad5   :  { %7353 = vmatpush3.msra.mxu0 %v6508_v5 }
 0xad6   :  { %7354 = vmatprep.subr.mxu0 %v10051_v10 }
 0xad7   :  { %7355 = vmatpush3.msra.mxu0 %v6507_v59 }
 0xad8   :  { %7356 = vmatprep.subr.mxu0 %v10051_v10 }
 0xad9   :  { %7357 = vmatpush3.msra.mxu0 %v6506_v28 }
 0xada   :  { %7358 = vmatprep.subr.mxu0 %v10051_v10 }
 0xadb   :  { %7359 = vmatpush3.msra.mxu0 %v6505_v17 }
 0xadc   :  { %7360 = vmatprep.subr.mxu0 %v10051_v10 }
 0xadd   :  { %7361 = vmatpush3.msra.mxu0 %v6504_v56 }
 0xade   :  { %7362 = vmatprep.subr.mxu0 %v10051_v10 }
 0xadf   :  { %7363 = vmatpush3.msra.mxu0 %v6503_v55 }
 0xb60   :  { %v6217_v15 = vpop.f32.mrf.mxu0 }
 0xb61   :  { %v6294_v22 = vadd.f32 %v9738_v60, %v6217_v15 }
 0xb62   :  { %v7226_v36 = vpop.f32.mrf.mxu0  ;;  %v6489_v39 = vpop.f32.mrf.mxu1 }
 0xb64   :  { %v7331_v47 = vpop.f32.mrf.mxu1 }
 0xb80   :  { %v6384_v51 = vpop.f32.mrf.mxu0 }
 0xb81   :  { %v6388_v45 = vadd.f32 %v6384_v51, %v6294_v22 }
 0xb82   :  { %v7296_v19 = vpop.f32.mrf.mxu0 }
 0xb83   :  { %v6493_v11 = vadd.f32 %v6489_v39, %v6388_v45 }
 0xb85   :  { %v6501_v4 = vadd.f32 %v7105_v12, %v6493_v11 }
 0xb87   :  { %v6502_v14 = vmax.f32 %v6501_v4, 0.0 }
 0xb89   :  { %7365 = vmatmul.mubr.f32.vlgmr.msra.gmra.mxu0 %v6502_v14 }
 0xc49   :  { %v6592_v54 = vpop.f32.mrf.mxu0 }
 0xc4a   :  { %v6593_v10 = vadd.f32 %v7106_v41, %v6592_v54 }
 0xc4b   :  { %v7366_v57 = vpop.f32.mrf.mxu0 }
 0xc4c   :  { %6596 = vst [vmem:[#allocation20] sm:$0x3] %v6593_v10 }
 0xc4d   :  { %8286 = shalt.err (!%p8283_p12)
}
 0xc4e   :  { %6606 = dma.vmem_to_hbm [thread:$0]  %s6604_s9, 32, %s9798_s10, [#allocation5]  }
 0xc4f   :  { %8307 = dma.done.wait [#allocation5], 32  }
 0xc50   :  { %8308 = vsyncadd [#allocation5], 4294967264 }
 0xc51   :  { %6610 = vsyncpa [#allocation4], 1 }
 0xc52   :  { %6611 = vsyncpa [#allocation7], 1 }
 0xc53   :  { %6612 = vsyncpa [#allocation10], 1 }
 0xc54   :  { %6613 = vsyncpa [#allocation13], 1 }
 0xc55   :  { %6614 = vsyncpa [#allocation16], 1 }
 0xc56   :  { %6615 = vsyncpa [#allocation19], 1 }
 0xc57   :  { %6616 = vsyncpa [#allocation5], 1 }

</bundles_post_ra>
